<compile_context>
chip_gen: v6e
topology: v6e:2x2x1
jax: 0.10.0
libtpu: 0.0.40
codegen_flags: <defaults>
</compile_context>

<pallas_src>
import functools

import jax
import jax.numpy as jnp
from jax.experimental import pallas as pl
from jax.experimental.pallas import tpu as pltpu


# ----------------------------------------------------------------------------
# Pallas kernels
# ----------------------------------------------------------------------------
def _flow_kernel(a_ref, s_ref, w0_ref, w1_ref, sw_ref, sb_ref, cw_ref, cb_ref,
                 iw_ref, ib_ref, rw_ref, rb_ref, ewb_ref, ebb_ref, ews_ref,
                 ebs_ref, a0_ref, a1_ref, ls_ref, *, n_channels, n_layers, K,
                 T):
    """One whole WaveGlow flow for one batch element, fully VMEM-resident."""
    nc = n_channels

    def mm(w, x):
        # bf16 MXU inputs, f32 accumulate (v6e/v7x fast path; fine on v5e too).
        return jnp.dot(w.astype(jnp.bfloat16), x.astype(jnp.bfloat16),
                       preferred_element_type=jnp.float32)

    a = a_ref[0]                                        # (n_rem, T)

    # Invertible 1x1 conv, already split at the coupling boundary (f32: tiny).
    z0 = jnp.dot(w0_ref[...], a, preferred_element_type=jnp.float32)
    z1 = jnp.dot(w1_ref[...], a, preferred_element_type=jnp.float32)

    # WN: start conv + cond conv for all layers at once.
    h = mm(sw_ref[...], z0) + sb_ref[...]               # (nc, T)
    cond = mm(cw_ref[...], s_ref[0]) + cb_ref[...]      # (2*nc*n_layers, T)

    lane = jax.lax.broadcasted_iota(jnp.int32, (nc, T), 1)
    skip = jnp.zeros((nc, T), jnp.float32)
    for i in range(n_layers):                           # static unroll
        d = 2 ** i
        taps = []
        for k in range(K):                              # lane-shifted views
            off = (k - (K - 1) // 2) * d
            if off == 0:
                taps.append(h)
            else:
                xk = pltpu.roll(h, (-off) % T, 1)
                valid = jnp.logical_and(lane + off >= 0, lane + off < T)
                taps.append(jnp.where(valid, xk, 0.0))
        xstk = jnp.concatenate(taps, axis=0)            # (K*nc, T)
        # dilated conv = single MXU matmul with contraction K*nc
        acc = (mm(iw_ref[i], xstk) + ib_ref[i]
               + cond[i * 2 * nc:(i + 1) * 2 * nc])
        gated = jnp.tanh(acc[:nc]) * jax.nn.sigmoid(acc[nc:])
        rs = mm(rw_ref[i], gated) + rb_ref[i]           # (2*nc, T)
        if i < n_layers - 1:
            h = h + rs[:nc]
        skip = skip + rs[nc:]                           # last layer is skip-only
                                                        # (weights pre-padded)

    # end conv split into the (b, log_s) halves + affine coupling, fused.
    b_aff = mm(ewb_ref[...], skip) + ebb_ref[...]
    log_s = mm(ews_ref[...], skip) + ebs_ref[...]

    a0_ref[0] = z0
    a1_ref[0] = jnp.exp(log_s) * z1 + b_aff
    ls_ref[0] = log_s


def _upsample_mm_kernel(x_ref, w_ref, o_ref):
    o_ref[...] = jnp.dot(x_ref[...], w_ref[...],
                         preferred_element_type=jnp.float32)


# ----------------------------------------------------------------------------
# Wrappers around the Pallas kernels
# ----------------------------------------------------------------------------
def flow_step(a, s, fp, *, n_channels, n_layers, K):
    """Run one fused flow: returns (new audio (B, n_rem, T), log_s)."""
    B, n_rem, T = a.shape
    n_half = n_rem // 2
    n_cond = s.shape[1]
    two = 2 * n_channels
    kern = functools.partial(_flow_kernel, n_channels=n_channels,
                             n_layers=n_layers, K=K, T=T)

    def rep(shape):
        nd = len(shape)
        return pl.BlockSpec(shape, lambda b, _nd=nd: (0,) * _nd)

    def batched(c):
        return pl.BlockSpec((1, c, T), lambda b: (b, 0, 0))

    in_specs = [
        batched(n_rem),                      # audio
        batched(n_cond),                     # cond spect
        rep((n_half, n_rem)), rep((n_half, n_rem)),          # W0, W1
        rep((n_channels, n_half)), rep((n_channels, 1)),      # start
        rep((two * n_layers, n_cond)), rep((two * n_layers, 1)),  # cond conv
        rep((n_layers, two, K * n_channels)), rep((n_layers, two, 1)),  # in
        rep((n_layers, two, n_channels)), rep((n_layers, two, 1)),      # res
        rep((n_half, n_channels)), rep((n_half, 1)),          # end -> b
        rep((n_half, n_channels)), rep((n_half, 1)),          # end -> log_s
    ]
    out_specs = (batched(n_half), batched(n_half), batched(n_half))
    out_shape = tuple(jax.ShapeDtypeStruct((B, n_half, T), jnp.float32)
                      for _ in range(3))

    a0, a1, log_s = pl.pallas_call(
        kern,
        out_shape=out_shape,
        grid=(B,),
        in_specs=in_specs,
        out_specs=out_specs,
        compiler_params=pltpu.CompilerParams(dimension_semantics=("parallel",)),
    )(a, s, fp["W0"], fp["W1"], fp["start_w"], fp["start_b"],
      fp["cond_w"], fp["cond_b"], fp["in_w"], fp["in_b"],
      fp["res_w"], fp["res_b"], fp["end_w_b"], fp["end_b_b"],
      fp["end_w_s"], fp["end_b_s"])
    return jnp.concatenate([a0, a1], axis=1), log_s


def upsample_convtranspose(spect, w_aug, stride, time):
    """ConvTranspose1d(Cin, Cout, Kup, stride) as one lane-dense matmul.

    out[b, co, u*stride + p] = sum_{r, ci} x[b, ci, u-r] * w[ci, co, r*stride+p]
    -> rows = (batch, output-frame u), contraction = (tap r, Cin) + bias term,
       columns = (Cout, stride)  (lane-dense, single HBM write per element).
    """
    spect = spect.astype(jnp.float32)
    B, Cin, F = spect.shape
    Q, N = w_aug.shape
    R = (Q - 1) // Cin
    Cout = N // stride
    U = F + R - 1
    assert U * stride >= time

    xp = jnp.pad(spect, ((0, 0), (0, 0), (R - 1, R - 1)))
    wins = [xp[:, :, (R - 1 - r):(R - 1 - r) + U] for r in range(R)]
    X = jnp.stack(wins, axis=1).reshape(B, R * Cin, U)
    X = jnp.transpose(X, (0, 2, 1)).reshape(B * U, R * Cin)
    X = jnp.concatenate([X, jnp.ones((B * U, 1), jnp.float32)], axis=1)

    M = B * U
    TM = 8
    Mp = ((M + TM - 1) // TM) * TM
    if Mp != M:
        X = jnp.pad(X, ((0, Mp - M), (0, 0)))

    out = pl.pallas_call(
        _upsample_mm_kernel,
        out_shape=jax.ShapeDtypeStruct((Mp, N), jnp.float32),
        grid=(Mp // TM,),
        in_specs=[pl.BlockSpec((TM, Q), lambda m: (m, 0)),
                  pl.BlockSpec((Q, N), lambda m: (0, 0))],
        out_specs=pl.BlockSpec((TM, N), lambda m: (m, 0)),
        compiler_params=pltpu.CompilerParams(dimension_semantics=("parallel",)),
    )(X, w_aug)

    out = out[:M].reshape(B, U, Cout, stride)
    out = jnp.transpose(out, (0, 2, 1, 3)).reshape(B, Cout, U * stride)
    return out[:, :, :time]


# ----------------------------------------------------------------------------
# Parameter preparation (done once, outside the forward path)
# ----------------------------------------------------------------------------
def _prep_upsample(up_w, up_b, stride):
    Cin, Cout, Kup = up_w.shape
    R = Kup // stride
    assert R * stride == Kup
    w = up_w.astype(jnp.float32).reshape(Cin, Cout, R, stride)
    w = jnp.transpose(w, (2, 0, 1, 3)).reshape(R * Cin, Cout * stride)
    brow = jnp.repeat(up_b.astype(jnp.float32), stride)[None, :]
    return jnp.concatenate([w, brow], axis=0)            # (R*Cin + 1, Cout*stride)


def prep_params(params, cfg):
    nc, K, nl = cfg["n_channels"], cfg["kernel_size"], cfg["n_layers"]
    prepped = {
        "up_w_aug": _prep_upsample(params["up_w"], params["up_b"], stride=256),
        "convinv": [w.astype(jnp.float32) for w in params["convinv"]],
        "flows": [],
    }
    for k in range(cfg["n_flows"]):
        wn = params["wn"][k]
        n_half = wn["start_w"].shape[1]
        W = params["convinv"][k].astype(jnp.float32)

        in_w = jnp.stack([
            jnp.transpose(wn["in_w"][i], (0, 2, 1)).reshape(2 * nc, K * nc)
            for i in range(nl)]).astype(jnp.float32)
        in_b = jnp.stack([wn["in_b"][i].reshape(2 * nc, 1)
                          for i in range(nl)]).astype(jnp.float32)

        rws, rbs = [], []
        for i in range(nl):
            rw, rb = wn["res_w"][i], wn["res_b"][i]
            if rw.shape[0] == nc:  # last layer: skip-only -> pad residual half
                rw = jnp.concatenate([jnp.zeros((nc, nc), jnp.float32), rw], 0)
                rb = jnp.concatenate([jnp.zeros((nc,), jnp.float32), rb], 0)
            rws.append(rw.astype(jnp.float32))
            rbs.append(rb.reshape(2 * nc, 1).astype(jnp.float32))

        end_w = wn["end_w"].astype(jnp.float32)
        end_b = wn["end_b"].astype(jnp.float32)
        prepped["flows"].append(dict(
            W0=W[:n_half], W1=W[n_half:],
            start_w=wn["start_w"].astype(jnp.float32),
            start_b=wn["start_b"].reshape(-1, 1).astype(jnp.float32),
            cond_w=wn["cond_w"].astype(jnp.float32),
            cond_b=wn["cond_b"].reshape(-1, 1).astype(jnp.float32),
            in_w=in_w, in_b=in_b,
            res_w=jnp.stack(rws), res_b=jnp.stack(rbs),
            end_w_b=end_w[:n_half], end_b_b=end_b[:n_half].reshape(-1, 1),
            end_w_s=end_w[n_half:], end_b_s=end_b[n_half:].reshape(-1, 1),
        ))
    return prepped


# ----------------------------------------------------------------------------
# WaveGlow forward
# ----------------------------------------------------------------------------
def waveglow_forward(prepped, cfg, spect, audio):
    n_group, n_mel = cfg["n_group"], cfg["n_mel"]
    B = spect.shape[0]
    time = audio.shape[1]

    spect_up = upsample_convtranspose(spect, prepped["up_w_aug"],
                                      stride=256, time=time)

    T = time // n_group
    # spect.unfold(2, n_group, n_group).permute(0,2,1,3).view(...).permute(0,2,1)
    s = spect_up[:, :, :T * n_group].reshape(B, n_mel, T, n_group)
    s = jnp.transpose(s, (0, 2, 1, 3)).reshape(B, T, n_mel * n_group)
    s = jnp.transpose(s, (0, 2, 1))                       # (B, n_mel*n_group, T)
    # audio.unfold(1, n_group, n_group).permute(0, 2, 1)
    a = audio[:, :T * n_group].reshape(B, T, n_group)
    a = jnp.transpose(a, (0, 2, 1)).astype(jnp.float32)   # (B, n_group, T)

    # log_det_W hoisted out of the flow-to-flow critical path (data-independent).
    log_det_W_list = []
    for W in prepped["convinv"]:
        sign, logabs = jnp.linalg.slogdet(W)
        # torch.logdet: NaN for negative determinant.
        log_det_W_list.append(B * T * jnp.where(sign > 0, logabs, jnp.nan))

    output_audio, log_s_list = [], []
    for k in range(cfg["n_flows"]):
        if k % cfg["n_early_every"] == 0 and k > 0:
            output_audio.append(a[:, :cfg["n_early_size"], :])
            a = a[:, cfg["n_early_size"]:, :]
        a, log_s = flow_step(a, s, prepped["flows"][k],
                             n_channels=cfg["n_channels"],
                             n_layers=cfg["n_layers"], K=cfg["kernel_size"])
        log_s_list.append(log_s)
    output_audio.append(a)
    return jnp.concatenate(output_audio, axis=1), log_s_list, log_det_W_list


# ----------------------------------------------------------------------------
# Deterministic parameter init (shapes match the PyTorch __init__)
# ----------------------------------------------------------------------------
def init_params(key, cfg):
    n_mel, n_group = cfg["n_mel"], cfg["n_group"]
    n_flows, n_layers = cfg["n_flows"], cfg["n_layers"]
    n_channels, K = cfg["n_channels"], cfg["kernel_size"]

    keys = iter(jax.random.split(key, 4096))

    def nrm(shape, scale=0.1):
        return scale * jax.random.normal(next(keys), shape, jnp.float32)

    params = {
        # ConvTranspose1d(n_mel, n_mel, 1024, stride=256): weight (Cin, Cout, K)
        "up_w": nrm((n_mel, n_mel, 1024), 0.02),
        "up_b": nrm((n_mel,), 0.02),
        "convinv": [],
        "wn": [],
    }
    n_half = n_group // 2
    n_remaining = n_group
    for k in range(n_flows):
        if k % cfg["n_early_every"] == 0 and k > 0:
            n_half -= cfg["n_early_size"] // 2
            n_remaining -= cfg["n_early_size"]
        # Invertible1x1Conv weight: QR of a random matrix, det forced positive.
        Q, _ = jnp.linalg.qr(
            jax.random.normal(next(keys), (n_remaining, n_remaining),
                              jnp.float32))
        det = jnp.linalg.det(Q)
        Q = Q.at[:, 0].set(jnp.where(det < 0, -Q[:, 0], Q[:, 0]))
        params["convinv"].append(Q)
        # weight_norm at init is numerically the identity, so plain weights
        # reproduce the initialized forward pass exactly.
        wn = {
            "start_w": nrm((n_channels, n_half)),
            "start_b": nrm((n_channels,)),
            "cond_w": nrm((2 * n_channels * n_layers, n_mel * n_group)),
            "cond_b": nrm((2 * n_channels * n_layers,)),
            "in_w": [nrm((2 * n_channels, n_channels, K)) for _ in range(n_layers)],
            "in_b": [nrm((2 * n_channels,)) for _ in range(n_layers)],
            "res_w": [nrm(((2 * n_channels if i < n_layers - 1 else n_channels),
                           n_channels)) for i in range(n_layers)],
            "res_b": [nrm(((2 * n_channels if i < n_layers - 1 else n_channels),))
                      for i in range(n_layers)],
            # end conv is zero-initialized in the PyTorch module
            "end_w": jnp.zeros((2 * n_half, n_channels), jnp.float32),
            "end_b": jnp.zeros((2 * n_half,), jnp.float32),
        }
        params["wn"].append(wn)
    return params


# ----------------------------------------------------------------------------
if __name__ == "__main__":
    cfg = dict(
        n_mel=4,        # cfg.VOCODER.INPUT_DIM
        n_group=8,      # cfg.VOCODER.N_GROUP
        n_flows=4,      # cfg.VOCODER.N_FLOWS
        n_early_every=2,
        n_early_size=2,
        n_layers=2,     # cfg.VOCODER.N_LAYERS
        n_channels=16,  # cfg.VOCODER.N_CHANNELS
        kernel_size=3,  # cfg.VOCODER.KERNEL_SIZE
    )
    key = jax.random.PRNGKey(0)
    k_param, k_spect, k_audio = jax.random.split(key, 3)
    params = init_params(k_param, cfg)
    prepped = prep_params(params, cfg)

    B, frames, time = 2, 2, 1024  # upsampled spect len = 5*256 >= 1024
    spect = jax.random.normal(k_spect, (B, cfg["n_mel"], frames), jnp.float32)
    audio = jax.random.normal(k_audio, (B, time), jnp.float32)

    fwd = jax.jit(lambda pp, sp, au: waveglow_forward(pp, cfg, sp, au))
    out, log_s_list, log_det_W_list = fwd(prepped, spect, audio)
    jax.block_until_ready(out)
    for x in log_s_list + log_det_W_list:
        jax.block_until_ready(x)

    T_groups = time // cfg["n_group"]
    assert out.shape == (B, cfg["n_group"], T_groups)
    assert len(log_s_list) == cfg["n_flows"]
    assert len(log_det_W_list) == cfg["n_flows"]
    print("KERNEL_OK")
</pallas_src>

<mosaic_0001>
module attributes {stable_mosaic.version = 11 : i64} {
  func.func @_upsample_mm_kernel(%arg0: i32, %arg1: memref<8x17xf32, #tpu.memory_space<vmem>>, %arg2: memref<17x1024xf32, #tpu.memory_space<vmem>>, %arg3: memref<8x1024xf32, #tpu.memory_space<vmem>>) attributes {dimension_semantics = [#tpu.dimension_semantics<parallel>], iteration_bounds = array<i64: 2>, scalar_prefetch = 0 : i64, scratch_operands = 0 : i64, tpu.core_type = #tpu.core_type<tc>, window_params = [{transform_indices = @transform_0, window_bounds = array<i64: 8, 17>}, {pipeline_mode = #tpu.pipeline_mode<synchronous>, transform_indices = @transform_1, window_bounds = array<i64: 17, 1024>}, {transform_indices = @transform_2, window_bounds = array<i64: 8, 1024>}]} {
    %c0 = arith.constant 0 : index
    %c0_0 = arith.constant 0 : index
    %0 = vector.load %arg1[%c0, %c0_0] : memref<8x17xf32, #tpu.memory_space<vmem>>, vector<8x17xf32>
    %c0_1 = arith.constant 0 : index
    %c0_2 = arith.constant 0 : index
    %1 = vector.load %arg2[%c0_1, %c0_2] : memref<17x1024xf32, #tpu.memory_space<vmem>>, vector<17x1024xf32>
    %cst = arith.constant dense<0.000000e+00> : vector<8x1024xf32>
    %2 = tpu.matmul %0, %1, %cst {dimension_numbers = #tpu.dot_dimension_numbers<[1], [0], [0], [1], [0, 0, 1, 1], [], []>} : vector<8x17xf32>, vector<17x1024xf32>, vector<8x1024xf32> -> vector<8x1024xf32>
    %c0_3 = arith.constant 0 : index
    %c0_4 = arith.constant 0 : index
    %3 = vector.load %arg3[%c0_3, %c0_4] : memref<8x1024xf32, #tpu.memory_space<vmem>>, vector<8x1024xf32>
    tpu.vector_store %arg3[%c0_3, %c0_4], %2 {strides = array<i32>} : memref<8x1024xf32, #tpu.memory_space<vmem>>, vector<8x1024xf32>,
    return
  }
  func.func @transform_0(%arg0: i32) -> (i32, i32) {
    %c0_i32 = arith.constant 0 : i32
    %c0_i32_0 = arith.constant 0 : i32
    return %arg0, %c0_i32 : i32, i32
  }
  func.func @transform_1(%arg0: i32) -> (i32, i32) {
    %c0_i32 = arith.constant 0 : i32
    %c0_i32_0 = arith.constant 0 : i32
    %c0_i32_1 = arith.constant 0 : i32
    return %c0_i32, %c0_i32_0 : i32, i32
  }
  func.func @transform_2(%arg0: i32) -> (i32, i32) {
    %c0_i32 = arith.constant 0 : i32
    %c0_i32_0 = arith.constant 0 : i32
    return %arg0, %c0_i32 : i32, i32
  }
}

module attributes {stable_mosaic.version = 11 : i64} {
  func.func @_flow_kernel(%arg0: i32, %arg1: memref<1x8x128xf32, #tpu.memory_space<vmem>>, %arg2: memref<1x32x128xf32, #tpu.memory_space<vmem>>, %arg3: memref<4x8xf32, #tpu.memory_space<vmem>>, %arg4: memref<4x8xf32, #tpu.memory_space<vmem>>, %arg5: memref<16x4xf32, #tpu.memory_space<vmem>>, %arg6: memref<16x1xf32, #tpu.memory_space<vmem>>, %arg7: memref<64x32xf32, #tpu.memory_space<vmem>>, %arg8: memref<64x1xf32, #tpu.memory_space<vmem>>, %arg9: memref<2x32x48xf32, #tpu.memory_space<vmem>>, %arg10: memref<2x32x1xf32, #tpu.memory_space<vmem>>, %arg11: memref<2x32x16xf32, #tpu.memory_space<vmem>>, %arg12: memref<2x32x1xf32, #tpu.memory_space<vmem>>, %arg13: memref<4x16xf32, #tpu.memory_space<vmem>>, %arg14: memref<4x1xf32, #tpu.memory_space<vmem>>, %arg15: memref<4x16xf32, #tpu.memory_space<vmem>>, %arg16: memref<4x1xf32, #tpu.memory_space<vmem>>, %arg17: memref<1x4x128xf32, #tpu.memory_space<vmem>>, %arg18: memref<1x4x128xf32, #tpu.memory_space<vmem>>, %arg19: memref<1x4x128xf32, #tpu.memory_space<vmem>>) attributes {dimension_semantics = [#tpu.dimension_semantics<parallel>], iteration_bounds = array<i64: 2>, scalar_prefetch = 0 : i64, scratch_operands = 0 : i64, tpu.core_type = #tpu.core_type<tc>, window_params = [{transform_indices = @transform_0, window_bounds = array<i64: 1, 8, 128>}, {transform_indices = @transform_1, window_bounds = array<i64: 1, 32, 128>}, {pipeline_mode = #tpu.pipeline_mode<synchronous>, transform_indices = @transform_2, window_bounds = array<i64: 4, 8>}, {pipeline_mode = #tpu.pipeline_mode<synchronous>, transform_indices = @transform_3, window_bounds = array<i64: 4, 8>}, {pipeline_mode = #tpu.pipeline_mode<synchronous>, transform_indices = @transform_4, window_bounds = array<i64: 16, 4>}, {pipeline_mode = #tpu.pipeline_mode<synchronous>, transform_indices = @transform_5, window_bounds = array<i64: 16, 1>}, {pipeline_mode = #tpu.pipeline_mode<synchronous>, transform_indices = @transform_6, window_bounds = array<i64: 64, 32>}, {pipeline_mode = #tpu.pipeline_mode<synchronous>, transform_indices = @transform_7, window_bounds = array<i64: 64, 1>}, {pipeline_mode = #tpu.pipeline_mode<synchronous>, transform_indices = @transform_8, window_bounds = array<i64: 2, 32, 48>}, {pipeline_mode = #tpu.pipeline_mode<synchronous>, transform_indices = @transform_9, window_bounds = array<i64: 2, 32, 1>}, {pipeline_mode = #tpu.pipeline_mode<synchronous>, transform_indices = @transform_10, window_bounds = array<i64: 2, 32, 16>}, {pipeline_mode = #tpu.pipeline_mode<synchronous>, transform_indices = @transform_11, window_bounds = array<i64: 2, 32, 1>}, {pipeline_mode = #tpu.pipeline_mode<synchronous>, transform_indices = @transform_12, window_bounds = array<i64: 4, 16>}, {pipeline_mode = #tpu.pipeline_mode<synchronous>, transform_indices = @transform_13, window_bounds = array<i64: 4, 1>}, {pipeline_mode = #tpu.pipeline_mode<synchronous>, transform_indices = @transform_14, window_bounds = array<i64: 4, 16>}, {pipeline_mode = #tpu.pipeline_mode<synchronous>, transform_indices = @transform_15, window_bounds = array<i64: 4, 1>}, {transform_indices = @transform_16, window_bounds = array<i64: 1, 4, 128>}, {transform_indices = @transform_17, window_bounds = array<i64: 1, 4, 128>}, {transform_indices = @transform_18, window_bounds = array<i64: 1, 4, 128>}]} {
    %c0 = arith.constant 0 : index
    %c0_0 = arith.constant 0 : index
    %c0_1 = arith.constant 0 : index
    %0 = vector.load %arg1[%c0, %c0_0, %c0_1] : memref<1x8x128xf32, #tpu.memory_space<vmem>>, vector<1x8x128xf32>
    %1 = vector.shape_cast %0 : vector<1x8x128xf32> to vector<8x128xf32>
    %c0_2 = arith.constant 0 : index
    %c0_3 = arith.constant 0 : index
    %2 = vector.load %arg3[%c0_2, %c0_3] : memref<4x8xf32, #tpu.memory_space<vmem>>, vector<4x8xf32>
    %cst = arith.constant dense<0.000000e+00> : vector<4x128xf32>
    %3 = tpu.matmul %2, %1, %cst {dimension_numbers = #tpu.dot_dimension_numbers<[1], [0], [0], [1], [0, 0, 1, 1], [], []>} : vector<4x8xf32>, vector<8x128xf32>, vector<4x128xf32> -> vector<4x128xf32>
    %c0_4 = arith.constant 0 : index
    %c0_5 = arith.constant 0 : index
    %4 = vector.load %arg4[%c0_4, %c0_5] : memref<4x8xf32, #tpu.memory_space<vmem>>, vector<4x8xf32>
    %cst_6 = arith.constant dense<0.000000e+00> : vector<4x128xf32>
    %5 = tpu.matmul %4, %1, %cst_6 {dimension_numbers = #tpu.dot_dimension_numbers<[1], [0], [0], [1], [0, 0, 1, 1], [], []>} : vector<4x8xf32>, vector<8x128xf32>, vector<4x128xf32> -> vector<4x128xf32>
    %c0_7 = arith.constant 0 : index
    %c0_8 = arith.constant 0 : index
    %6 = vector.load %arg5[%c0_7, %c0_8] : memref<16x4xf32, #tpu.memory_space<vmem>>, vector<16x4xf32>
    %7 = arith.truncf %6 : vector<16x4xf32> to vector<16x4xbf16>
    %8 = arith.truncf %3 : vector<4x128xf32> to vector<4x128xbf16>
    %cst_9 = arith.constant dense<0.000000e+00> : vector<16x128xf32>
    %9 = tpu.matmul %7, %8, %cst_9 {dimension_numbers = #tpu.dot_dimension_numbers<[1], [0], [0], [1], [0, 0, 1, 1], [], []>} : vector<16x4xbf16>, vector<4x128xbf16>, vector<16x128xf32> -> vector<16x128xf32>
    %c0_10 = arith.constant 0 : index
    %c0_11 = arith.constant 0 : index
    %10 = vector.load %arg6[%c0_10, %c0_11] : memref<16x1xf32, #tpu.memory_space<vmem>>, vector<16x1xf32>
    %11 = vector.broadcast %10 : vector<16x1xf32> to vector<16x128xf32>
    %12 = arith.addf %9, %11 : vector<16x128xf32>
    %c0_12 = arith.constant 0 : index
    %c0_13 = arith.constant 0 : index
    %13 = vector.load %arg7[%c0_12, %c0_13] : memref<64x32xf32, #tpu.memory_space<vmem>>, vector<64x32xf32>
    %c0_14 = arith.constant 0 : index
    %c0_15 = arith.constant 0 : index
    %c0_16 = arith.constant 0 : index
    %14 = vector.load %arg2[%c0_14, %c0_15, %c0_16] : memref<1x32x128xf32, #tpu.memory_space<vmem>>, vector<1x32x128xf32>
    %15 = vector.shape_cast %14 : vector<1x32x128xf32> to vector<32x128xf32>
    %16 = arith.truncf %13 : vector<64x32xf32> to vector<64x32xbf16>
    %17 = arith.truncf %15 : vector<32x128xf32> to vector<32x128xbf16>
    %cst_17 = arith.constant dense<0.000000e+00> : vector<64x128xf32>
    %18 = tpu.matmul %16, %17, %cst_17 {dimension_numbers = #tpu.dot_dimension_numbers<[1], [0], [0], [1], [0, 0, 1, 1], [], []>} : vector<64x32xbf16>, vector<32x128xbf16>, vector<64x128xf32> -> vector<64x128xf32>
    %c0_18 = arith.constant 0 : index
    %c0_19 = arith.constant 0 : index
    %19 = vector.load %arg8[%c0_18, %c0_19] : memref<64x1xf32, #tpu.memory_space<vmem>>, vector<64x1xf32>
    %20 = vector.broadcast %19 : vector<64x1xf32> to vector<64x128xf32>
    %21 = arith.addf %18, %20 : vector<64x128xf32>
    %22 = tpu.iota {dimensions = array<i32: 1>} : vector<16x128xi32>
    %cst_20 = arith.constant 0.000000e+00 : f32
    %23 = vector.broadcast %cst_20 : f32 to vector<16x128xf32>
    %c1_i32 = arith.constant 1 : i32
    %24 = tpu.dynamic_rotate %12 by %c1_i32 dim 1 : vector<16x128xf32>, i32 -> vector<16x128xf32>
    %c-1_i32 = arith.constant -1 : i32
    %25 = vector.broadcast %c-1_i32 : i32 to vector<16x128xi32>
    %26 = arith.addi %22, %25 : vector<16x128xi32>
    %c0_i32 = arith.constant 0 : i32
    %27 = vector.broadcast %c0_i32 : i32 to vector<16x128xi32>
    %28 = arith.cmpi sge, %26, %27 : vector<16x128xi32>
    %c-1_i32_21 = arith.constant -1 : i32
    %29 = vector.broadcast %c-1_i32_21 : i32 to vector<16x128xi32>
    %30 = arith.addi %22, %29 : vector<16x128xi32>
    %c128_i32 = arith.constant 128 : i32
    %31 = vector.broadcast %c128_i32 : i32 to vector<16x128xi32>
    %32 = arith.cmpi slt, %30, %31 : vector<16x128xi32>
    %33 = arith.andi %28, %32 : vector<16x128xi1>
    %cst_22 = arith.constant 0.000000e+00 : f32
    %34 = vector.broadcast %cst_22 : f32 to vector<16x128xf32>
    %35 = arith.select %33, %24, %34 : vector<16x128xi1>, vector<16x128xf32>
    %c127_i32 = arith.constant 127 : i32
    %36 = tpu.dynamic_rotate %12 by %c127_i32 dim 1 : vector<16x128xf32>, i32 -> vector<16x128xf32>
    %c1_i32_23 = arith.constant 1 : i32
    %37 = vector.broadcast %c1_i32_23 : i32 to vector<16x128xi32>
    %38 = arith.addi %22, %37 : vector<16x128xi32>
    %c0_i32_24 = arith.constant 0 : i32
    %39 = vector.broadcast %c0_i32_24 : i32 to vector<16x128xi32>
    %40 = arith.cmpi sge, %38, %39 : vector<16x128xi32>
    %c1_i32_25 = arith.constant 1 : i32
    %41 = vector.broadcast %c1_i32_25 : i32 to vector<16x128xi32>
    %42 = arith.addi %22, %41 : vector<16x128xi32>
    %c128_i32_26 = arith.constant 128 : i32
    %43 = vector.broadcast %c128_i32_26 : i32 to vector<16x128xi32>
    %44 = arith.cmpi slt, %42, %43 : vector<16x128xi32>
    %45 = arith.andi %40, %44 : vector<16x128xi1>
    %cst_27 = arith.constant 0.000000e+00 : f32
    %46 = vector.broadcast %cst_27 : f32 to vector<16x128xf32>
    %47 = arith.select %45, %36, %46 : vector<16x128xi1>, vector<16x128xf32>
    %48 = tpu.concatenate %35, %12, %47 in 0 : vector<16x128xf32>, vector<16x128xf32>, vector<16x128xf32> -> vector<48x128xf32>
    %c0_28 = arith.constant 0 : index
    %c0_29 = arith.constant 0 : index
    %c0_30 = arith.constant 0 : index
    %49 = vector.load %arg9[%c0_28, %c0_29, %c0_30] : memref<2x32x48xf32, #tpu.memory_space<vmem>>, vector<1x32x48xf32>
    %50 = vector.shape_cast %49 : vector<1x32x48xf32> to vector<32x48xf32>
    %51 = arith.truncf %50 : vector<32x48xf32> to vector<32x48xbf16>
    %52 = arith.truncf %48 : vector<48x128xf32> to vector<48x128xbf16>
    %cst_31 = arith.constant dense<0.000000e+00> : vector<32x128xf32>
    %53 = tpu.matmul %51, %52, %cst_31 {dimension_numbers = #tpu.dot_dimension_numbers<[1], [0], [0], [1], [0, 0, 1, 1], [], []>} : vector<32x48xbf16>, vector<48x128xbf16>, vector<32x128xf32> -> vector<32x128xf32>
    %c0_32 = arith.constant 0 : index
    %c0_33 = arith.constant 0 : index
    %c0_34 = arith.constant 0 : index
    %54 = vector.load %arg10[%c0_32, %c0_33, %c0_34] : memref<2x32x1xf32, #tpu.memory_space<vmem>>, vector<1x32x1xf32>
    %55 = vector.shape_cast %54 : vector<1x32x1xf32> to vector<32x1xf32>
    %56 = vector.broadcast %55 : vector<32x1xf32> to vector<32x128xf32>
    %57 = arith.addf %53, %56 : vector<32x128xf32>
    %58 = vector.extract_strided_slice %21 {offsets = [0, 0], sizes = [32, 128], strides = [1, 1]} : vector<64x128xf32> to vector<32x128xf32>
    %59 = arith.addf %57, %58 : vector<32x128xf32>
    %60 = vector.extract_strided_slice %59 {offsets = [0, 0], sizes = [16, 128], strides = [1, 1]} : vector<32x128xf32> to vector<16x128xf32>
    %61 = math.tanh %60 : vector<16x128xf32>
    %62 = vector.extract_strided_slice %59 {offsets = [16, 0], sizes = [16, 128], strides = [1, 1]} : vector<32x128xf32> to vector<16x128xf32>
    %63 = arith.negf %62 : vector<16x128xf32>
    %64 = math.exp %63 : vector<16x128xf32>
    %cst_35 = arith.constant 1.000000e+00 : f32
    %65 = vector.broadcast %cst_35 : f32 to vector<16x128xf32>
    %66 = arith.addf %65, %64 : vector<16x128xf32>
    %67 = arith.divf %65, %66 : vector<16x128xf32>
    %68 = arith.mulf %61, %67 : vector<16x128xf32>
    %c0_36 = arith.constant 0 : index
    %c0_37 = arith.constant 0 : index
    %c0_38 = arith.constant 0 : index
    %69 = vector.load %arg11[%c0_36, %c0_37, %c0_38] : memref<2x32x16xf32, #tpu.memory_space<vmem>>, vector<1x32x16xf32>
    %70 = vector.shape_cast %69 : vector<1x32x16xf32> to vector<32x16xf32>
    %71 = arith.truncf %70 : vector<32x16xf32> to vector<32x16xbf16>
    %72 = arith.truncf %68 : vector<16x128xf32> to vector<16x128xbf16>
    %cst_39 = arith.constant dense<0.000000e+00> : vector<32x128xf32>
    %73 = tpu.matmul %71, %72, %cst_39 {dimension_numbers = #tpu.dot_dimension_numbers<[1], [0], [0], [1], [0, 0, 1, 1], [], []>} : vector<32x16xbf16>, vector<16x128xbf16>, vector<32x128xf32> -> vector<32x128xf32>
    %c0_40 = arith.constant 0 : index
    %c0_41 = arith.constant 0 : index
    %c0_42 = arith.constant 0 : index
    %74 = vector.load %arg12[%c0_40, %c0_41, %c0_42] : memref<2x32x1xf32, #tpu.memory_space<vmem>>, vector<1x32x1xf32>
    %75 = vector.shape_cast %74 : vector<1x32x1xf32> to vector<32x1xf32>
    %76 = vector.broadcast %75 : vector<32x1xf32> to vector<32x128xf32>
    %77 = arith.addf %73, %76 : vector<32x128xf32>
    %78 = vector.extract_strided_slice %77 {offsets = [0, 0], sizes = [16, 128], strides = [1, 1]} : vector<32x128xf32> to vector<16x128xf32>
    %79 = arith.addf %12, %78 : vector<16x128xf32>
    %80 = vector.extract_strided_slice %77 {offsets = [16, 0], sizes = [16, 128], strides = [1, 1]} : vector<32x128xf32> to vector<16x128xf32>
    %81 = arith.addf %23, %80 : vector<16x128xf32>
    %c2_i32 = arith.constant 2 : i32
    %82 = tpu.dynamic_rotate %79 by %c2_i32 dim 1 : vector<16x128xf32>, i32 -> vector<16x128xf32>
    %c-2_i32 = arith.constant -2 : i32
    %83 = vector.broadcast %c-2_i32 : i32 to vector<16x128xi32>
    %84 = arith.addi %22, %83 : vector<16x128xi32>
    %c0_i32_43 = arith.constant 0 : i32
    %85 = vector.broadcast %c0_i32_43 : i32 to vector<16x128xi32>
    %86 = arith.cmpi sge, %84, %85 : vector<16x128xi32>
    %c-2_i32_44 = arith.constant -2 : i32
    %87 = vector.broadcast %c-2_i32_44 : i32 to vector<16x128xi32>
    %88 = arith.addi %22, %87 : vector<16x128xi32>
    %c128_i32_45 = arith.constant 128 : i32
    %89 = vector.broadcast %c128_i32_45 : i32 to vector<16x128xi32>
    %90 = arith.cmpi slt, %88, %89 : vector<16x128xi32>
    %91 = arith.andi %86, %90 : vector<16x128xi1>
    %cst_46 = arith.constant 0.000000e+00 : f32
    %92 = vector.broadcast %cst_46 : f32 to vector<16x128xf32>
    %93 = arith.select %91, %82, %92 : vector<16x128xi1>, vector<16x128xf32>
    %c126_i32 = arith.constant 126 : i32
    %94 = tpu.dynamic_rotate %79 by %c126_i32 dim 1 : vector<16x128xf32>, i32 -> vector<16x128xf32>
    %c2_i32_47 = arith.constant 2 : i32
    %95 = vector.broadcast %c2_i32_47 : i32 to vector<16x128xi32>
    %96 = arith.addi %22, %95 : vector<16x128xi32>
    %c0_i32_48 = arith.constant 0 : i32
    %97 = vector.broadcast %c0_i32_48 : i32 to vector<16x128xi32>
    %98 = arith.cmpi sge, %96, %97 : vector<16x128xi32>
    %c2_i32_49 = arith.constant 2 : i32
    %99 = vector.broadcast %c2_i32_49 : i32 to vector<16x128xi32>
    %100 = arith.addi %22, %99 : vector<16x128xi32>
    %c128_i32_50 = arith.constant 128 : i32
    %101 = vector.broadcast %c128_i32_50 : i32 to vector<16x128xi32>
    %102 = arith.cmpi slt, %100, %101 : vector<16x128xi32>
    %103 = arith.andi %98, %102 : vector<16x128xi1>
    %cst_51 = arith.constant 0.000000e+00 : f32
    %104 = vector.broadcast %cst_51 : f32 to vector<16x128xf32>
    %105 = arith.select %103, %94, %104 : vector<16x128xi1>, vector<16x128xf32>
    %106 = tpu.concatenate %93, %79, %105 in 0 : vector<16x128xf32>, vector<16x128xf32>, vector<16x128xf32> -> vector<48x128xf32>
    %c1 = arith.constant 1 : index
    %c0_52 = arith.constant 0 : index
    %c0_53 = arith.constant 0 : index
    %107 = vector.load %arg9[%c1, %c0_52, %c0_53] : memref<2x32x48xf32, #tpu.memory_space<vmem>>, vector<1x32x48xf32>
    %108 = vector.shape_cast %107 : vector<1x32x48xf32> to vector<32x48xf32>
    %109 = arith.truncf %108 : vector<32x48xf32> to vector<32x48xbf16>
    %110 = arith.truncf %106 : vector<48x128xf32> to vector<48x128xbf16>
    %cst_54 = arith.constant dense<0.000000e+00> : vector<32x128xf32>
    %111 = tpu.matmul %109, %110, %cst_54 {dimension_numbers = #tpu.dot_dimension_numbers<[1], [0], [0], [1], [0, 0, 1, 1], [], []>} : vector<32x48xbf16>, vector<48x128xbf16>, vector<32x128xf32> -> vector<32x128xf32>
    %c1_55 = arith.constant 1 : index
    %c0_56 = arith.constant 0 : index
    %c0_57 = arith.constant 0 : index
    %112 = vector.load %arg10[%c1_55, %c0_56, %c0_57] : memref<2x32x1xf32, #tpu.memory_space<vmem>>, vector<1x32x1xf32>
    %113 = vector.shape_cast %112 : vector<1x32x1xf32> to vector<32x1xf32>
    %114 = vector.broadcast %113 : vector<32x1xf32> to vector<32x128xf32>
    %115 = arith.addf %111, %114 : vector<32x128xf32>
    %116 = vector.extract_strided_slice %21 {offsets = [32, 0], sizes = [32, 128], strides = [1, 1]} : vector<64x128xf32> to vector<32x128xf32>
    %117 = arith.addf %115, %116 : vector<32x128xf32>
    %118 = vector.extract_strided_slice %117 {offsets = [0, 0], sizes = [16, 128], strides = [1, 1]} : vector<32x128xf32> to vector<16x128xf32>
    %119 = math.tanh %118 : vector<16x128xf32>
    %120 = vector.extract_strided_slice %117 {offsets = [16, 0], sizes = [16, 128], strides = [1, 1]} : vector<32x128xf32> to vector<16x128xf32>
    %121 = arith.negf %120 : vector<16x128xf32>
    %122 = math.exp %121 : vector<16x128xf32>
    %cst_58 = arith.constant 1.000000e+00 : f32
    %123 = vector.broadcast %cst_58 : f32 to vector<16x128xf32>
    %124 = arith.addf %123, %122 : vector<16x128xf32>
    %125 = arith.divf %123, %124 : vector<16x128xf32>
    %126 = arith.mulf %119, %125 : vector<16x128xf32>
    %c1_59 = arith.constant 1 : index
    %c0_60 = arith.constant 0 : index
    %c0_61 = arith.constant 0 : index
    %127 = vector.load %arg11[%c1_59, %c0_60, %c0_61] : memref<2x32x16xf32, #tpu.memory_space<vmem>>, vector<1x32x16xf32>
    %128 = vector.shape_cast %127 : vector<1x32x16xf32> to vector<32x16xf32>
    %129 = arith.truncf %128 : vector<32x16xf32> to vector<32x16xbf16>
    %130 = arith.truncf %126 : vector<16x128xf32> to vector<16x128xbf16>
    %cst_62 = arith.constant dense<0.000000e+00> : vector<32x128xf32>
    %131 = tpu.matmul %129, %130, %cst_62 {dimension_numbers = #tpu.dot_dimension_numbers<[1], [0], [0], [1], [0, 0, 1, 1], [], []>} : vector<32x16xbf16>, vector<16x128xbf16>, vector<32x128xf32> -> vector<32x128xf32>
    %c1_63 = arith.constant 1 : index
    %c0_64 = arith.constant 0 : index
    %c0_65 = arith.constant 0 : index
    %132 = vector.load %arg12[%c1_63, %c0_64, %c0_65] : memref<2x32x1xf32, #tpu.memory_space<vmem>>, vector<1x32x1xf32>
    %133 = vector.shape_cast %132 : vector<1x32x1xf32> to vector<32x1xf32>
    %134 = vector.broadcast %133 : vector<32x1xf32> to vector<32x128xf32>
    %135 = arith.addf %131, %134 : vector<32x128xf32>
    %136 = vector.extract_strided_slice %135 {offsets = [16, 0], sizes = [16, 128], strides = [1, 1]} : vector<32x128xf32> to vector<16x128xf32>
    %137 = arith.addf %81, %136 : vector<16x128xf32>
    %c0_66 = arith.constant 0 : index
    %c0_67 = arith.constant 0 : index
    %138 = vector.load %arg13[%c0_66, %c0_67] : memref<4x16xf32, #tpu.memory_space<vmem>>, vector<4x16xf32>
    %139 = arith.truncf %138 : vector<4x16xf32> to vector<4x16xbf16>
    %140 = arith.truncf %137 : vector<16x128xf32> to vector<16x128xbf16>
    %cst_68 = arith.constant dense<0.000000e+00> : vector<4x128xf32>
    %141 = tpu.matmul %139, %140, %cst_68 {dimension_numbers = #tpu.dot_dimension_numbers<[1], [0], [0], [1], [0, 0, 1, 1], [], []>} : vector<4x16xbf16>, vector<16x128xbf16>, vector<4x128xf32> -> vector<4x128xf32>
    %c0_69 = arith.constant 0 : index
    %c0_70 = arith.constant 0 : index
    %142 = vector.load %arg14[%c0_69, %c0_70] : memref<4x1xf32, #tpu.memory_space<vmem>>, vector<4x1xf32>
    %143 = vector.broadcast %142 : vector<4x1xf32> to vector<4x128xf32>
    %144 = arith.addf %141, %143 : vector<4x128xf32>
    %c0_71 = arith.constant 0 : index
    %c0_72 = arith.constant 0 : index
    %145 = vector.load %arg15[%c0_71, %c0_72] : memref<4x16xf32, #tpu.memory_space<vmem>>, vector<4x16xf32>
    %146 = arith.truncf %145 : vector<4x16xf32> to vector<4x16xbf16>
    %147 = arith.truncf %137 : vector<16x128xf32> to vector<16x128xbf16>
    %cst_73 = arith.constant dense<0.000000e+00> : vector<4x128xf32>
    %148 = tpu.matmul %146, %147, %cst_73 {dimension_numbers = #tpu.dot_dimension_numbers<[1], [0], [0], [1], [0, 0, 1, 1], [], []>} : vector<4x16xbf16>, vector<16x128xbf16>, vector<4x128xf32> -> vector<4x128xf32>
    %c0_74 = arith.constant 0 : index
    %c0_75 = arith.constant 0 : index
    %149 = vector.load %arg16[%c0_74, %c0_75] : memref<4x1xf32, #tpu.memory_space<vmem>>, vector<4x1xf32>
    %150 = vector.broadcast %149 : vector<4x1xf32> to vector<4x128xf32>
    %151 = arith.addf %148, %150 : vector<4x128xf32>
    %c0_76 = arith.constant 0 : index
    %c0_77 = arith.constant 0 : index
    %c0_78 = arith.constant 0 : index
    %152 = vector.load %arg17[%c0_76, %c0_77, %c0_78] : memref<1x4x128xf32, #tpu.memory_space<vmem>>, vector<1x4x128xf32>
    %153 = vector.shape_cast %152 : vector<1x4x128xf32> to vector<4x128xf32>
    %154 = vector.shape_cast %3 : vector<4x128xf32> to vector<1x4x128xf32>
    tpu.vector_store %arg17[%c0_76, %c0_77, %c0_78], %154 {strides = array<i32>} : memref<1x4x128xf32, #tpu.memory_space<vmem>>, vector<1x4x128xf32>,
    %155 = math.exp %151 : vector<4x128xf32>
    %156 = arith.mulf %155, %5 : vector<4x128xf32>
    %157 = arith.addf %156, %144 : vector<4x128xf32>
    %c0_79 = arith.constant 0 : index
    %c0_80 = arith.constant 0 : index
    %c0_81 = arith.constant 0 : index
    %158 = vector.load %arg18[%c0_79, %c0_80, %c0_81] : memref<1x4x128xf32, #tpu.memory_space<vmem>>, vector<1x4x128xf32>
    %159 = vector.shape_cast %158 : vector<1x4x128xf32> to vector<4x128xf32>
    %160 = vector.shape_cast %157 : vector<4x128xf32> to vector<1x4x128xf32>
    tpu.vector_store %arg18[%c0_79, %c0_80, %c0_81], %160 {strides = array<i32>} : memref<1x4x128xf32, #tpu.memory_space<vmem>>, vector<1x4x128xf32>,
    %c0_82 = arith.constant 0 : index
    %c0_83 = arith.constant 0 : index
    %c0_84 = arith.constant 0 : index
    %161 = vector.load %arg19[%c0_82, %c0_83, %c0_84] : memref<1x4x128xf32, #tpu.memory_space<vmem>>, vector<1x4x128xf32>
    %162 = vector.shape_cast %161 : vector<1x4x128xf32> to vector<4x128xf32>
    %163 = vector.shape_cast %151 : vector<4x128xf32> to vector<1x4x128xf32>
    tpu.vector_store %arg19[%c0_82, %c0_83, %c0_84], %163 {strides = array<i32>} : memref<1x4x128xf32, #tpu.memory_space<vmem>>, vector<1x4x128xf32>,
    return
  }
  func.func @transform_0(%arg0: i32) -> (i32, i32, i32) {
    %c0_i32 = arith.constant 0 : i32
    %c0_i32_0 = arith.constant 0 : i32
    %c0_i32_1 = arith.constant 0 : i32
    return %arg0, %c0_i32, %c0_i32_0 : i32, i32, i32
  }
  func.func @transform_1(%arg0: i32) -> (i32, i32, i32) {
    %c0_i32 = arith.constant 0 : i32
    %c0_i32_0 = arith.constant 0 : i32
    %c0_i32_1 = arith.constant 0 : i32
    return %arg0, %c0_i32, %c0_i32_0 : i32, i32, i32
  }
  func.func @transform_2(%arg0: i32) -> (i32, i32) {
    %c0_i32 = arith.constant 0 : i32
    %c0_i32_0 = arith.constant 0 : i32
    %c0_i32_1 = arith.constant 0 : i32
    return %c0_i32, %c0_i32_0 : i32, i32
  }
  func.func @transform_3(%arg0: i32) -> (i32, i32) {
    %c0_i32 = arith.constant 0 : i32
    %c0_i32_0 = arith.constant 0 : i32
    %c0_i32_1 = arith.constant 0 : i32
    return %c0_i32, %c0_i32_0 : i32, i32
  }
  func.func @transform_4(%arg0: i32) -> (i32, i32) {
    %c0_i32 = arith.constant 0 : i32
    %c0_i32_0 = arith.constant 0 : i32
    %c0_i32_1 = arith.constant 0 : i32
    return %c0_i32, %c0_i32_0 : i32, i32
  }
  func.func @transform_5(%arg0: i32) -> (i32, i32) {
    %c0_i32 = arith.constant 0 : i32
    %c0_i32_0 = arith.constant 0 : i32
    %c0_i32_1 = arith.constant 0 : i32
    return %c0_i32, %c0_i32_0 : i32, i32
  }
  func.func @transform_6(%arg0: i32) -> (i32, i32) {
    %c0_i32 = arith.constant 0 : i32
    %c0_i32_0 = arith.constant 0 : i32
    %c0_i32_1 = arith.constant 0 : i32
    return %c0_i32, %c0_i32_0 : i32, i32
  }
  func.func @transform_7(%arg0: i32) -> (i32, i32) {
    %c0_i32 = arith.constant 0 : i32
    %c0_i32_0 = arith.constant 0 : i32
    %c0_i32_1 = arith.constant 0 : i32
    return %c0_i32, %c0_i32_0 : i32, i32
  }
  func.func @transform_8(%arg0: i32) -> (i32, i32, i32) {
    %c0_i32 = arith.constant 0 : i32
    %c0_i32_0 = arith.constant 0 : i32
    %c0_i32_1 = arith.constant 0 : i32
    %c0_i32_2 = arith.constant 0 : i32
    return %c0_i32, %c0_i32_0, %c0_i32_1 : i32, i32, i32
  }
  func.func @transform_9(%arg0: i32) -> (i32, i32, i32) {
    %c0_i32 = arith.constant 0 : i32
    %c0_i32_0 = arith.constant 0 : i32
    %c0_i32_1 = arith.constant 0 : i32
    %c0_i32_2 = arith.constant 0 : i32
    return %c0_i32, %c0_i32_0, %c0_i32_1 : i32, i32, i32
  }
  func.func @transform_10(%arg0: i32) -> (i32, i32, i32) {
    %c0_i32 = arith.constant 0 : i32
    %c0_i32_0 = arith.constant 0 : i32
    %c0_i32_1 = arith.constant 0 : i32
    %c0_i32_2 = arith.constant 0 : i32
    return %c0_i32, %c0_i32_0, %c0_i32_1 : i32, i32, i32
  }
  func.func @transform_11(%arg0: i32) -> (i32, i32, i32) {
    %c0_i32 = arith.constant 0 : i32
    %c0_i32_0 = arith.constant 0 : i32
    %c0_i32_1 = arith.constant 0 : i32
    %c0_i32_2 = arith.constant 0 : i32
    return %c0_i32, %c0_i32_0, %c0_i32_1 : i32, i32, i32
  }
  func.func @transform_12(%arg0: i32) -> (i32, i32) {
    %c0_i32 = arith.constant 0 : i32
    %c0_i32_0 = arith.constant 0 : i32
    %c0_i32_1 = arith.constant 0 : i32
    return %c0_i32, %c0_i32_0 : i32, i32
  }
  func.func @transform_13(%arg0: i32) -> (i32, i32) {
    %c0_i32 = arith.constant 0 : i32
    %c0_i32_0 = arith.constant 0 : i32
    %c0_i32_1 = arith.constant 0 : i32
    return %c0_i32, %c0_i32_0 : i32, i32
  }
  func.func @transform_14(%arg0: i32) -> (i32, i32) {
    %c0_i32 = arith.constant 0 : i32
    %c0_i32_0 = arith.constant 0 : i32
    %c0_i32_1 = arith.constant 0 : i32
    return %c0_i32, %c0_i32_0 : i32, i32
  }
  func.func @transform_15(%arg0: i32) -> (i32, i32) {
    %c0_i32 = arith.constant 0 : i32
    %c0_i32_0 = arith.constant 0 : i32
    %c0_i32_1 = arith.constant 0 : i32
    return %c0_i32, %c0_i32_0 : i32, i32
  }
  func.func @transform_16(%arg0: i32) -> (i32, i32, i32) {
    %c0_i32 = arith.constant 0 : i32
    %c0_i32_0 = arith.constant 0 : i32
    %c0_i32_1 = arith.constant 0 : i32
    return %arg0, %c0_i32, %c0_i32_0 : i32, i32, i32
  }
  func.func @transform_17(%arg0: i32) -> (i32, i32, i32) {
    %c0_i32 = arith.constant 0 : i32
    %c0_i32_0 = arith.constant 0 : i32
    %c0_i32_1 = arith.constant 0 : i32
    return %arg0, %c0_i32, %c0_i32_0 : i32, i32, i32
  }
  func.func @transform_18(%arg0: i32) -> (i32, i32, i32) {
    %c0_i32 = arith.constant 0 : i32
    %c0_i32_0 = arith.constant 0 : i32
    %c0_i32_1 = arith.constant 0 : i32
    return %arg0, %c0_i32, %c0_i32_0 : i32, i32, i32
  }
}

module attributes {stable_mosaic.version = 11 : i64} {
  func.func @_flow_kernel(%arg0: i32, %arg1: memref<1x6x128xf32, #tpu.memory_space<vmem>>, %arg2: memref<1x32x128xf32, #tpu.memory_space<vmem>>, %arg3: memref<3x6xf32, #tpu.memory_space<vmem>>, %arg4: memref<3x6xf32, #tpu.memory_space<vmem>>, %arg5: memref<16x3xf32, #tpu.memory_space<vmem>>, %arg6: memref<16x1xf32, #tpu.memory_space<vmem>>, %arg7: memref<64x32xf32, #tpu.memory_space<vmem>>, %arg8: memref<64x1xf32, #tpu.memory_space<vmem>>, %arg9: memref<2x32x48xf32, #tpu.memory_space<vmem>>, %arg10: memref<2x32x1xf32, #tpu.memory_space<vmem>>, %arg11: memref<2x32x16xf32, #tpu.memory_space<vmem>>, %arg12: memref<2x32x1xf32, #tpu.memory_space<vmem>>, %arg13: memref<3x16xf32, #tpu.memory_space<vmem>>, %arg14: memref<3x1xf32, #tpu.memory_space<vmem>>, %arg15: memref<3x16xf32, #tpu.memory_space<vmem>>, %arg16: memref<3x1xf32, #tpu.memory_space<vmem>>, %arg17: memref<1x3x128xf32, #tpu.memory_space<vmem>>, %arg18: memref<1x3x128xf32, #tpu.memory_space<vmem>>, %arg19: memref<1x3x128xf32, #tpu.memory_space<vmem>>) attributes {dimension_semantics = [#tpu.dimension_semantics<parallel>], iteration_bounds = array<i64: 2>, scalar_prefetch = 0 : i64, scratch_operands = 0 : i64, tpu.core_type = #tpu.core_type<tc>, window_params = [{transform_indices = @transform_0, window_bounds = array<i64: 1, 6, 128>}, {transform_indices = @transform_1, window_bounds = array<i64: 1, 32, 128>}, {pipeline_mode = #tpu.pipeline_mode<synchronous>, transform_indices = @transform_2, window_bounds = array<i64: 3, 6>}, {pipeline_mode = #tpu.pipeline_mode<synchronous>, transform_indices = @transform_3, window_bounds = array<i64: 3, 6>}, {pipeline_mode = #tpu.pipeline_mode<synchronous>, transform_indices = @transform_4, window_bounds = array<i64: 16, 3>}, {pipeline_mode = #tpu.pipeline_mode<synchronous>, transform_indices = @transform_5, window_bounds = array<i64: 16, 1>}, {pipeline_mode = #tpu.pipeline_mode<synchronous>, transform_indices = @transform_6, window_bounds = array<i64: 64, 32>}, {pipeline_mode = #tpu.pipeline_mode<synchronous>, transform_indices = @transform_7, window_bounds = array<i64: 64, 1>}, {pipeline_mode = #tpu.pipeline_mode<synchronous>, transform_indices = @transform_8, window_bounds = array<i64: 2, 32, 48>}, {pipeline_mode = #tpu.pipeline_mode<synchronous>, transform_indices = @transform_9, window_bounds = array<i64: 2, 32, 1>}, {pipeline_mode = #tpu.pipeline_mode<synchronous>, transform_indices = @transform_10, window_bounds = array<i64: 2, 32, 16>}, {pipeline_mode = #tpu.pipeline_mode<synchronous>, transform_indices = @transform_11, window_bounds = array<i64: 2, 32, 1>}, {pipeline_mode = #tpu.pipeline_mode<synchronous>, transform_indices = @transform_12, window_bounds = array<i64: 3, 16>}, {pipeline_mode = #tpu.pipeline_mode<synchronous>, transform_indices = @transform_13, window_bounds = array<i64: 3, 1>}, {pipeline_mode = #tpu.pipeline_mode<synchronous>, transform_indices = @transform_14, window_bounds = array<i64: 3, 16>}, {pipeline_mode = #tpu.pipeline_mode<synchronous>, transform_indices = @transform_15, window_bounds = array<i64: 3, 1>}, {transform_indices = @transform_16, window_bounds = array<i64: 1, 3, 128>}, {transform_indices = @transform_17, window_bounds = array<i64: 1, 3, 128>}, {transform_indices = @transform_18, window_bounds = array<i64: 1, 3, 128>}]} {
    %c0 = arith.constant 0 : index
    %c0_0 = arith.constant 0 : index
    %c0_1 = arith.constant 0 : index
    %0 = vector.load %arg1[%c0, %c0_0, %c0_1] : memref<1x6x128xf32, #tpu.memory_space<vmem>>, vector<1x6x128xf32>
    %1 = vector.shape_cast %0 : vector<1x6x128xf32> to vector<6x128xf32>
    %c0_2 = arith.constant 0 : index
    %c0_3 = arith.constant 0 : index
    %2 = vector.load %arg3[%c0_2, %c0_3] : memref<3x6xf32, #tpu.memory_space<vmem>>, vector<3x6xf32>
    %cst = arith.constant dense<0.000000e+00> : vector<3x128xf32>
    %3 = tpu.matmul %2, %1, %cst {dimension_numbers = #tpu.dot_dimension_numbers<[1], [0], [0], [1], [0, 0, 1, 1], [], []>} : vector<3x6xf32>, vector<6x128xf32>, vector<3x128xf32> -> vector<3x128xf32>
    %c0_4 = arith.constant 0 : index
    %c0_5 = arith.constant 0 : index
    %4 = vector.load %arg4[%c0_4, %c0_5] : memref<3x6xf32, #tpu.memory_space<vmem>>, vector<3x6xf32>
    %cst_6 = arith.constant dense<0.000000e+00> : vector<3x128xf32>
    %5 = tpu.matmul %4, %1, %cst_6 {dimension_numbers = #tpu.dot_dimension_numbers<[1], [0], [0], [1], [0, 0, 1, 1], [], []>} : vector<3x6xf32>, vector<6x128xf32>, vector<3x128xf32> -> vector<3x128xf32>
    %c0_7 = arith.constant 0 : index
    %c0_8 = arith.constant 0 : index
    %6 = vector.load %arg5[%c0_7, %c0_8] : memref<16x3xf32, #tpu.memory_space<vmem>>, vector<16x3xf32>
    %7 = arith.truncf %6 : vector<16x3xf32> to vector<16x3xbf16>
    %8 = arith.truncf %3 : vector<3x128xf32> to vector<3x128xbf16>
    %cst_9 = arith.constant dense<0.000000e+00> : vector<16x128xf32>
    %9 = tpu.matmul %7, %8, %cst_9 {dimension_numbers = #tpu.dot_dimension_numbers<[1], [0], [0], [1], [0, 0, 1, 1], [], []>} : vector<16x3xbf16>, vector<3x128xbf16>, vector<16x128xf32> -> vector<16x128xf32>
    %c0_10 = arith.constant 0 : index
    %c0_11 = arith.constant 0 : index
    %10 = vector.load %arg6[%c0_10, %c0_11] : memref<16x1xf32, #tpu.memory_space<vmem>>, vector<16x1xf32>
    %11 = vector.broadcast %10 : vector<16x1xf32> to vector<16x128xf32>
    %12 = arith.addf %9, %11 : vector<16x128xf32>
    %c0_12 = arith.constant 0 : index
    %c0_13 = arith.constant 0 : index
    %13 = vector.load %arg7[%c0_12, %c0_13] : memref<64x32xf32, #tpu.memory_space<vmem>>, vector<64x32xf32>
    %c0_14 = arith.constant 0 : index
    %c0_15 = arith.constant 0 : index
    %c0_16 = arith.constant 0 : index
    %14 = vector.load %arg2[%c0_14, %c0_15, %c0_16] : memref<1x32x128xf32, #tpu.memory_space<vmem>>, vector<1x32x128xf32>
    %15 = vector.shape_cast %14 : vector<1x32x128xf32> to vector<32x128xf32>
    %16 = arith.truncf %13 : vector<64x32xf32> to vector<64x32xbf16>
    %17 = arith.truncf %15 : vector<32x128xf32> to vector<32x128xbf16>
    %cst_17 = arith.constant dense<0.000000e+00> : vector<64x128xf32>
    %18 = tpu.matmul %16, %17, %cst_17 {dimension_numbers = #tpu.dot_dimension_numbers<[1], [0], [0], [1], [0, 0, 1, 1], [], []>} : vector<64x32xbf16>, vector<32x128xbf16>, vector<64x128xf32> -> vector<64x128xf32>
    %c0_18 = arith.constant 0 : index
    %c0_19 = arith.constant 0 : index
    %19 = vector.load %arg8[%c0_18, %c0_19] : memref<64x1xf32, #tpu.memory_space<vmem>>, vector<64x1xf32>
    %20 = vector.broadcast %19 : vector<64x1xf32> to vector<64x128xf32>
    %21 = arith.addf %18, %20 : vector<64x128xf32>
    %22 = tpu.iota {dimensions = array<i32: 1>} : vector<16x128xi32>
    %cst_20 = arith.constant 0.000000e+00 : f32
    %23 = vector.broadcast %cst_20 : f32 to vector<16x128xf32>
    %c1_i32 = arith.constant 1 : i32
    %24 = tpu.dynamic_rotate %12 by %c1_i32 dim 1 : vector<16x128xf32>, i32 -> vector<16x128xf32>
    %c-1_i32 = arith.constant -1 : i32
    %25 = vector.broadcast %c-1_i32 : i32 to vector<16x128xi32>
    %26 = arith.addi %22, %25 : vector<16x128xi32>
    %c0_i32 = arith.constant 0 : i32
    %27 = vector.broadcast %c0_i32 : i32 to vector<16x128xi32>
    %28 = arith.cmpi sge, %26, %27 : vector<16x128xi32>
    %c-1_i32_21 = arith.constant -1 : i32
    %29 = vector.broadcast %c-1_i32_21 : i32 to vector<16x128xi32>
    %30 = arith.addi %22, %29 : vector<16x128xi32>
    %c128_i32 = arith.constant 128 : i32
    %31 = vector.broadcast %c128_i32 : i32 to vector<16x128xi32>
    %32 = arith.cmpi slt, %30, %31 : vector<16x128xi32>
    %33 = arith.andi %28, %32 : vector<16x128xi1>
    %cst_22 = arith.constant 0.000000e+00 : f32
    %34 = vector.broadcast %cst_22 : f32 to vector<16x128xf32>
    %35 = arith.select %33, %24, %34 : vector<16x128xi1>, vector<16x128xf32>
    %c127_i32 = arith.constant 127 : i32
    %36 = tpu.dynamic_rotate %12 by %c127_i32 dim 1 : vector<16x128xf32>, i32 -> vector<16x128xf32>
    %c1_i32_23 = arith.constant 1 : i32
    %37 = vector.broadcast %c1_i32_23 : i32 to vector<16x128xi32>
    %38 = arith.addi %22, %37 : vector<16x128xi32>
    %c0_i32_24 = arith.constant 0 : i32
    %39 = vector.broadcast %c0_i32_24 : i32 to vector<16x128xi32>
    %40 = arith.cmpi sge, %38, %39 : vector<16x128xi32>
    %c1_i32_25 = arith.constant 1 : i32
    %41 = vector.broadcast %c1_i32_25 : i32 to vector<16x128xi32>
    %42 = arith.addi %22, %41 : vector<16x128xi32>
    %c128_i32_26 = arith.constant 128 : i32
    %43 = vector.broadcast %c128_i32_26 : i32 to vector<16x128xi32>
    %44 = arith.cmpi slt, %42, %43 : vector<16x128xi32>
    %45 = arith.andi %40, %44 : vector<16x128xi1>
    %cst_27 = arith.constant 0.000000e+00 : f32
    %46 = vector.broadcast %cst_27 : f32 to vector<16x128xf32>
    %47 = arith.select %45, %36, %46 : vector<16x128xi1>, vector<16x128xf32>
    %48 = tpu.concatenate %35, %12, %47 in 0 : vector<16x128xf32>, vector<16x128xf32>, vector<16x128xf32> -> vector<48x128xf32>
    %c0_28 = arith.constant 0 : index
    %c0_29 = arith.constant 0 : index
    %c0_30 = arith.constant 0 : index
    %49 = vector.load %arg9[%c0_28, %c0_29, %c0_30] : memref<2x32x48xf32, #tpu.memory_space<vmem>>, vector<1x32x48xf32>
    %50 = vector.shape_cast %49 : vector<1x32x48xf32> to vector<32x48xf32>
    %51 = arith.truncf %50 : vector<32x48xf32> to vector<32x48xbf16>
    %52 = arith.truncf %48 : vector<48x128xf32> to vector<48x128xbf16>
    %cst_31 = arith.constant dense<0.000000e+00> : vector<32x128xf32>
    %53 = tpu.matmul %51, %52, %cst_31 {dimension_numbers = #tpu.dot_dimension_numbers<[1], [0], [0], [1], [0, 0, 1, 1], [], []>} : vector<32x48xbf16>, vector<48x128xbf16>, vector<32x128xf32> -> vector<32x128xf32>
    %c0_32 = arith.constant 0 : index
    %c0_33 = arith.constant 0 : index
    %c0_34 = arith.constant 0 : index
    %54 = vector.load %arg10[%c0_32, %c0_33, %c0_34] : memref<2x32x1xf32, #tpu.memory_space<vmem>>, vector<1x32x1xf32>
    %55 = vector.shape_cast %54 : vector<1x32x1xf32> to vector<32x1xf32>
    %56 = vector.broadcast %55 : vector<32x1xf32> to vector<32x128xf32>
    %57 = arith.addf %53, %56 : vector<32x128xf32>
    %58 = vector.extract_strided_slice %21 {offsets = [0, 0], sizes = [32, 128], strides = [1, 1]} : vector<64x128xf32> to vector<32x128xf32>
    %59 = arith.addf %57, %58 : vector<32x128xf32>
    %60 = vector.extract_strided_slice %59 {offsets = [0, 0], sizes = [16, 128], strides = [1, 1]} : vector<32x128xf32> to vector<16x128xf32>
    %61 = math.tanh %60 : vector<16x128xf32>
    %62 = vector.extract_strided_slice %59 {offsets = [16, 0], sizes = [16, 128], strides = [1, 1]} : vector<32x128xf32> to vector<16x128xf32>
    %63 = arith.negf %62 : vector<16x128xf32>
    %64 = math.exp %63 : vector<16x128xf32>
    %cst_35 = arith.constant 1.000000e+00 : f32
    %65 = vector.broadcast %cst_35 : f32 to vector<16x128xf32>
    %66 = arith.addf %65, %64 : vector<16x128xf32>
    %67 = arith.divf %65, %66 : vector<16x128xf32>
    %68 = arith.mulf %61, %67 : vector<16x128xf32>
    %c0_36 = arith.constant 0 : index
    %c0_37 = arith.constant 0 : index
    %c0_38 = arith.constant 0 : index
    %69 = vector.load %arg11[%c0_36, %c0_37, %c0_38] : memref<2x32x16xf32, #tpu.memory_space<vmem>>, vector<1x32x16xf32>
    %70 = vector.shape_cast %69 : vector<1x32x16xf32> to vector<32x16xf32>
    %71 = arith.truncf %70 : vector<32x16xf32> to vector<32x16xbf16>
    %72 = arith.truncf %68 : vector<16x128xf32> to vector<16x128xbf16>
    %cst_39 = arith.constant dense<0.000000e+00> : vector<32x128xf32>
    %73 = tpu.matmul %71, %72, %cst_39 {dimension_numbers = #tpu.dot_dimension_numbers<[1], [0], [0], [1], [0, 0, 1, 1], [], []>} : vector<32x16xbf16>, vector<16x128xbf16>, vector<32x128xf32> -> vector<32x128xf32>
    %c0_40 = arith.constant 0 : index
    %c0_41 = arith.constant 0 : index
    %c0_42 = arith.constant 0 : index
    %74 = vector.load %arg12[%c0_40, %c0_41, %c0_42] : memref<2x32x1xf32, #tpu.memory_space<vmem>>, vector<1x32x1xf32>
    %75 = vector.shape_cast %74 : vector<1x32x1xf32> to vector<32x1xf32>
    %76 = vector.broadcast %75 : vector<32x1xf32> to vector<32x128xf32>
    %77 = arith.addf %73, %76 : vector<32x128xf32>
    %78 = vector.extract_strided_slice %77 {offsets = [0, 0], sizes = [16, 128], strides = [1, 1]} : vector<32x128xf32> to vector<16x128xf32>
    %79 = arith.addf %12, %78 : vector<16x128xf32>
    %80 = vector.extract_strided_slice %77 {offsets = [16, 0], sizes = [16, 128], strides = [1, 1]} : vector<32x128xf32> to vector<16x128xf32>
    %81 = arith.addf %23, %80 : vector<16x128xf32>
    %c2_i32 = arith.constant 2 : i32
    %82 = tpu.dynamic_rotate %79 by %c2_i32 dim 1 : vector<16x128xf32>, i32 -> vector<16x128xf32>
    %c-2_i32 = arith.constant -2 : i32
    %83 = vector.broadcast %c-2_i32 : i32 to vector<16x128xi32>
    %84 = arith.addi %22, %83 : vector<16x128xi32>
    %c0_i32_43 = arith.constant 0 : i32
    %85 = vector.broadcast %c0_i32_43 : i32 to vector<16x128xi32>
    %86 = arith.cmpi sge, %84, %85 : vector<16x128xi32>
    %c-2_i32_44 = arith.constant -2 : i32
    %87 = vector.broadcast %c-2_i32_44 : i32 to vector<16x128xi32>
    %88 = arith.addi %22, %87 : vector<16x128xi32>
    %c128_i32_45 = arith.constant 128 : i32
    %89 = vector.broadcast %c128_i32_45 : i32 to vector<16x128xi32>
    %90 = arith.cmpi slt, %88, %89 : vector<16x128xi32>
    %91 = arith.andi %86, %90 : vector<16x128xi1>
    %cst_46 = arith.constant 0.000000e+00 : f32
    %92 = vector.broadcast %cst_46 : f32 to vector<16x128xf32>
    %93 = arith.select %91, %82, %92 : vector<16x128xi1>, vector<16x128xf32>
    %c126_i32 = arith.constant 126 : i32
    %94 = tpu.dynamic_rotate %79 by %c126_i32 dim 1 : vector<16x128xf32>, i32 -> vector<16x128xf32>
    %c2_i32_47 = arith.constant 2 : i32
    %95 = vector.broadcast %c2_i32_47 : i32 to vector<16x128xi32>
    %96 = arith.addi %22, %95 : vector<16x128xi32>
    %c0_i32_48 = arith.constant 0 : i32
    %97 = vector.broadcast %c0_i32_48 : i32 to vector<16x128xi32>
    %98 = arith.cmpi sge, %96, %97 : vector<16x128xi32>
    %c2_i32_49 = arith.constant 2 : i32
    %99 = vector.broadcast %c2_i32_49 : i32 to vector<16x128xi32>
    %100 = arith.addi %22, %99 : vector<16x128xi32>
    %c128_i32_50 = arith.constant 128 : i32
    %101 = vector.broadcast %c128_i32_50 : i32 to vector<16x128xi32>
    %102 = arith.cmpi slt, %100, %101 : vector<16x128xi32>
    %103 = arith.andi %98, %102 : vector<16x128xi1>
    %cst_51 = arith.constant 0.000000e+00 : f32
    %104 = vector.broadcast %cst_51 : f32 to vector<16x128xf32>
    %105 = arith.select %103, %94, %104 : vector<16x128xi1>, vector<16x128xf32>
    %106 = tpu.concatenate %93, %79, %105 in 0 : vector<16x128xf32>, vector<16x128xf32>, vector<16x128xf32> -> vector<48x128xf32>
    %c1 = arith.constant 1 : index
    %c0_52 = arith.constant 0 : index
    %c0_53 = arith.constant 0 : index
    %107 = vector.load %arg9[%c1, %c0_52, %c0_53] : memref<2x32x48xf32, #tpu.memory_space<vmem>>, vector<1x32x48xf32>
    %108 = vector.shape_cast %107 : vector<1x32x48xf32> to vector<32x48xf32>
    %109 = arith.truncf %108 : vector<32x48xf32> to vector<32x48xbf16>
    %110 = arith.truncf %106 : vector<48x128xf32> to vector<48x128xbf16>
    %cst_54 = arith.constant dense<0.000000e+00> : vector<32x128xf32>
    %111 = tpu.matmul %109, %110, %cst_54 {dimension_numbers = #tpu.dot_dimension_numbers<[1], [0], [0], [1], [0, 0, 1, 1], [], []>} : vector<32x48xbf16>, vector<48x128xbf16>, vector<32x128xf32> -> vector<32x128xf32>
    %c1_55 = arith.constant 1 : index
    %c0_56 = arith.constant 0 : index
    %c0_57 = arith.constant 0 : index
    %112 = vector.load %arg10[%c1_55, %c0_56, %c0_57] : memref<2x32x1xf32, #tpu.memory_space<vmem>>, vector<1x32x1xf32>
    %113 = vector.shape_cast %112 : vector<1x32x1xf32> to vector<32x1xf32>
    %114 = vector.broadcast %113 : vector<32x1xf32> to vector<32x128xf32>
    %115 = arith.addf %111, %114 : vector<32x128xf32>
    %116 = vector.extract_strided_slice %21 {offsets = [32, 0], sizes = [32, 128], strides = [1, 1]} : vector<64x128xf32> to vector<32x128xf32>
    %117 = arith.addf %115, %116 : vector<32x128xf32>
    %118 = vector.extract_strided_slice %117 {offsets = [0, 0], sizes = [16, 128], strides = [1, 1]} : vector<32x128xf32> to vector<16x128xf32>
    %119 = math.tanh %118 : vector<16x128xf32>
    %120 = vector.extract_strided_slice %117 {offsets = [16, 0], sizes = [16, 128], strides = [1, 1]} : vector<32x128xf32> to vector<16x128xf32>
    %121 = arith.negf %120 : vector<16x128xf32>
    %122 = math.exp %121 : vector<16x128xf32>
    %cst_58 = arith.constant 1.000000e+00 : f32
    %123 = vector.broadcast %cst_58 : f32 to vector<16x128xf32>
    %124 = arith.addf %123, %122 : vector<16x128xf32>
    %125 = arith.divf %123, %124 : vector<16x128xf32>
    %126 = arith.mulf %119, %125 : vector<16x128xf32>
    %c1_59 = arith.constant 1 : index
    %c0_60 = arith.constant 0 : index
    %c0_61 = arith.constant 0 : index
    %127 = vector.load %arg11[%c1_59, %c0_60, %c0_61] : memref<2x32x16xf32, #tpu.memory_space<vmem>>, vector<1x32x16xf32>
    %128 = vector.shape_cast %127 : vector<1x32x16xf32> to vector<32x16xf32>
    %129 = arith.truncf %128 : vector<32x16xf32> to vector<32x16xbf16>
    %130 = arith.truncf %126 : vector<16x128xf32> to vector<16x128xbf16>
    %cst_62 = arith.constant dense<0.000000e+00> : vector<32x128xf32>
    %131 = tpu.matmul %129, %130, %cst_62 {dimension_numbers = #tpu.dot_dimension_numbers<[1], [0], [0], [1], [0, 0, 1, 1], [], []>} : vector<32x16xbf16>, vector<16x128xbf16>, vector<32x128xf32> -> vector<32x128xf32>
    %c1_63 = arith.constant 1 : index
    %c0_64 = arith.constant 0 : index
    %c0_65 = arith.constant 0 : index
    %132 = vector.load %arg12[%c1_63, %c0_64, %c0_65] : memref<2x32x1xf32, #tpu.memory_space<vmem>>, vector<1x32x1xf32>
    %133 = vector.shape_cast %132 : vector<1x32x1xf32> to vector<32x1xf32>
    %134 = vector.broadcast %133 : vector<32x1xf32> to vector<32x128xf32>
    %135 = arith.addf %131, %134 : vector<32x128xf32>
    %136 = vector.extract_strided_slice %135 {offsets = [16, 0], sizes = [16, 128], strides = [1, 1]} : vector<32x128xf32> to vector<16x128xf32>
    %137 = arith.addf %81, %136 : vector<16x128xf32>
    %c0_66 = arith.constant 0 : index
    %c0_67 = arith.constant 0 : index
    %138 = vector.load %arg13[%c0_66, %c0_67] : memref<3x16xf32, #tpu.memory_space<vmem>>, vector<3x16xf32>
    %139 = arith.truncf %138 : vector<3x16xf32> to vector<3x16xbf16>
    %140 = arith.truncf %137 : vector<16x128xf32> to vector<16x128xbf16>
    %cst_68 = arith.constant dense<0.000000e+00> : vector<3x128xf32>
    %141 = tpu.matmul %139, %140, %cst_68 {dimension_numbers = #tpu.dot_dimension_numbers<[1], [0], [0], [1], [0, 0, 1, 1], [], []>} : vector<3x16xbf16>, vector<16x128xbf16>, vector<3x128xf32> -> vector<3x128xf32>
    %c0_69 = arith.constant 0 : index
    %c0_70 = arith.constant 0 : index
    %142 = vector.load %arg14[%c0_69, %c0_70] : memref<3x1xf32, #tpu.memory_space<vmem>>, vector<3x1xf32>
    %143 = vector.broadcast %142 : vector<3x1xf32> to vector<3x128xf32>
    %144 = arith.addf %141, %143 : vector<3x128xf32>
    %c0_71 = arith.constant 0 : index
    %c0_72 = arith.constant 0 : index
    %145 = vector.load %arg15[%c0_71, %c0_72] : memref<3x16xf32, #tpu.memory_space<vmem>>, vector<3x16xf32>
    %146 = arith.truncf %145 : vector<3x16xf32> to vector<3x16xbf16>
    %147 = arith.truncf %137 : vector<16x128xf32> to vector<16x128xbf16>
    %cst_73 = arith.constant dense<0.000000e+00> : vector<3x128xf32>
    %148 = tpu.matmul %146, %147, %cst_73 {dimension_numbers = #tpu.dot_dimension_numbers<[1], [0], [0], [1], [0, 0, 1, 1], [], []>} : vector<3x16xbf16>, vector<16x128xbf16>, vector<3x128xf32> -> vector<3x128xf32>
    %c0_74 = arith.constant 0 : index
    %c0_75 = arith.constant 0 : index
    %149 = vector.load %arg16[%c0_74, %c0_75] : memref<3x1xf32, #tpu.memory_space<vmem>>, vector<3x1xf32>
    %150 = vector.broadcast %149 : vector<3x1xf32> to vector<3x128xf32>
    %151 = arith.addf %148, %150 : vector<3x128xf32>
    %c0_76 = arith.constant 0 : index
    %c0_77 = arith.constant 0 : index
    %c0_78 = arith.constant 0 : index
    %152 = vector.load %arg17[%c0_76, %c0_77, %c0_78] : memref<1x3x128xf32, #tpu.memory_space<vmem>>, vector<1x3x128xf32>
    %153 = vector.shape_cast %152 : vector<1x3x128xf32> to vector<3x128xf32>
    %154 = vector.shape_cast %3 : vector<3x128xf32> to vector<1x3x128xf32>
    tpu.vector_store %arg17[%c0_76, %c0_77, %c0_78], %154 {strides = array<i32>} : memref<1x3x128xf32, #tpu.memory_space<vmem>>, vector<1x3x128xf32>,
    %155 = math.exp %151 : vector<3x128xf32>
    %156 = arith.mulf %155, %5 : vector<3x128xf32>
    %157 = arith.addf %156, %144 : vector<3x128xf32>
    %c0_79 = arith.constant 0 : index
    %c0_80 = arith.constant 0 : index
    %c0_81 = arith.constant 0 : index
    %158 = vector.load %arg18[%c0_79, %c0_80, %c0_81] : memref<1x3x128xf32, #tpu.memory_space<vmem>>, vector<1x3x128xf32>
    %159 = vector.shape_cast %158 : vector<1x3x128xf32> to vector<3x128xf32>
    %160 = vector.shape_cast %157 : vector<3x128xf32> to vector<1x3x128xf32>
    tpu.vector_store %arg18[%c0_79, %c0_80, %c0_81], %160 {strides = array<i32>} : memref<1x3x128xf32, #tpu.memory_space<vmem>>, vector<1x3x128xf32>,
    %c0_82 = arith.constant 0 : index
    %c0_83 = arith.constant 0 : index
    %c0_84 = arith.constant 0 : index
    %161 = vector.load %arg19[%c0_82, %c0_83, %c0_84] : memref<1x3x128xf32, #tpu.memory_space<vmem>>, vector<1x3x128xf32>
    %162 = vector.shape_cast %161 : vector<1x3x128xf32> to vector<3x128xf32>
    %163 = vector.shape_cast %151 : vector<3x128xf32> to vector<1x3x128xf32>
    tpu.vector_store %arg19[%c0_82, %c0_83, %c0_84], %163 {strides = array<i32>} : memref<1x3x128xf32, #tpu.memory_space<vmem>>, vector<1x3x128xf32>,
    return
  }
  func.func @transform_0(%arg0: i32) -> (i32, i32, i32) {
    %c0_i32 = arith.constant 0 : i32
    %c0_i32_0 = arith.constant 0 : i32
    %c0_i32_1 = arith.constant 0 : i32
    return %arg0, %c0_i32, %c0_i32_0 : i32, i32, i32
  }
  func.func @transform_1(%arg0: i32) -> (i32, i32, i32) {
    %c0_i32 = arith.constant 0 : i32
    %c0_i32_0 = arith.constant 0 : i32
    %c0_i32_1 = arith.constant 0 : i32
    return %arg0, %c0_i32, %c0_i32_0 : i32, i32, i32
  }
  func.func @transform_2(%arg0: i32) -> (i32, i32) {
    %c0_i32 = arith.constant 0 : i32
    %c0_i32_0 = arith.constant 0 : i32
    %c0_i32_1 = arith.constant 0 : i32
    return %c0_i32, %c0_i32_0 : i32, i32
  }
  func.func @transform_3(%arg0: i32) -> (i32, i32) {
    %c0_i32 = arith.constant 0 : i32
    %c0_i32_0 = arith.constant 0 : i32
    %c0_i32_1 = arith.constant 0 : i32
    return %c0_i32, %c0_i32_0 : i32, i32
  }
  func.func @transform_4(%arg0: i32) -> (i32, i32) {
    %c0_i32 = arith.constant 0 : i32
    %c0_i32_0 = arith.constant 0 : i32
    %c0_i32_1 = arith.constant 0 : i32
    return %c0_i32, %c0_i32_0 : i32, i32
  }
  func.func @transform_5(%arg0: i32) -> (i32, i32) {
    %c0_i32 = arith.constant 0 : i32
    %c0_i32_0 = arith.constant 0 : i32
    %c0_i32_1 = arith.constant 0 : i32
    return %c0_i32, %c0_i32_0 : i32, i32
  }
  func.func @transform_6(%arg0: i32) -> (i32, i32) {
    %c0_i32 = arith.constant 0 : i32
    %c0_i32_0 = arith.constant 0 : i32
    %c0_i32_1 = arith.constant 0 : i32
    return %c0_i32, %c0_i32_0 : i32, i32
  }
  func.func @transform_7(%arg0: i32) -> (i32, i32) {
    %c0_i32 = arith.constant 0 : i32
    %c0_i32_0 = arith.constant 0 : i32
    %c0_i32_1 = arith.constant 0 : i32
    return %c0_i32, %c0_i32_0 : i32, i32
  }
  func.func @transform_8(%arg0: i32) -> (i32, i32, i32) {
    %c0_i32 = arith.constant 0 : i32
    %c0_i32_0 = arith.constant 0 : i32
    %c0_i32_1 = arith.constant 0 : i32
    %c0_i32_2 = arith.constant 0 : i32
    return %c0_i32, %c0_i32_0, %c0_i32_1 : i32, i32, i32
  }
  func.func @transform_9(%arg0: i32) -> (i32, i32, i32) {
    %c0_i32 = arith.constant 0 : i32
    %c0_i32_0 = arith.constant 0 : i32
    %c0_i32_1 = arith.constant 0 : i32
    %c0_i32_2 = arith.constant 0 : i32
    return %c0_i32, %c0_i32_0, %c0_i32_1 : i32, i32, i32
  }
  func.func @transform_10(%arg0: i32) -> (i32, i32, i32) {
    %c0_i32 = arith.constant 0 : i32
    %c0_i32_0 = arith.constant 0 : i32
    %c0_i32_1 = arith.constant 0 : i32
    %c0_i32_2 = arith.constant 0 : i32
    return %c0_i32, %c0_i32_0, %c0_i32_1 : i32, i32, i32
  }
  func.func @transform_11(%arg0: i32) -> (i32, i32, i32) {
    %c0_i32 = arith.constant 0 : i32
    %c0_i32_0 = arith.constant 0 : i32
    %c0_i32_1 = arith.constant 0 : i32
    %c0_i32_2 = arith.constant 0 : i32
    return %c0_i32, %c0_i32_0, %c0_i32_1 : i32, i32, i32
  }
  func.func @transform_12(%arg0: i32) -> (i32, i32) {
    %c0_i32 = arith.constant 0 : i32
    %c0_i32_0 = arith.constant 0 : i32
    %c0_i32_1 = arith.constant 0 : i32
    return %c0_i32, %c0_i32_0 : i32, i32
  }
  func.func @transform_13(%arg0: i32) -> (i32, i32) {
    %c0_i32 = arith.constant 0 : i32
    %c0_i32_0 = arith.constant 0 : i32
    %c0_i32_1 = arith.constant 0 : i32
    return %c0_i32, %c0_i32_0 : i32, i32
  }
  func.func @transform_14(%arg0: i32) -> (i32, i32) {
    %c0_i32 = arith.constant 0 : i32
    %c0_i32_0 = arith.constant 0 : i32
    %c0_i32_1 = arith.constant 0 : i32
    return %c0_i32, %c0_i32_0 : i32, i32
  }
  func.func @transform_15(%arg0: i32) -> (i32, i32) {
    %c0_i32 = arith.constant 0 : i32
    %c0_i32_0 = arith.constant 0 : i32
    %c0_i32_1 = arith.constant 0 : i32
    return %c0_i32, %c0_i32_0 : i32, i32
  }
  func.func @transform_16(%arg0: i32) -> (i32, i32, i32) {
    %c0_i32 = arith.constant 0 : i32
    %c0_i32_0 = arith.constant 0 : i32
    %c0_i32_1 = arith.constant 0 : i32
    return %arg0, %c0_i32, %c0_i32_0 : i32, i32, i32
  }
  func.func @transform_17(%arg0: i32) -> (i32, i32, i32) {
    %c0_i32 = arith.constant 0 : i32
    %c0_i32_0 = arith.constant 0 : i32
    %c0_i32_1 = arith.constant 0 : i32
    return %arg0, %c0_i32, %c0_i32_0 : i32, i32, i32
  }
  func.func @transform_18(%arg0: i32) -> (i32, i32, i32) {
    %c0_i32 = arith.constant 0 : i32
    %c0_i32_0 = arith.constant 0 : i32
    %c0_i32_1 = arith.constant 0 : i32
    return %arg0, %c0_i32, %c0_i32_0 : i32, i32, i32
  }
}

</mosaic_0001>

<bundles_post_ra>
// kernel: custom-call.14
= control target key start
LH: loop header
LB: loop body
LE: loop exit
PB: predicated region body
PF: predicated region fallthrough
CT: control target
= control target key end

     0   :  { %5 = vsyncpa [#allocation1], 0  ;;  %s630_s0 = inlined_call_operand.hbm [shape: f32[8,8], index: 0, kind: input, shape index: {}]   ;;  %s631_s1 = inlined_call_operand.vmem [shape: f32[8,8], index: 1, kind: output, shape index: {0}]   ;;  %s632_s2 = inlined_call_operand.vmem [shape: s32[8], index: 2, kind: output, shape index: {1}]   ;;  %s633_s3 = inlined_call_operand.hbm [shape: s32[8], index: 3, kind: output, shape index: {2}]  }
   0x1   :  { %6 = vsyncpa [#allocation2], 0  ;;  %s560_s12 = smov [#allocation0]  }
   0x2   :  { %s10_s13 = sshll.u32 %s560_s12, 4  ;;  %s11_s13 = int_to_ptr.vmem [resolvable:$true] %s10_s13 }
   0x3   :  { %s480_s14 = scalar_lea.vmem %s11_s13, 128  ;;  %p485_p1 = scmp.lt.s32.totalorder %s11_s13, %s11_s13 }
   0x4   :  { %p481_p0 = scmp.ne.s32.totalorder %s11_s13, %s480_s14  ;;  %p486_p2 = scmp.lt.s32.totalorder %s480_s14, %s480_s14 }
   0x6   :  { %p487_p3 = por %p486_p2, %p485_p1 }
   0x8   :  { %p488_p4 = pnand %p487_p3, %p481_p0 }
   0xa   :  { %491 = shalt.err (!%p488_p4)
}
   0xb   :  { %13 = dma.hbm_to_vmem [thread:$0]  %s630_s0, 128, %s11_s13, [#allocation1]  }
   0xc   :  { %544 = dma.done.wait [#allocation1], 128  }
   0xd   :  { %545 = vsyncadd [#allocation1], 4294967168  ;;  %v18_v0 = vlaneseq  ;;  %v561_v1 = vmov 0   ;;  %v15_v3 = vld [vmem:[#allocation0] sm:$0xff]  ;;  %s590_s17 = smov 0  }
   0xe   :  { %17 = vst [vmem:[#allocation4] sm:$0x1] %v561_v1  ;;  %16 = vst [vmem:[#allocation3] sm:$0xff] %v15_v3 }
   0xf   :  { %v587_v2 = vshrl.u32 %v18_v0, 7 }
  0x11   :  { %22 = vst [vmem:[#allocation8] sm:$0xff] %v587_v2 }
  0x12 LB: > { %v596_v6 = vstv %s550_s17  ;;  %s79_s0 = ssub.s32 128, %s550_s17  ;;  %v85_v36 = vand.u32 127, %v18_v0  ;;  %s91_s18 = scalar_lea.vmem [#allocation3], %s550_s17  ;;  %s550_s17 = sphi %s590_s17, %s28_s17  }
  0x13   : > { %vm37_vm0 = vcmp.ge.s32.totalorder %v587_v2, %v596_v6  ;;  %s97_s20 = scalar_lea.vmem [#allocation8], %s550_s17  ;;  %vm117_vm13 = vcmp.gt.s32.totalorder %v587_v2, %v596_v6  ;;  %s28_s17 = sadd.s32 1, %s550_s17  }
  0x14   : > { %vm109_vm10 = vcmp.gt.s32.totalorder %v85_v36, %v596_v6  ;;  %vm86_vm11 = vcmp.eq.s32.totalorder %v85_v36, %v596_v6  ;;  %p25_p5 = scmp.ge.s32.totalorder %s28_s17, 8  }
  0x15   : > { %v33_v4 = vld [vmem:[#allocation3] sm:$0xff]  ;;  %v88_v38 = vld [vmem:[#allocation4] ss:$0 sm:$0xff]  ;;  %v93_v39 = vld [vmem:[%s91_s18] ss:$0 sm:$0xff]  ;;  %s552_s25 = smov (%p25_p5), %s631_s1   ;;  %s556_s26 = smov (%p25_p5), [#allocation3]  }
  0x16   : > { %v34_v5 = vand.u32 2147483647, %v33_v4  ;;  %vm121_vm15 = vmand %vm117_vm13, %vm86_vm11 }
  0x18   : > { %vm392_vm1 = vcmp.gt.f32.partialorder %v34_v5, -inf  ;;  %v99_v40 = vld [vmem:[%s97_s20] ss:$0 sm:$0xff] }
  0x19   : > { %vm41_vm2 = vmand %vm37_vm0, %vm392_vm1 }
  0x1a   : > { %v42_v7 = vsel %vm41_vm2, %v587_v2, %v596_v6  ;;  %v43_v8 = vsel %vm41_vm2, %v34_v5, -inf }
  0x1b   : > { %v44_v9 = vrot.slane %v43_v8, 1  ;;  %v45_v10 = vrot.slane %v42_v7, 1 }
  0x1d   : > { %vm46_vm3 = vcmp.ge.f32.partialorder %v44_v9, %v43_v8  ;;  %v49_v11 = vrot.slane %v44_v9, 1  ;;  %v50_v12 = vrot.slane %v45_v10, 1 }
  0x1e   : > { %v47_v13 = vsel %vm46_vm3, %v44_v9, %v43_v8  ;;  %v48_v14 = vsel %vm46_vm3, %v45_v10, %v42_v7 }
  0x1f   : > { %vm51_vm4 = vcmp.ge.f32.partialorder %v49_v11, %v47_v13  ;;  %v54_v15 = vrot.slane %v49_v11, 1  ;;  %v55_v16 = vrot.slane %v50_v12, 1 }
  0x20   : > { %v52_v17 = vsel %vm51_vm4, %v49_v11, %v47_v13  ;;  %v53_v18 = vsel %vm51_vm4, %v50_v12, %v48_v14 }
  0x21   : > { %vm56_vm5 = vcmp.ge.f32.partialorder %v54_v15, %v52_v17  ;;  %v59_v19 = vrot.slane %v54_v15, 1  ;;  %v60_v20 = vrot.slane %v55_v16, 1 }
  0x22   : > { %v57_v21 = vsel %vm56_vm5, %v54_v15, %v52_v17  ;;  %v58_v22 = vsel %vm56_vm5, %v55_v16, %v53_v18 }
  0x23   : > { %vm61_vm6 = vcmp.ge.f32.partialorder %v59_v19, %v57_v21  ;;  %v64_v23 = vrot.slane %v59_v19, 1  ;;  %v65_v24 = vrot.slane %v60_v20, 1 }
  0x24   : > { %v62_v25 = vsel %vm61_vm6, %v59_v19, %v57_v21  ;;  %v63_v26 = vsel %vm61_vm6, %v60_v20, %v58_v22 }
  0x25   : > { %vm66_vm7 = vcmp.ge.f32.partialorder %v64_v23, %v62_v25  ;;  %v69_v27 = vrot.slane %v64_v23, 1  ;;  %v70_v28 = vrot.slane %v65_v24, 1 }
  0x26   : > { %v67_v29 = vsel %vm66_vm7, %v64_v23, %v62_v25  ;;  %v68_v30 = vsel %vm66_vm7, %v65_v24, %v63_v26 }
  0x27   : > { %vm71_vm8 = vcmp.ge.f32.partialorder %v69_v27, %v67_v29  ;;  %v74_v31 = vrot.slane %v69_v27, 1  ;;  %v75_v32 = vrot.slane %v70_v28, 1 }
  0x28   : > { %v72_v33 = vsel %vm71_vm8, %v69_v27, %v67_v29  ;;  %v73_v34 = vsel %vm71_vm8, %v70_v28, %v68_v30 }
  0x29   : > { %vm76_vm9 = vcmp.ge.f32.partialorder %v74_v31, %v72_v33 }
  0x2a   : > { %v78_v35 = vsel %vm76_vm9, %v75_v32, %v73_v34 }
  0x2b   : > { %80 = vrot.lane.b32.xlu0 %v78_v35, %s79_s0 }
  0x9d   : > { %v81_v37 = vpop.permute.xlu0 %80 }
  0x9e   : > { %400 = vpush %v81_v37 }
  0xcf   : > { %s401_s19 = spop %400 }
  0xd0   : > { %v87_v41 = vstv %s401_s19  ;;  %s92_s21 = scalar_lea.vmem [#allocation3], %s401_s19  ;;  %s98_s22 = scalar_lea.vmem [#allocation8], %s401_s19 }
  0xd1   : > { %v94_v42 = vld [vmem:[%s92_s21] ss:$0 sm:$0xff]  ;;  %v89_v44 = vsel %vm86_vm11, %v87_v41, %v88_v38 }
  0xd2   : > { %v100_v43 = vld [vmem:[%s98_s22] ss:$0 sm:$0xff]  ;;  %95 = vst [vmem:[%s92_s21] sm:$0x1] %v93_v39  ;;  %vm103_vm12 = vcmp.ne.f32.partialorder %v94_v42, 0.0  ;;  %90 = vst [vmem:[#allocation4] sm:$0x1] %v89_v44 }
  0xd3   : > { %101 = vst [vmem:[%s98_s22] sm:$0x1] %v99_v40  ;;  %96 = vst [vmem:[%s91_s18] sm:$0x1] %v94_v42  ;;  %v110_v51 = vsel %vm109_vm10, %v94_v42, 0.0 }
  0xd4   : > { %102 = vst [vmem:[%s97_s20] sm:$0x1] %v100_v43  ;;  %vm104_vm14 = vmand %vm86_vm11, %vm103_vm12 }
  0xd5   : > { %v105_v45 = vsel %vm104_vm14, %v94_v42, 1.0 }
  0xd6   : > { %v118_v46 = vsel %vm117_vm13, %v105_v45, 1.0 }
  0xd7   : > { %470 = vrcp.f32 %v118_v46 }
  0xd9   :  { %v181_v56 = vld [vmem:[#allocation4] sm:$0x1] (%p25_p5) }
  0xda   : > { %v114_v48 = vld [vmem:[#allocation3] sm:$0xff]  ;;  %184 = vst [vmem:[#allocation5] sm:$0x1] (%p25_p5), %v181_v56 }
  0xdb   :  { %v128_v55 = vld [vmem:[#allocation8] sm:$0xff] (%p25_p5) }
  0xe4   : > { %v471_v47 = vpop.eup %470 }
  0xe5   : > { %v120_v49 = vmul.f32 %v471_v47, %v114_v48 }
  0xe7   : > { %v122_v50 = vsel %vm121_vm15, %v120_v49, 0.0 }
  0xe8   : > { %123 = vadd.xlane.f32.xlu0 %v122_v50 }
 0x115   :  { %144 = vxpose.xlu0.b32.start.end [1/1] (short) (narrow) (%p25_p5), %v128_v55, 8 }
 0x171   : > { %v124_v52 = vpop.xlane.xlu0 %123 }
 0x172   : > { %v125_v53 = vmul.f32 %v124_v52, %v110_v51  ;;  %27 = sbr.rel (!%p25_p5) target bundleno = 18 (0x12), region = 112 }
 0x174   : > { %v126_v54 = vsub.f32 %v120_v49, %v125_v53 }
 0x176   : > { %127 = vst [vmem:[#allocation3] sm:$0xff] %v126_v54 }
 0x191   :  { %v160_v57 = vpop.trf.xlu0 }
 0x192   :  { %176 = vst [vmem:[#allocation6] sm:$0x1] %v160_v57 }
 0x199   :  { %v189_v58 = vld [vmem:[#allocation6] sm:$0x1] }
 0x19a   :  { %192 = vst [vmem:[#allocation7] sm:$0x1] %v189_v58 }
 0x19b LB: > { %v240_v59 = vld [vmem:[%s558_s26] sm:$0xff]  ;;  %s242_s26 = scalar_lea.vmem %s558_s26, 8   ;;  %s558_s26 = sphi %s556_s26, %s242_s26   ;;  %s554_s25 = sphi %s552_s25, %s243_s25  }
 0x19c   : > { %241 = vst [vmem:[%s554_s25] sm:$0xff] %v240_v59  ;;  %s243_s25 = scalar_lea.vmem %s554_s25, 8   ;;  %p237_p6 = scmp.gt.s32.totalorder %s242_s26, [#allocation3] }
 0x19d   :  { %v319_v60 = vld [vmem:[#allocation5] sm:$0x1] (%p237_p6)  ;;  %s562_s29 = smov (%p237_p6), [#allocation7]  }
 0x19e   :  { %239 = sbr.rel (!%p237_p6) target bundleno = 411 (0x19b), region = 134  ;;  %320 = vst [vmem:[%s632_s2] sm:$0x1] (%p237_p6), %v319_v60  ;;  %s326_s1 = sshll.u32 (%p237_p6), %s562_s29, 4  ;;  %s327_s1 = int_to_ptr.vmem [resolvable:$true] %s326_s1 }
 0x19f   :  { %s492_s30 = scalar_lea.vmem (%p237_p6), %s327_s1, 16  ;;  %s496_s4 = scalar_lea.vmem (%p237_p6), %s327_s1, 32 }
 0x1a0   :  { %p493_p7 = scmp.ne.s32.totalorder (%p237_p6), %s327_s1, %s492_s30  ;;  %p497_p8 = scmp.lt.s32.totalorder (%p237_p6), %s327_s1, %s327_s1 }
 0x1a1   :  { %p498_p9 = scmp.lt.s32.totalorder (%p237_p6), %s496_s4, %s492_s30 }
 0x1a3   :  { %p499_p10 = por %p498_p9, %p497_p8 }
 0x1a5   :  { %p500_p11 = pnand %p499_p10, %p493_p7 }
 0x1a7   :  { %503 = shalt.err (!%p500_p11)
}
 0x1a8   :  { %329 = dma.vmem_to_hbm [thread:$0]  %s327_s1, 16, %s633_s3, [#allocation2]  }
 0x1a9   :  { %546 = dma.done.wait [#allocation2], 16  }
 0x1aa   :  { %547 = vsyncadd [#allocation2], 4294967280 }
 0x1ab   :  { %335 = vsyncpa [#allocation1], 1 }
 0x1ac   :  { %336 = vsyncpa [#allocation2], 1 }

// kernel: _lambda_.5
= control target key start
LH: loop header
LB: loop body
LE: loop exit
PB: predicated region body
PF: predicated region fallthrough
CT: control target
= control target key end

     0   :  { %s598_s9 = smov 0   ;;  %s703_s0 = inlined_call_operand.vmem [shape: f32[16,17], index: 0, kind: input, shape index: {}]   ;;  %s704_s1 = inlined_call_operand.vmem [shape: f32[17,1024], index: 1, kind: input, shape index: {}]   ;;  %s705_s2 = inlined_call_operand.vmem [shape: f32[16,1024], index: 2, kind: output, shape index: {}]  }
   0x1 LB: > { %s542_s10 = sadd.s32 4294967295, %s580_s9   ;;  %p546_p0 = scmp.ge.s32.totalorder %s580_s9, 1  ;;  %s580_s9 = sphi %s598_s9, %s12_s9  }
   0x2   : > { %p111_p1 = scmp.lt.s32.totalorder %s580_s9, 3 }
   0x4   : > { %p112_p2 = pnand %p546_p0, %p111_p1 }
   0x5   : > { %p132_p3 = scmp.lt.s32.totalorder (!%p112_p2), %s542_s10, 1 }
   0x6   : > { %115 = sbr.rel (%p112_p2) target bundleno = 223 (0xdf), region = 28 }
   0xb   : > { %v159_v0 = vld [vmem:[%s704_s1 + $0x88] sm:$0x1]  ;;  %vm170_vm0 = vcmask 1040384   ;;  %v161_v1 = vld [vmem:[%s704_s1 + $0x98] sm:$0x1]  ;;  %v150_v6 = vld [vmem:[%s704_s1 + $0x40] sm:$0xff] }
   0xc   : > { %v151_v2 = vld [vmem:[%s704_s1 + $0x48] sm:$0xff]  ;;  %550 = vmatprep.subr.msk.mxu0 %vm170_vm0, %v159_v0  ;;  %553 = vmatprep.subr.msk.mxu1 %vm170_vm0, %v161_v1  ;;  %v158_v3 = vld [vmem:[%s704_s1 + $0x80] sm:$0x1]  ;;  %v160_v4 = vld [vmem:[%s704_s1 + $0x90] sm:$0x1]  ;;  %s707_s10 = smov (!%p132_p3, %s542_s10), 1 }
   0xd   : > { %v153_v5 = vld [vmem:[%s704_s1 + $0x58] sm:$0xff]  ;;  %551 = vmatpush1.msk.msra.mxu0 %vm170_vm0, %v158_v3  ;;  %554 = vmatpush1.msk.msra.mxu1 %vm170_vm0, %v160_v4  ;;  %v152_v7 = vld [vmem:[%s704_s1 + $0x50] sm:$0xff]  ;;  %v143_v8 = vld [vmem:[%s704_s1 + $0x8] sm:$0xff]  ;;  %v582_v14 = vmov 0.0   ;;  %s547_s13 = sshll.u32 %s707_s10, 3  ;;  %vm166_vm1 = vcmask 138240  }
   0xe   : > { %223 = vmatprep.subr.mxu0 %v151_v2  ;;  %294 = vmatprep.subr.mxu1 %v153_v5  ;;  %v145_v9 = vld [vmem:[%s704_s1 + $0x18] sm:$0xff]  ;;  %v142_v10 = vld [vmem:[%s704_s1] sm:$0xff]  ;;  %v144_v11 = vld [vmem:[%s704_s1 + $0x10] sm:$0xff]  ;;  %s135_s16 = scalar_lea.vmem %s703_s0, %s547_s13  ;;  %s564_s11 = sshll.u32 %s707_s10, 6 }
   0xf   : > { %224 = vmatpush1.msra.mxu0 %v150_v6  ;;  %295 = vmatpush1.msra.mxu1 %v152_v7  ;;  %v163_v12 = vld [vmem:[%s704_s1 + $0xa8] sm:$0x1]  ;;  %v165_v13 = vld [vmem:[%s704_s1 + $0xb8] sm:$0x1]  ;;  %v162_v15 = vld [vmem:[%s704_s1 + $0xa0] sm:$0x1]  ;;  %s140_s14 = scalar_lea.vmem %s705_s2, %s564_s11 }
  0x10   : > { %225 = vmatprep.subr.mxu0 %v143_v8  ;;  %296 = vmatprep.subr.mxu1 %v145_v9  ;;  %v164_v16 = vld [vmem:[%s704_s1 + $0xb0] sm:$0x1]  ;;  %v141_v17 = vld [vmem:[%s135_s16] sm:$0xff]  ;;  %v155_v18 = vld [vmem:[%s704_s1 + $0x68] sm:$0xff] }
  0x11   : > { %226 = vmatpush1.msra.mxu0 %v142_v10  ;;  %259 = vmatprep.mubr.f32.mxu0 %v582_v14  ;;  %v157_v19 = vld [vmem:[%s704_s1 + $0x78] sm:$0xff]  ;;  %v154_v20 = vld [vmem:[%s704_s1 + $0x60] sm:$0xff]  ;;  %v156_v21 = vld [vmem:[%s704_s1 + $0x70] sm:$0xff] }
  0x12   : > { %297 = vmatpush1.msra.mxu1 %v144_v11  ;;  %330 = vmatprep.mubr.f32.mxu1 %v582_v14  ;;  %v147_v22 = vld [vmem:[%s704_s1 + $0x28] sm:$0xff]  ;;  %v149_v23 = vld [vmem:[%s704_s1 + $0x38] sm:$0xff]  ;;  %v146_v24 = vld [vmem:[%s704_s1 + $0x20] sm:$0xff] }
  0x13   : > { %556 = vmatprep.subr.msk.mxu0 %vm170_vm0, %v163_v12  ;;  %559 = vmatprep.subr.msk.mxu1 %vm170_vm0, %v165_v13  ;;  %v148_v25 = vld [vmem:[%s704_s1 + $0x30] sm:$0xff] }
  0x14   : > { %552 = vmatmul.mubr.msk.f32.vlgmr.msra.gmra.mxu0 %vm166_vm1, %v141_v17  ;;  %555 = vmatmul.mubr.msk.f32.vlgmr.msra.gmra.mxu1 %vm166_vm1, %v141_v17 }
  0x15   : > { %557 = vmatpush1.msk.msra.mxu0 %vm170_vm0, %v162_v15  ;;  %560 = vmatpush1.msk.msra.mxu1 %vm170_vm0, %v164_v16 }
  0x16   : > { %365 = vmatprep.subr.mxu0 %v155_v18  ;;  %436 = vmatprep.subr.mxu1 %v157_v19 }
  0x17   : > { %366 = vmatpush1.msra.mxu0 %v154_v20  ;;  %437 = vmatpush1.msra.mxu1 %v156_v21 }
  0x18   : > { %367 = vmatprep.subr.mxu0 %v147_v22  ;;  %438 = vmatprep.subr.mxu1 %v149_v23 }
  0x19   : > { %368 = vmatpush1.msra.mxu0 %v146_v24  ;;  %401 = vmatprep.mubr.f32.mxu0 %v582_v14 }
  0x1a   : > { %439 = vmatpush1.msra.mxu1 %v148_v25  ;;  %472 = vmatprep.mubr.f32.mxu1 %v582_v14 }
  0x1b   : > { %558 = vmatmul.mubr.msk.f32.vlgmr.msra.gmra.mxu0 %vm166_vm1, %v141_v17  ;;  %561 = vmatmul.mubr.msk.f32.vlgmr.msra.gmra.mxu1 %vm166_vm1, %v141_v17 }
  0xd4   : > { %v261_v26 = vpop.f32.mrf.mxu0  ;;  %v332_v27 = vpop.f32.mrf.mxu1 }
  0xd5   : > { %479 = vst [vmem:[%s140_s14] sm:$0xff] %v261_v26  ;;  %481 = vst [vmem:[%s140_s14 + $0x10] sm:$0xff] %v332_v27 }
  0xd6   : > { %v263_v28 = vpop.f32.mrf.mxu0  ;;  %v334_v29 = vpop.f32.mrf.mxu1 }
  0xd7   : > { %480 = vst [vmem:[%s140_s14 + $0x8] sm:$0xff] %v263_v28  ;;  %482 = vst [vmem:[%s140_s14 + $0x18] sm:$0xff] %v334_v29 }
  0xdb   : > { %v403_v30 = vpop.f32.mrf.mxu0  ;;  %v474_v31 = vpop.f32.mrf.mxu1 }
  0xdc   : > { %483 = vst [vmem:[%s140_s14 + $0x20] sm:$0xff] %v403_v30  ;;  %485 = vst [vmem:[%s140_s14 + $0x30] sm:$0xff] %v474_v31 }
  0xdd   : > { %v405_v32 = vpop.f32.mrf.mxu0  ;;  %v476_v33 = vpop.f32.mrf.mxu1 }
  0xde   : > { %484 = vst [vmem:[%s140_s14 + $0x28] sm:$0xff] %v405_v32  ;;  %486 = vst [vmem:[%s140_s14 + $0x38] sm:$0xff] %v476_v33 }
  0xdf PF: > { %s12_s9 = sadd.s32 1, %s580_s9  }
  0xe0   : > { %p9_p4 = scmp.ge.s32.totalorder %s12_s9, 4  }
  0xe2   :  { %11 = sbr.rel (!%p9_p4) target bundleno = 1 (0x1), region = 58 }

// kernel: custom-call.18
= control target key start
LH: loop header
LB: loop body
LE: loop exit
PB: predicated region body
PF: predicated region fallthrough
CT: control target
= control target key end

     0   :  { %5 = vsyncpa [#allocation1], 0  ;;  %s631_s0 = inlined_call_operand.hbm [shape: f32[6,6], index: 0, kind: input, shape index: {}]   ;;  %s632_s1 = inlined_call_operand.vmem [shape: f32[6,6], index: 1, kind: output, shape index: {0}]   ;;  %s633_s2 = inlined_call_operand.vmem [shape: s32[6], index: 2, kind: output, shape index: {1}]   ;;  %s634_s3 = inlined_call_operand.hbm [shape: s32[6], index: 3, kind: output, shape index: {2}]  }
   0x1   :  { %6 = vsyncpa [#allocation2], 0  ;;  %s560_s12 = smov [#allocation0]  }
   0x2   :  { %s10_s13 = sshll.u32 %s560_s12, 4  ;;  %s11_s13 = int_to_ptr.vmem [resolvable:$true] %s10_s13 }
   0x3   :  { %s480_s14 = scalar_lea.vmem %s11_s13, 128  ;;  %p485_p1 = scmp.lt.s32.totalorder %s11_s13, %s11_s13 }
   0x4   :  { %p481_p0 = scmp.ne.s32.totalorder %s11_s13, %s480_s14  ;;  %p486_p2 = scmp.lt.s32.totalorder %s480_s14, %s480_s14 }
   0x6   :  { %p487_p3 = por %p486_p2, %p485_p1 }
   0x8   :  { %p488_p4 = pnand %p487_p3, %p481_p0 }
   0xa   :  { %491 = shalt.err (!%p488_p4)
}
   0xb   :  { %13 = dma.hbm_to_vmem [thread:$0]  %s631_s0, 128, %s11_s13, [#allocation1]  }
   0xc   :  { %544 = dma.done.wait [#allocation1], 128  }
   0xd   :  { %545 = vsyncadd [#allocation1], 4294967168  ;;  %v18_v0 = vlaneseq  ;;  %v561_v1 = vmov 0   ;;  %v15_v3 = vld [vmem:[#allocation0] sm:$0xff]  ;;  %s590_s17 = smov 0  }
   0xe   :  { %17 = vst [vmem:[#allocation4] sm:$0x1] %v561_v1  ;;  %16 = vst [vmem:[#allocation3] sm:$0xff] %v15_v3 }
   0xf   :  { %v587_v2 = vshrl.u32 %v18_v0, 7 }
  0x11   :  { %22 = vst [vmem:[#allocation8] sm:$0xff] %v587_v2 }
  0x12 LB: > { %vm38_vm0 = vcmp.lt.s32.totalorder %v587_v2, 6  ;;  %v597_v6 = vstv %s550_s17  ;;  %s79_s0 = ssub.s32 128, %s550_s17  ;;  %v85_v36 = vand.u32 127, %v18_v0  ;;  %s91_s18 = scalar_lea.vmem [#allocation3], %s550_s17  ;;  %s550_s17 = sphi %s590_s17, %s28_s17  }
  0x13   : > { %vm37_vm1 = vcmp.ge.s32.totalorder %v587_v2, %v597_v6  ;;  %s97_s20 = scalar_lea.vmem [#allocation8], %s550_s17  ;;  %vm117_vm15 = vcmp.gt.s32.totalorder %v587_v2, %v597_v6  ;;  %s28_s17 = sadd.s32 1, %s550_s17  }
  0x14   : > { %vm39_vm3 = vmand %vm37_vm1, %vm38_vm0  ;;  %vm109_vm12 = vcmp.gt.s32.totalorder %v85_v36, %v597_v6  ;;  %vm86_vm13 = vcmp.eq.s32.totalorder %v85_v36, %v597_v6  ;;  %p25_p5 = scmp.ge.s32.totalorder %s28_s17, 6  }
  0x15   : > { %v33_v4 = vld [vmem:[#allocation3] sm:$0xff]  ;;  %v88_v38 = vld [vmem:[#allocation4] ss:$0 sm:$0xff]  ;;  %v93_v39 = vld [vmem:[%s91_s18] ss:$0 sm:$0xff]  ;;  %s552_s25 = smov (%p25_p5), %s632_s1   ;;  %s556_s26 = smov (%p25_p5), [#allocation3]  }
  0x16   : > { %v34_v5 = vand.u32 2147483647, %v33_v4  ;;  %vm121_vm1 = vmand %vm117_vm15, %vm86_vm13 }
  0x18   : > { %vm392_vm2 = vcmp.gt.f32.partialorder %v34_v5, -inf  ;;  %v99_v40 = vld [vmem:[%s97_s20] ss:$0 sm:$0xff] }
  0x19   : > { %vm41_vm4 = vmand %vm39_vm3, %vm392_vm2 }
  0x1a   : > { %v42_v7 = vsel %vm41_vm4, %v587_v2, %v597_v6  ;;  %v43_v8 = vsel %vm41_vm4, %v34_v5, -inf }
  0x1b   : > { %v44_v9 = vrot.slane %v43_v8, 1  ;;  %v45_v10 = vrot.slane %v42_v7, 1 }
  0x1d   : > { %vm46_vm5 = vcmp.ge.f32.partialorder %v44_v9, %v43_v8  ;;  %v49_v11 = vrot.slane %v44_v9, 1  ;;  %v50_v12 = vrot.slane %v45_v10, 1 }
  0x1e   : > { %v47_v13 = vsel %vm46_vm5, %v44_v9, %v43_v8  ;;  %v48_v14 = vsel %vm46_vm5, %v45_v10, %v42_v7 }
  0x1f   : > { %vm51_vm6 = vcmp.ge.f32.partialorder %v49_v11, %v47_v13  ;;  %v54_v15 = vrot.slane %v49_v11, 1  ;;  %v55_v16 = vrot.slane %v50_v12, 1 }
  0x20   : > { %v52_v17 = vsel %vm51_vm6, %v49_v11, %v47_v13  ;;  %v53_v18 = vsel %vm51_vm6, %v50_v12, %v48_v14 }
  0x21   : > { %vm56_vm7 = vcmp.ge.f32.partialorder %v54_v15, %v52_v17  ;;  %v59_v19 = vrot.slane %v54_v15, 1  ;;  %v60_v20 = vrot.slane %v55_v16, 1 }
  0x22   : > { %v57_v21 = vsel %vm56_vm7, %v54_v15, %v52_v17  ;;  %v58_v22 = vsel %vm56_vm7, %v55_v16, %v53_v18 }
  0x23   : > { %vm61_vm8 = vcmp.ge.f32.partialorder %v59_v19, %v57_v21  ;;  %v64_v23 = vrot.slane %v59_v19, 1  ;;  %v65_v24 = vrot.slane %v60_v20, 1 }
  0x24   : > { %v62_v25 = vsel %vm61_vm8, %v59_v19, %v57_v21  ;;  %v63_v26 = vsel %vm61_vm8, %v60_v20, %v58_v22 }
  0x25   : > { %vm66_vm9 = vcmp.ge.f32.partialorder %v64_v23, %v62_v25  ;;  %v69_v27 = vrot.slane %v64_v23, 1  ;;  %v70_v28 = vrot.slane %v65_v24, 1 }
  0x26   : > { %v67_v29 = vsel %vm66_vm9, %v64_v23, %v62_v25  ;;  %v68_v30 = vsel %vm66_vm9, %v65_v24, %v63_v26 }
  0x27   : > { %vm71_vm10 = vcmp.ge.f32.partialorder %v69_v27, %v67_v29  ;;  %v74_v31 = vrot.slane %v69_v27, 1  ;;  %v75_v32 = vrot.slane %v70_v28, 1 }
  0x28   : > { %v72_v33 = vsel %vm71_vm10, %v69_v27, %v67_v29  ;;  %v73_v34 = vsel %vm71_vm10, %v70_v28, %v68_v30 }
  0x29   : > { %vm76_vm11 = vcmp.ge.f32.partialorder %v74_v31, %v72_v33 }
  0x2a   : > { %v78_v35 = vsel %vm76_vm11, %v75_v32, %v73_v34 }
  0x2b   : > { %80 = vrot.lane.b32.xlu0 %v78_v35, %s79_s0 }
  0x9d   : > { %v81_v37 = vpop.permute.xlu0 %80 }
  0x9e   : > { %400 = vpush %v81_v37 }
  0xcf   : > { %s401_s19 = spop %400 }
  0xd0   : > { %v87_v41 = vstv %s401_s19  ;;  %s92_s21 = scalar_lea.vmem [#allocation3], %s401_s19  ;;  %s98_s22 = scalar_lea.vmem [#allocation8], %s401_s19 }
  0xd1   : > { %v94_v42 = vld [vmem:[%s92_s21] ss:$0 sm:$0xff]  ;;  %v89_v44 = vsel %vm86_vm13, %v87_v41, %v88_v38 }
  0xd2   : > { %v100_v43 = vld [vmem:[%s98_s22] ss:$0 sm:$0xff]  ;;  %95 = vst [vmem:[%s92_s21] sm:$0x1] %v93_v39  ;;  %vm103_vm14 = vcmp.ne.f32.partialorder %v94_v42, 0.0  ;;  %90 = vst [vmem:[#allocation4] sm:$0x1] %v89_v44 }
  0xd3   : > { %101 = vst [vmem:[%s98_s22] sm:$0x1] %v99_v40  ;;  %96 = vst [vmem:[%s91_s18] sm:$0x1] %v94_v42  ;;  %v110_v51 = vsel %vm109_vm12, %v94_v42, 0.0 }
  0xd4   : > { %102 = vst [vmem:[%s97_s20] sm:$0x1] %v100_v43  ;;  %vm104_vm0 = vmand %vm86_vm13, %vm103_vm14 }
  0xd5   : > { %v105_v45 = vsel %vm104_vm0, %v94_v42, 1.0 }
  0xd6   : > { %v118_v46 = vsel %vm117_vm15, %v105_v45, 1.0 }
  0xd7   : > { %470 = vrcp.f32 %v118_v46 }
  0xd9   :  { %v181_v56 = vld [vmem:[#allocation4] sm:$0x1] (%p25_p5) }
  0xda   : > { %v114_v48 = vld [vmem:[#allocation3] sm:$0xff]  ;;  %184 = vst [vmem:[#allocation5] sm:$0x1] (%p25_p5), %v181_v56 }
  0xdb   :  { %v128_v55 = vld [vmem:[#allocation8] sm:$0xff] (%p25_p5) }
  0xe4   : > { %v471_v47 = vpop.eup %470 }
  0xe5   : > { %v120_v49 = vmul.f32 %v471_v47, %v114_v48 }
  0xe7   : > { %v122_v50 = vsel %vm121_vm1, %v120_v49, 0.0 }
  0xe8   : > { %123 = vadd.xlane.f32.xlu0 %v122_v50 }
 0x115   :  { %144 = vxpose.xlu0.b32.start.end [1/1] (short) (narrow) (%p25_p5), %v128_v55, 8 }
 0x171   : > { %v124_v52 = vpop.xlane.xlu0 %123 }
 0x172   : > { %v125_v53 = vmul.f32 %v124_v52, %v110_v51  ;;  %27 = sbr.rel (!%p25_p5) target bundleno = 18 (0x12), region = 112 }
 0x174   : > { %v126_v54 = vsub.f32 %v120_v49, %v125_v53 }
 0x176   : > { %127 = vst [vmem:[#allocation3] sm:$0xff] %v126_v54 }
 0x191   :  { %v160_v57 = vpop.trf.xlu0 }
 0x192   :  { %176 = vst [vmem:[#allocation6] sm:$0x1] %v160_v57 }
 0x199   :  { %v189_v58 = vld [vmem:[#allocation6] sm:$0x1] }
 0x19a   :  { %192 = vst [vmem:[#allocation7] sm:$0x1] %v189_v58 }
 0x19b LB: > { %v240_v59 = vld [vmem:[%s558_s26] sm:$0xff]  ;;  %s242_s26 = scalar_lea.vmem %s558_s26, 8   ;;  %s558_s26 = sphi %s556_s26, %s242_s26   ;;  %s554_s25 = sphi %s552_s25, %s243_s25  }
 0x19c   : > { %241 = vst [vmem:[%s554_s25] sm:$0xff] %v240_v59  ;;  %s243_s25 = scalar_lea.vmem %s554_s25, 8   ;;  %p237_p6 = scmp.gt.s32.totalorder %s242_s26, [#allocation3] }
 0x19d   :  { %v319_v60 = vld [vmem:[#allocation5] sm:$0x1] (%p237_p6)  ;;  %s562_s29 = smov (%p237_p6), [#allocation7]  }
 0x19e   :  { %239 = sbr.rel (!%p237_p6) target bundleno = 411 (0x19b), region = 134  ;;  %320 = vst [vmem:[%s633_s2] sm:$0x1] (%p237_p6), %v319_v60  ;;  %s326_s1 = sshll.u32 (%p237_p6), %s562_s29, 4  ;;  %s327_s1 = int_to_ptr.vmem [resolvable:$true] %s326_s1 }
 0x19f   :  { %s492_s30 = scalar_lea.vmem (%p237_p6), %s327_s1, 16  ;;  %s496_s4 = scalar_lea.vmem (%p237_p6), %s327_s1, 32 }
 0x1a0   :  { %p493_p7 = scmp.ne.s32.totalorder (%p237_p6), %s327_s1, %s492_s30  ;;  %p497_p8 = scmp.lt.s32.totalorder (%p237_p6), %s327_s1, %s327_s1 }
 0x1a1   :  { %p498_p9 = scmp.lt.s32.totalorder (%p237_p6), %s496_s4, %s492_s30 }
 0x1a3   :  { %p499_p10 = por %p498_p9, %p497_p8 }
 0x1a5   :  { %p500_p11 = pnand %p499_p10, %p493_p7 }
 0x1a7   :  { %503 = shalt.err (!%p500_p11)
}
 0x1a8   :  { %329 = dma.vmem_to_hbm [thread:$0]  %s327_s1, 16, %s634_s3, [#allocation2]  }
 0x1a9   :  { %546 = dma.done.wait [#allocation2], 16  }
 0x1aa   :  { %547 = vsyncadd [#allocation2], 4294967280 }
 0x1ab   :  { %335 = vsyncpa [#allocation1], 1 }
 0x1ac   :  { %336 = vsyncpa [#allocation2], 1 }

// kernel: _lambda_.6
= control target key start
LH: loop header
LB: loop body
LE: loop exit
PB: predicated region body
PF: predicated region fallthrough
CT: control target
= control target key end

     0   :  { %s2433_s0 = inlined_call_operand.vmem [shape: f32[2,8,128], index: 0, kind: input, shape index: {}]   ;;  %s2434_s1 = inlined_call_operand.vmem [shape: f32[2,32,128], index: 1, kind: input, shape index: {}]   ;;  %s2435_s2 = inlined_call_operand.vmem [shape: f32[4,8], index: 2, kind: input, shape index: {}]   ;;  %s2436_s3 = inlined_call_operand.vmem [shape: f32[4,8], index: 3, kind: input, shape index: {}]   ;;  %s2437_s4 = inlined_call_operand.vmem [shape: f32[16,4], index: 4, kind: input, shape index: {}]   ;;  %s2438_s5 = inlined_call_operand.vmem [shape: f32[16,1], index: 5, kind: input, shape index: {}]   ;;  %s2439_s6 = inlined_call_operand.vmem [shape: f32[64,32], index: 6, kind: input, shape index: {}]   ;;  %s2440_s7 = inlined_call_operand.vmem [shape: f32[64,1], index: 7, kind: input, shape index: {}]   ;;  %s2441_s8 = inlined_call_operand.vmem [shape: f32[2,32,48], index: 8, kind: input, shape index: {}]   ;;  %s2442_s9 = inlined_call_operand.vmem [shape: f32[2,32,1], index: 9, kind: input, shape index: {}]   ;;  %s2443_s10 = inlined_call_operand.vmem [shape: f32[2,32,16], index: 10, kind: input, shape index: {}]   ;;  %s2444_s11 = inlined_call_operand.vmem [shape: f32[2,32,1], index: 11, kind: input, shape index: {}]   ;;  %s2445_s12 = inlined_call_operand.vmem [shape: f32[4,16], index: 12, kind: input, shape index: {}]   ;;  %s2446_s13 = inlined_call_operand.vmem [shape: f32[4,1], index: 13, kind: input, shape index: {}]   ;;  %s2447_s14 = inlined_call_operand.vmem [shape: f32[4,16], index: 14, kind: input, shape index: {}]   ;;  %s2448_s15 = inlined_call_operand.vmem [shape: f32[4,1], index: 15, kind: input, shape index: {}]   ;;  %s2449_s16 = inlined_call_operand.vmem [shape: f32[2,4,128], index: 16, kind: output, shape index: {0}]   ;;  %s2450_s17 = inlined_call_operand.vmem [shape: f32[2,4,128], index: 17, kind: output, shape index: {1}]   ;;  %s2451_s18 = inlined_call_operand.hbm [shape: f32[2,4,128], index: 18, kind: output, shape index: {2}]  }
   0x1   :  { %2458 = sst [smem:[#allocation11_spill]] %s2433_s0 }
   0x2   :  { %2459 = sst [smem:[#allocation12_spill]] %s2434_s1 }
   0x3   :  { %2460 = sst [smem:[#allocation13_spill]] %s2435_s2 }
   0x4   :  { %2461 = sst [smem:[#allocation14_spill]] %s2436_s3 }
   0x5   :  { %2462 = sst [smem:[#allocation15_spill]] %s2438_s5 }
   0x6   :  { %24 = vsyncpa [#allocation3], 0 }
   0x7   :  { %26 = vsyncpa [#allocation3 + $0x1], 0  ;;  %s2094_s27 = smov 0   ;;  %s2096_s28 = smov 0  }
   0x8   :  { %s2098_s29 = smov 0   ;;  %s2100_s30 = smov 0  }
   0x9 LB: > { %2463 = sst [smem:[#allocation5_spill]] %s1977_s27  ;;  %s2115_s0 = sadd.s32 4294967295, %s1989_s30   ;;  %s1989_s30 = sphi %s2100_s30, %s2479_s30   ;;  %s1985_s29 = sphi %s2098_s29, %s2481_s29   ;;  %s1981_s28 = sphi %s2096_s28, %s2483_s28   ;;  %s1977_s27 = sphi %s2094_s27, %s2482_s27  }
   0xa   : > { %2464 = sst [smem:[#allocation6_spill]] %s1985_s29  ;;  %s1667_s19 = sadd.s32 4294967294, %s1989_s30  }
   0xb   : > { %2465 = sst [smem:[#allocation7_spill]] %s1989_s30  ;;  %s2119_s1 = sadd.s32 1, %s1989_s30  }
   0xc   : > { %2466 = sst [smem:[#allocation8_spill]] %s2119_s1  ;;  %s437_s20 = sadd.s32 1, %s1985_s29 }
   0xd   : > { %s434_s21 = ssub.s32 %s1989_s30, %s2119_s1  ;;  %p447_p0 = scmp.ne.s32.totalorder %s1985_s29, %s1981_s28 }
   0xe   : > { %p435_p1 = scmp.eq.s32.totalorder %s434_s21, 0  ;;  %p448_p2 = scmp.eq.s32.totalorder %s2115_s0, 1 }
   0xf   : > { %p453_p3 = scmp.ne.s32.totalorder %s1981_s28, %s1977_s27  ;;  %p454_p4 = scmp.eq.s32.totalorder %s1667_s19, 1 }
  0x10   : > { %s2130_s22 = scalar_select %p435_p1, %s1985_s29, %s437_s20  }
  0x11   : > { %p2132_p5 = por %p448_p2, %p447_p0  ;;  %p2136_p6 = por %p454_p4, %p453_p3 }
  0x12   : > { %2467 = sst [smem:[#allocation9_spill]] %s2130_s22  ;;  %p1670_p7 = scmp.ge.s32.totalorder %s1989_s30, 1 }
  0x13   : > { %s2469_s23 = scalar_select %p2136_p6, 1, 0 }
  0x14   : > { %p529_p8 = scmp.lt.s32.totalorder %s1989_s30, 3 }
  0x15   : > { %2470 = sst [smem:[#allocation10_spill]] %s2469_s23 }
  0x16   : > { %p530_p9 = pnand %p1670_p7, %p529_p8 }
  0x17   : > { %p595_p10 = scmp.lt.s32.totalorder (!%p530_p9), %s2115_s0, 1  ;;  %s2471_s20 = sld [smem:[#allocation11_spill]] (!%p530_p9) }
  0x18   : > { %533 = sbr.rel (%p530_p9) target bundleno = 1817 (0x719), region = 84  ;;  %s2472_s1 = sld [smem:[#allocation13_spill]] (!%p530_p9) }
  0x19   : > { %s2473_s3 = sld [smem:[#allocation14_spill]] (!%p530_p9)  ;;  %s1997_s26 = smov (!%p530_p9), 126  }
  0x1a   : > { %s2474_s5 = sld [smem:[#allocation15_spill]] (!%p530_p9)  ;;  %s592_s29 = sand.u32 (!%p530_p9), 1, %s1981_s28  }
  0x1d   : > { %v1991_v0 = vmov 0.0   ;;  %vm1992_vm0 = vmmov 0   ;;  %s2147_s24 = scalar_select %p595_p10, %s2115_s0, 1  ;;  %vm615_vm1 = vcmask 64512   ;;  %v1993_v5 = vmov 0   ;;  %v848_v7 = vld [vmem:[%s2440_s7 + $0x10] sm:$0xff] }
  0x1e   : > { %1763 = vmatprep.subr.mxu0 %v1991_v0  ;;  %1765 = vmatprep.mubr.msk.f32.mxu0 %vm1992_vm0, %v1991_v0  ;;  %v614_v1 = vld [vmem:[%s2472_s1] sm:$0xf]  ;;  %v1005_v8 = vld [vmem:[%s2442_s9 + $0x10] sm:$0xff]  ;;  %vm783_vm2 = vcmask 1041408   ;;  %v764_v16 = vld [vmem:[%s2437_s4 + $0x8] sm:$0xff]  ;;  %vm779_vm3 = vcmask 31744   ;;  %v972_v50 = vlaneseq }
  0x1f   : > { %1768 = vmatprep.subr.mxu1 %v1991_v0  ;;  %1770 = vmatprep.mubr.msk.f32.mxu1 %vm1992_vm0, %v1991_v0  ;;  %s1672_s25 = sshll.u32 %s2147_s24, 3  ;;  %v689_v3 = vld [vmem:[%s2473_s3] sm:$0xf]  ;;  %s1730_s27 = sshll.u32 %s2147_s24, 5  ;;  %v829_v20 = vld [vmem:[%s2439_s6 + $0x8] sm:$0xff]  ;;  %vm894_vm4 = vcmask 261120  }
  0x20   : > { %s598_s21 = scalar_lea.vmem %s2471_s20, %s1672_s25  ;;  %v767_v4 = vld [vmem:[%s2474_s5] sm:$0xff]  ;;  %1881 = vset.pattern.permute.xlu0 %v1993_v5  ;;  %1892 = vset.pattern.permute.xlu1 %v1993_v5  ;;  %v768_v6 = vld [vmem:[%s2474_s5 + $0x8] sm:$0xff]  ;;  %s1675_s22 = sshll.u32 %s2147_s24, 2  ;;  %v830_v28 = vld [vmem:[%s2439_s6 + $0x10] sm:$0xff]  ;;  %vm1027_vm5 = vcmask 392192   ;;  %v2246_v51 = vand.u32 127, %v972_v50 }
  0x21   : > { %v613_v2 = vld [vmem:[%s598_s21] sm:$0xff]  ;;  %771 = vperm.xlu0 %1881, %v767_v4   ;;  %s2475_s3 = sld [smem:[#allocation12_spill]]  ;;  %s607_s30 = scalar_lea.vmem %s2449_s16, %s1675_s22  ;;  %v831_v29 = vld [vmem:[%s2439_s6 + $0x18] sm:$0xff]  ;;  %v995_v43 = vld [vmem:[%s2441_s8 + $0x8] sm:$0xff]  ;;  %vm1134_vm10 = vcmask 130048  }
  0x22   : > { %1764 = vmatpush3.msra.mxu0 %v613_v2  ;;  %1769 = vmatpush3.msra.mxu1 %v613_v2  ;;  %v846_v9 = vld [vmem:[%s2440_s7] sm:$0xff]  ;;  %v841_v30 = vpack.c.bf16 %v831_v29, %v830_v28  ;;  %v849_v45 = vld [vmem:[%s2440_s7 + $0x18] sm:$0xff]  ;;  %v847_v47 = vld [vmem:[%s2440_s7 + $0x8] sm:$0xff]  ;;  %v988_v52 = vadd.s32 1, %v2246_v51  ;;  %v978_v56 = vadd.s32 4294967295, %v2246_v51  ;;  %s1671_s1 = sshll.u32 %s592_s29, 2 }
  0x23   : > { %1766 = vmatmul.mubr.msk.f32.vlgmr.msra.gmra.mxu0 %vm615_vm1, %v614_v1  ;;  %1773 = vmatprep.subr.bf16.mxu1 %v1991_v0  ;;  %v1003_v10 = vld [vmem:[%s2442_s9] sm:$0xff]  ;;  %v1006_v46 = vld [vmem:[%s2442_s9 + $0x18] sm:$0xff]  ;;  %v1004_v48 = vld [vmem:[%s2442_s9 + $0x8] sm:$0xff]  ;;  %s1998_s25 = smov [#allocation2]  }
  0x24   : > { %1771 = vmatmul.mubr.msk.f32.vlgmr.msra.gmra.mxu1 %vm615_vm1, %v689_v3  ;;  %v1110_v11 = vld [vmem:[%s2444_s11] sm:$0xff]  ;;  %v1111_v49 = vld [vmem:[%s2444_s11 + $0x8] sm:$0xff]  ;;  %vm990_vm6 = vcmp.lt.s32.totalorder %v988_v52, 128  ;;  %vm979_vm8 = vcmp.ge.s32.totalorder %v978_v56, 0  ;;  %v996_v63 = vld [vmem:[%s2441_s8 + $0x10] sm:$0xff] }
  0x25   : > { %1775 = vmatprep.mubr.msk.bf16.mxu1 %vm1992_vm0, %v1991_v0  ;;  %776 = vperm.xlu0 %1881, %v768_v6   ;;  %v763_v15 = vld [vmem:[%s2437_s4] sm:$0xff]  ;;  %vm1684_vm7 = vmpackc.low %vm990_vm6, %vm990_vm6  ;;  %v997_v1 = vld [vmem:[%s2441_s8 + $0x18] sm:$0xff] }
  0x26   : > { %v828_v19 = vld [vmem:[%s2439_s6] sm:$0xff]  ;;  %v765_v25 = vpack.c.bf16 %v764_v16, %v763_v15  ;;  %vm1687_vm9 = vmpackc.low %vm979_vm8, %vm979_vm8  ;;  %v999_v2 = vpack.c.bf16 %v997_v1, %v996_v63  ;;  %v1104_v4 = vld [vmem:[%s2443_s10 + $0x8] sm:$0xff] }
  0x27   : > { %s603_s5 = scalar_lea.vmem %s2475_s3, %s1730_s27  ;;  %v840_v26 = vpack.c.bf16 %v829_v20, %v828_v19  ;;  %v994_v42 = vld [vmem:[%s2441_s8] sm:$0xff]  ;;  %s1994_s3 = smov 127   ;;  %v1105_v56 = vld [vmem:[%s2443_s10 + $0x10] sm:$0xff] }
  0x28   : > { %v838_v12 = vld [vmem:[%s603_s5 + $0x10] sm:$0xff]  ;;  %v839_v13 = vld [vmem:[%s603_s5 + $0x18] sm:$0xff]  ;;  %v836_v22 = vld [vmem:[%s603_s5] sm:$0xff]  ;;  %v998_v44 = vpack.c.bf16 %v995_v43, %v994_v42  ;;  %s1995_s27 = smov 1  }
  0x29   : > { %866 = vperm.xlu0 %1881, %v848_v7   ;;  %v845_v18 = vpack.c.bf16 %v839_v13, %v838_v12  ;;  %v837_v23 = vld [vmem:[%s603_s5 + $0x8] sm:$0xff]  ;;  %v1103_v3 = vld [vmem:[%s2443_s10] sm:$0xff]  ;;  %s1996_s5 = smov 2  }
  0x2a   : > { %v844_v27 = vpack.c.bf16 %v837_v23, %v836_v22  ;;  %1797 = vmatprep.mubr.msk.bf16.mxu0 %vm1027_vm5, %v998_v44  ;;  %v1107_v5 = vpack.c.bf16 %v1104_v4, %v1103_v3  ;;  %v832_v6 = vld [vmem:[%s2439_s6 + $0x20] sm:$0xff]  ;;  %v833_v7 = vld [vmem:[%s2439_s6 + $0x28] sm:$0xff] }
  0x2d   : > { %1019 = vperm.xlu0 %1881, %v1005_v8   ;;  %v834_v8 = vld [vmem:[%s2439_s6 + $0x30] sm:$0xff] }
  0x31   : > { %856 = vperm.xlu0 %1881, %v846_v9   ;;  %v842_v9 = vpack.c.bf16 %v833_v7, %v832_v6 }
  0x35   : > { %1009 = vperm.xlu0 %1881, %v1003_v10   ;;  %v835_v10 = vld [vmem:[%s2439_s6 + $0x38] sm:$0xff] }
  0x39   : > { %1116 = vperm.xlu0 %1881, %v1110_v11   ;;  %v843_v11 = vpack.c.bf16 %v835_v10, %v834_v8  ;;  %v1697_v10 = vld [vmem:[%s2441_s8 + $0x28] sm:$0xff] }
  0x9c   : > { %v772_v33 = vpop.permute.xlu0 %771 }
  0xa0   : > { %v777_v36 = vpop.permute.xlu0 %776 }
  0xa4   : > { %v867_v12 = vpop.permute.xlu0 %866 }
  0xa8   : > { %v1020_v15 = vpop.permute.xlu0 %1019 }
  0xac   : > { %v857_v29 = vpop.permute.xlu0 %856 }
  0xe3   : > { %v685_v14 = vpop.f32.mrf.mxu0 }
  0xe4   : > { %v766_v17 = vpack.c.bf16 %v685_v14, %v685_v14  ;;  %1513 = vst [vmem:[%s607_s30] sm:$0xf] %v685_v14  ;;  %v2216_v31 = vpop.f32.mrf.mxu1 }
  0xe5   : > { %v1767_v21 = vpop.f32.mrf.mxu0 }
  0xe6   : > { %v785_v24 = vsel %vm783_vm2, %v766_v17, 0  ;;  %v1772_v32 = vpop.f32.mrf.mxu1 }
  0xe7   : > { %1774 = vmatpush3.bf16.msra.mxu1 %v785_v24 }
  0xe8   : > { %1779 = vmatprep.subr.bf16.mxu1 %v845_v18 }
  0xea   : > { %1776 = vmatmul.mubr.msk.bf16.vlgmr.msra.gmra.mxu1 %vm779_vm3, %v765_v25 }
  0xeb   : > { %1780 = vmatpush3.bf16.msra.mxu1 %v845_v18  ;;  %1783 = vmatprep.mubr.msk.bf16.mxu1 %vm894_vm4, %v840_v26 }
  0xec   : > { %1781 = vmatprep.subr.bf16.mxu1 %v844_v27 }
  0xef   : > { %1782 = vmatpush3.bf16.msra.mxu1 %v844_v27 }
  0xf2   : > { %1784 = vmatmul.mubr.msk.bf16.vlgmr.msra.gmra.mxu1 %vm894_vm4, %v841_v30 }
  0xf3   : > { %1787 = vmatprep.mubr.msk.bf16.mxu1 %vm894_vm4, %v842_v9  ;;  %v1696_v9 = vld [vmem:[%s2441_s8 + $0x20] sm:$0xff] }
  0xfa   : > { %1788 = vmatmul.mubr.msk.bf16.gmra.mxu1 %vm894_vm4, %v843_v11  ;;  %v1219_v11 = vpack.c.bf16 %v1697_v10, %v1696_v9 }
  0xfc   : > { %1813 = vmatprep.mubr.msk.bf16.mxu1 %vm1027_vm5, %v1219_v11 }
 0x1aa   : > { %v821_v34 = vpop.f32.mrf.mxu1 }
 0x1ab   : > { %v2218_v38 = vadd.f32 %v821_v34, %v772_v33  ;;  %v1010_v33 = vpop.permute.xlu0 %1009 }
 0x1ac   : > { %v1777_v35 = vpop.f32.mrf.mxu1 }
 0x1ae   : > { %v824_v37 = vpop.f32.mrf.mxu1 }
 0x1af   : > { %v2220_v39 = vadd.f32 %v824_v37, %v777_v36 }
 0x1b0   : > { %v1778_v40 = vpop.f32.mrf.mxu1 }
 0x1b1   : > { %v1882_v41 = vpack.i.bf16 %v2220_v39, %v2218_v38  ;;  %v1001_v61 = vpack.c.bf16 %v2220_v39, %v2218_v38 }
 0x1b2   : > { %v1785_v13 = vpop.f32.mrf.mxu1 }
 0x1b3   : > { %1883 = vrot.lane.b32.xlu1 %v1882_v41, %s1994_s3  ;;  %v950_v17 = vadd.f32 %v1785_v13, %v867_v12  ;;  %v1703_v12 = vld [vmem:[%s2442_s9 + $0x38] sm:$0xff]  ;;  %v1702_v13 = vld [vmem:[%s2442_s9 + $0x30] sm:$0xff]  ;;  %s1727_s3 = sshll.u32 %s2115_s0, 6  ;;  %s1529_s0 = scalar_lea.sflag [#allocation3], %s592_s29 }
 0x1b4   : > { %v941_v18 = vpop.f32.mrf.mxu1  ;;  %s2386_s20 = scalar_lea.hbm %s2451_s18, %s1727_s3 }
 0x1b5   : > { %v942_v40 = vadd.f32 %v941_v18, %v857_v29  ;;  %v1113_v18 = vld [vmem:[%s2444_s11 + $0x18] sm:$0xff] }
 0x1b6   : > { %v1786_v21 = vpop.f32.mrf.mxu1 }
 0x1b7   : > { %1888 = vrot.lane.b32.xlu1 %v1882_v41, %s1995_s27  ;;  %s594_s27 = scalar_lea.vmem [#allocation2], %s1671_s1 }
 0x1b8   : > { %v944_v37 = vpop.f32.mrf.mxu1  ;;  %s1548_s23 = sshll.u32 %s594_s27, 4  ;;  %s2388_s23 = int_to_ptr.vmem [resolvable:$true] %s1548_s23 }
 0x1b9   : > { %s1929_s21 = scalar_lea.vmem %s2388_s23, 64 }
 0x1ba   : > { %p1930_p11 = scmp.ne.s32.totalorder %s2388_s23, %s1929_s21 }
 0x1bb   : > { %871 = vperm.xlu1 %1892, %v849_v45  }
 0x1bc   : > { %p1931_p12 = pnand %p1930_p11, %p2132_p5 }
 0x1be   : > { %p1932_p13 = pneg %p1931_p12 }
 0x1bf   : > { %1024 = vperm.xlu1 %1892, %v1006_v46  }
 0x1c3   : > { %861 = vperm.xlu1 %1892, %v847_v47  }
 0x1c7   : > { %1014 = vperm.xlu1 %1892, %v1004_v48  }
 0x1cb   : > { %1121 = vperm.xlu1 %1892, %v1111_v49  }
 0x225   : > { %v1884_v53 = vpop.permute.xlu1 %1883 }
 0x226   : > { %v1886_v54 = vunpack.i.h.bf16 %v1884_v53  ;;  %v1885_v55 = vunpack.i.l.bf16 %v1884_v53 }
 0x228   : > { %v1685_v57 = vpack.c.bf16 %v1886_v54, %v1885_v55 }
 0x229   : > { %v1889_v58 = vpop.permute.xlu1 %1888 }
 0x22a   : > { %v1891_v59 = vunpack.i.h.bf16 %v1889_v58  ;;  %v1890_v60 = vunpack.i.l.bf16 %v1889_v58  ;;  %1791 = vmatprep.subr.msk.bf16.mxu0 %vm1684_vm7, %v1685_v57 }
 0x22b   : > { %1792 = vmatpush3.bf16.msk.msra.mxu0 %vm1684_vm7, %v1685_v57  ;;  %v1106_v57 = vld [vmem:[%s2443_s10 + $0x18] sm:$0xff] }
 0x22c   : > { %1793 = vmatprep.subr.bf16.mxu0 %v1001_v61  ;;  %v1688_v62 = vpack.c.bf16 %v1891_v59, %v1890_v60  ;;  %v1108_v59 = vpack.c.bf16 %v1106_v57, %v1105_v56 }
 0x22f   : > { %1794 = vmatpush3.bf16.msra.mxu0 %v1001_v61 }
 0x230   : > { %1795 = vmatprep.subr.msk.bf16.mxu0 %vm1687_vm9, %v1688_v62 }
 0x233   : > { %1796 = vmatpush3.bf16.msk.msra.mxu0 %vm1687_vm9, %v1688_v62  ;;  %v1117_v62 = vpop.permute.xlu0 %1116 }
 0x236   : > { %1798 = vmatmul.mubr.msk.bf16.vlgmr.msra.gmra.mxu0 %vm1027_vm5, %v999_v2  ;;  %v872_v14 = vpop.permute.xlu1 %871 }
 0x237   : > { %1803 = vmatprep.mubr.msk.bf16.mxu0 %vm1134_vm10, %v1107_v5  ;;  %v953_v25 = vadd.f32 %v1786_v21, %v872_v14  ;;  %v851_v14 = vld [vmem:[%s2440_s7 + $0x28] sm:$0xff]  ;;  %v1720_v21 = vld [vmem:[%s2444_s11 + $0x30] sm:$0xff] }
 0x23a   : > { %v1025_v23 = vpop.permute.xlu1 %1024 }
 0x23e   : > { %v862_v32 = vpop.permute.xlu1 %861 }
 0x23f   : > { %v945_v43 = vadd.f32 %v944_v37, %v862_v32  ;;  %v1714_v37 = vld [vmem:[%s2443_s10 + $0x20] sm:$0xff] }
 0x242   : > { %v1015_v36 = vpop.permute.xlu1 %1014 }
 0x246   : > { %v1122_v2 = vpop.permute.xlu1 %1121 }
 0x2f6   : > { %v1799_v16 = vpop.f32.mrf.mxu0 }
 0x2f7   : > { %v1077_v19 = vadd.f32 %v1799_v16, %v1020_v15  ;;  %v850_v15 = vld [vmem:[%s2440_s7 + $0x20] sm:$0xff]  ;;  %v1701_v16 = vld [vmem:[%s2442_s9 + $0x28] sm:$0xff] }
 0x2f8   : > { %v1068_v20 = vpop.f32.mrf.mxu0 }
 0x2f9   : > { %v1085_v22 = vadd.f32 %v1077_v19, %v950_v17  ;;  %v1069_v35 = vadd.f32 %v1068_v20, %v1010_v33  ;;  %v1700_v17 = vld [vmem:[%s2442_s9 + $0x20] sm:$0xff]  ;;  %v1112_v19 = vld [vmem:[%s2444_s11 + $0x10] sm:$0xff]  ;;  %v1721_v20 = vld [vmem:[%s2444_s11 + $0x38] sm:$0xff] }
 0x2fa   : > { %v1800_v24 = vpop.f32.mrf.mxu0 }
 0x2fb   : > { %v1692_v26 = vmul.f32 -1.442695, %v1085_v22  ;;  %v1080_v27 = vadd.f32 %v1800_v24, %v1025_v23  ;;  %v1083_v44 = vadd.f32 %v1069_v35, %v942_v40  ;;  %v1413_v22 = vld [vmem:[%s2446_s13] sm:$0xf]  ;;  %v1208_v24 = vadd.s32 2, %v2246_v51  ;;  %v1698_v35 = vld [vmem:[%s2441_s8 + $0x30] sm:$0xff] }
 0x2fc   : > { %v1071_v34 = vpop.f32.mrf.mxu0  ;;  %v1464_v23 = vld [vmem:[%s2448_s15] sm:$0xf]  ;;  %v1715_v40 = vld [vmem:[%s2443_s10 + $0x28] sm:$0xff] }
 0x2fd   : > { %1903 = vpow2.f32 %v1692_v26  ;;  %v1086_v28 = vadd.f32 %v1080_v27, %v953_v25  ;;  %v1072_v41 = vadd.f32 %v1071_v34, %v1015_v36  ;;  %vm1210_vm11 = vcmp.lt.s32.totalorder %v1208_v24, 128 }
 0x2fe   : > { %vm1704_vm12 = vmpackc.low %vm1210_vm11, %vm1210_vm11 }
 0x2ff   : > { %v1693_v30 = vmul.f32 -1.442695, %v1086_v28  ;;  %v1084_v46 = vadd.f32 %v1072_v41, %v945_v43  ;;  %v1198_v28 = vadd.s32 4294967294, %v2246_v51  ;;  %v1699_v51 = vld [vmem:[%s2441_s8 + $0x38] sm:$0xff]  ;;  %v1329_v41 = vpack.c.bf16 %v1715_v40, %v1714_v37  ;;  %v1462_v40 = vld [vmem:[%s2447_s14] sm:$0xf] }
 0x300   : > { %v1220_v36 = vpack.c.bf16 %v1699_v51, %v1698_v35 }
 0x301   : > { %1905 = vpow2.f32 %v1693_v30  ;;  %vm1199_vm13 = vcmp.ge.s32.totalorder %v1198_v28, 0 }
 0x302   : > { %1907 = vtanh.f32 %v1083_v44  ;;  %vm1707_vm14 = vmpackc.low %vm1199_vm13, %vm1199_vm13 }
 0x30a   : > { %v1904_v42 = vpop.eup %1903 }
 0x30b   : > { %v1095_v45 = vadd.f32 1.0, %v1904_v42  ;;  %v1789_v42 = vpop.f32.mrf.mxu1 }
 0x30d   : > { %1909 = vrcp.f32 %v1095_v45  ;;  %v957_v43 = vpop.f32.mrf.mxu1 }
 0x30e   : > { %v1906_v47 = vpop.eup %1905  ;;  %1911 = vtanh.f32 %v1084_v46 }
 0x30f   : > { %v1096_v48 = vadd.f32 1.0, %v1906_v47  ;;  %v1908_v49 = vpop.eup %1907  ;;  %v1790_v45 = vpop.f32.mrf.mxu1 }
 0x311   : > { %1913 = vrcp.f32 %v1096_v48  ;;  %v960_v47 = vpop.f32.mrf.mxu1 }
 0x31a   : > { %v1910_v50 = vpop.eup %1909 }
 0x31b   : > { %v1912_v52 = vpop.eup %1911  ;;  %v1101_v54 = vmul.f32 %v1910_v50, %v1908_v49 }
 0x31e   : > { %v1914_v53 = vpop.eup %1913 }
 0x31f   : > { %v1102_v55 = vmul.f32 %v1914_v53, %v1912_v52 }
 0x321   : > { %v1109_v58 = vpack.c.bf16 %v1102_v55, %v1101_v54 }
 0x323   : > { %1801 = vmatprep.subr.bf16.mxu0 %v1109_v58 }
 0x324   : > { %1802 = vmatpush3.bf16.msra.mxu0 %v1109_v58 }
 0x327   : > { %1804 = vmatmul.mubr.msk.bf16.vlgmr.msra.gmra.mxu0 %vm1134_vm10, %v1108_v59 }
 0x328   : > { %1819 = vmatprep.mubr.msk.bf16.mxu0 %vm1134_vm10, %v1329_v41 }
 0x3e7   : > { %v2287_v60 = vpop.f32.mrf.mxu0 }
 0x3e9   : > { %v1175_v61 = vpop.f32.mrf.mxu0 }
 0x3ea   : > { %v1176_v1 = vadd.f32 %v1175_v61, %v1117_v62 }
 0x3eb   : > { %v2289_v63 = vpop.f32.mrf.mxu0 }
 0x3ec   : > { %v1190_v5 = vadd.f32 %v1176_v1, %v2218_v38  ;;  %v853_v38 = vld [vmem:[%s2440_s7 + $0x38] sm:$0xff] }
 0x3ed   : > { %v1178_v3 = vpop.f32.mrf.mxu0 }
 0x3ee   : > { %v1179_v4 = vadd.f32 %v1178_v3, %v1122_v2 }
 0x3f0   : > { %v1191_v6 = vadd.f32 %v1179_v4, %v2220_v39  ;;  %v852_v39 = vld [vmem:[%s2440_s7 + $0x30] sm:$0xff] }
 0x3f2   : > { %v1898_v7 = vpack.i.bf16 %v1191_v6, %v1190_v5  ;;  %v1222_v8 = vpack.c.bf16 %v1191_v6, %v1190_v5 }
 0x3f4   : > { %1899 = vrot.lane.b32.xlu1 %v1898_v7, %s1996_s5  ;;  %1894 = vrot.lane.b32.xlu0 %v1898_v7, %s1997_s26  ;;  %s1933_s5 = sshll.u32 %s1998_s25, 4  ;;  %s1934_s5 = int_to_ptr.vmem [resolvable:$false] %s1933_s5 }
 0x3f5   : > { %s1935_s26 = scalar_lea.vmem %s1934_s5, 128  ;;  %p1936_p0 = scmp.lt.s32.totalorder %s2388_s23, %s1934_s5 }
 0x3f6   : > { %p1937_p1 = scmp.lt.s32.totalorder %s1935_s26, %s1929_s21 }
 0x3f8   : > { %891 = vperm.xlu1 %1892, %v853_v38   ;;  %886 = vperm.xlu0 %1881, %v852_v39   ;;  %p1938_p2 = por %p1937_p1, %p1936_p0 }
 0x3fa   : > { %p1939_p3 = pnand %p1938_p2, %p1932_p13 }
 0x3fc   : > { %1246 = vperm.xlu1 %1892, %v1703_v12   ;;  %1241 = vperm.xlu0 %1881, %v1702_v13  }
 0x400   : > { %881 = vperm.xlu1 %1892, %v851_v14   ;;  %876 = vperm.xlu0 %1881, %v850_v15  }
 0x404   : > { %1236 = vperm.xlu1 %1892, %v1701_v16   ;;  %1231 = vperm.xlu0 %1881, %v1700_v17  }
 0x408   : > { %1131 = vperm.xlu1 %1892, %v1113_v18   ;;  %1126 = vperm.xlu0 %1881, %v1112_v19  }
 0x40c   : > { %1352 = vperm.xlu1 %1892, %v1721_v20   ;;  %1347 = vperm.xlu0 %1881, %v1720_v21   ;;  %v1716_v20 = vld [vmem:[%s2443_s10 + $0x30] sm:$0xff]  ;;  %v1717_v21 = vld [vmem:[%s2443_s10 + $0x38] sm:$0xff] }
 0x410   : > { %1416 = vperm.xlu1 %1892, %v1413_v22   ;;  %1467 = vperm.xlu0 %1881, %v1464_v23   ;;  %v1330_v23 = vpack.c.bf16 %v1717_v21, %v1716_v20 }
 0x466   : > { %v1895_v25 = vpop.permute.xlu0 %1894  ;;  %v1900_v29 = vpop.permute.xlu1 %1899 }
 0x467   : > { %v1897_v26 = vunpack.i.h.bf16 %v1895_v25  ;;  %v1896_v27 = vunpack.i.l.bf16 %v1895_v25  ;;  %v1902_v32 = vunpack.i.h.bf16 %v1900_v29  ;;  %v1901_v33 = vunpack.i.l.bf16 %v1900_v29 }
 0x469   : > { %v1705_v30 = vpack.c.bf16 %v1897_v26, %v1896_v27  ;;  %v1708_v34 = vpack.c.bf16 %v1902_v32, %v1901_v33 }
 0x46b   : > { %1807 = vmatprep.subr.msk.bf16.mxu1 %vm1704_vm12, %v1705_v30 }
 0x46c   : > { %1808 = vmatpush3.bf16.msk.msra.mxu1 %vm1704_vm12, %v1705_v30 }
 0x46d   : > { %1809 = vmatprep.subr.bf16.mxu1 %v1222_v8 }
 0x470   : > { %1810 = vmatpush3.bf16.msra.mxu1 %v1222_v8 }
 0x471   : > { %1811 = vmatprep.subr.msk.bf16.mxu1 %vm1707_vm14, %v1708_v34 }
 0x473   : > { %v887_v44 = vpop.permute.xlu0 %886  ;;  %v892_v46 = vpop.permute.xlu1 %891 }
 0x474   : > { %1812 = vmatpush3.bf16.msk.msra.mxu1 %vm1707_vm14, %v1708_v34  ;;  %v966_v50 = vadd.f32 %v1789_v42, %v887_v44  ;;  %v969_v57 = vadd.f32 %v1790_v45, %v892_v46 }
 0x475   : > { %1823 = vmatprep.subr.bf16.mxu1 %v1991_v0 }
 0x477   : > { %1814 = vmatmul.mubr.msk.bf16.vlgmr.msra.gmra.mxu1 %vm1027_vm5, %v1220_v36  ;;  %v1242_v48 = vpop.permute.xlu0 %1241  ;;  %v1247_v55 = vpop.permute.xlu1 %1246 }
 0x478   : > { %1825 = vmatprep.mubr.msk.bf16.mxu1 %vm1992_vm0, %v1991_v0 }
 0x47b   : > { %v877_v62 = vpop.permute.xlu0 %876  ;;  %v882_v2 = vpop.permute.xlu1 %881 }
 0x47c   : > { %v958_v7 = vadd.f32 %v957_v43, %v877_v62  ;;  %v961_v10 = vadd.f32 %v960_v47, %v882_v2  ;;  %v1463_v43 = vpack.c.bf16 %v1462_v40, %v1462_v40 }
 0x47f   : > { %v1232_v3 = vpop.permute.xlu0 %1231  ;;  %v1237_v6 = vpop.permute.xlu1 %1236 }
 0x483   : > { %v1127_v24 = vpop.permute.xlu0 %1126  ;;  %v1132_v25 = vpop.permute.xlu1 %1131 }
 0x484   : > { %v1187_v33 = vadd.f32 %v2289_v63, %v1132_v25  ;;  %v1184_v34 = vadd.f32 %v2287_v60, %v1127_v24 }
 0x487   : > { %v1348_v27 = vpop.permute.xlu0 %1347  ;;  %v1353_v30 = vpop.permute.xlu1 %1352 }
 0x48b   : > { %v1468_v60 = vpop.permute.xlu0 %1467 }
 0x537   : > { %v1815_v49 = vpop.f32.mrf.mxu1 }
 0x538   : > { %v1298_v52 = vadd.f32 %v1815_v49, %v1242_v48 }
 0x539   : > { %v1289_v53 = vpop.f32.mrf.mxu1 }
 0x53a   : > { %v1306_v54 = vadd.f32 %v1298_v52, %v966_v50  ;;  %v1290_v5 = vadd.f32 %v1289_v53, %v1232_v3 }
 0x53b   : > { %v1816_v56 = vpop.f32.mrf.mxu1 }
 0x53c   : > { %v1712_v58 = vmul.f32 -1.442695, %v1306_v54  ;;  %v1301_v59 = vadd.f32 %v1816_v56, %v1247_v55  ;;  %v1304_v38 = vadd.f32 %v1290_v5, %v958_v7 }
 0x53d   : > { %v1292_v4 = vpop.f32.mrf.mxu1 }
 0x53e   : > { %1915 = vpow2.f32 %v1712_v58  ;;  %v1307_v61 = vadd.f32 %v1301_v59, %v969_v57  ;;  %v1293_v8 = vadd.f32 %v1292_v4, %v1237_v6 }
 0x540   : > { %v1713_v1 = vmul.f32 -1.442695, %v1307_v61  ;;  %v1305_v11 = vadd.f32 %v1293_v8, %v961_v10 }
 0x542   : > { %1917 = vpow2.f32 %v1713_v1 }
 0x543   : > { %1919 = vtanh.f32 %v1304_v38 }
 0x54b   : > { %v1916_v9 = vpop.eup %1915 }
 0x54c   : > { %v1316_v39 = vadd.f32 1.0, %v1916_v9 }
 0x54e   : > { %1921 = vrcp.f32 %v1316_v39 }
 0x54f   : > { %v1918_v12 = vpop.eup %1917  ;;  %1923 = vtanh.f32 %v1305_v11 }
 0x550   : > { %v1317_v13 = vadd.f32 1.0, %v1918_v12  ;;  %v1920_v14 = vpop.eup %1919 }
 0x552   : > { %1925 = vrcp.f32 %v1317_v13 }
 0x55b   : > { %v1922_v15 = vpop.eup %1921 }
 0x55c   : > { %v1924_v16 = vpop.eup %1923  ;;  %v1322_v18 = vmul.f32 %v1922_v15, %v1920_v14 }
 0x55f   : > { %v1926_v17 = vpop.eup %1925 }
 0x560   : > { %v1323_v19 = vmul.f32 %v1926_v17, %v1924_v16 }
 0x562   : > { %v1331_v22 = vpack.c.bf16 %v1323_v19, %v1322_v18 }
 0x564   : > { %1817 = vmatprep.subr.bf16.mxu0 %v1331_v22 }
 0x565   : > { %1818 = vmatpush3.bf16.msra.mxu0 %v1331_v22 }
 0x566   : > { %1829 = vmatprep.subr.bf16.mxu0 %v1991_v0 }
 0x568   : > { %1820 = vmatmul.mubr.msk.bf16.vlgmr.msra.gmra.mxu0 %vm1134_vm10, %v1330_v23 }
 0x569   : > { %1831 = vmatprep.mubr.msk.bf16.mxu0 %vm1992_vm0, %v1991_v0  ;;  %v1410_v0 = vld [vmem:[%s2445_s12] sm:$0xf] }
 0x56a   : > { %v1411_v42 = vpack.c.bf16 %v1410_v0, %v1410_v0 }
 0x628   : > { %v1821_v26 = vpop.f32.mrf.mxu0 }
 0x629   : > { %v1402_v29 = vadd.f32 %v1821_v26, %v1348_v27 }
 0x62a   : > { %v1395_v28 = vpop.f32.mrf.mxu0 }
 0x62b   : > { %v1408_v36 = vadd.f32 %v1402_v29, %v1184_v34 }
 0x62c   : > { %v1822_v32 = vpop.f32.mrf.mxu0 }
 0x62d   : > { %v1405_v35 = vadd.f32 %v1822_v32, %v1353_v30 }
 0x62e   : > { %v1397_v51 = vpop.f32.mrf.mxu0 }
 0x62f   : > { %v1409_v37 = vadd.f32 %v1405_v35, %v1187_v33 }
 0x631   : > { %v1412_v41 = vpack.c.bf16 %v1409_v37, %v1408_v36 }
 0x633   : > { %1824 = vmatpush3.bf16.msra.mxu1 %v1412_v41  ;;  %1830 = vmatpush3.bf16.msra.mxu0 %v1412_v41 }
 0x636   : > { %1826 = vmatmul.mubr.msk.bf16.vlgmr.msra.gmra.mxu1 %vm1134_vm10, %v1411_v42  ;;  %1832 = vmatmul.mubr.msk.bf16.vlgmr.msra.gmra.mxu0 %vm1134_vm10, %v1463_v43 }
 0x6f6   : > { %v1456_v63 = vpop.f32.mrf.mxu1  ;;  %v1507_v44 = vpop.f32.mrf.mxu0 }
 0x6f7   : > { %v1508_v45 = vadd.f32 %v1507_v44, %v1468_v60 }
 0x6f8   : > { %v1833_v46 = vpop.f32.mrf.mxu0  ;;  %v1827_v47 = vpop.f32.mrf.mxu1 }
 0x6f9   : > { %v1514_v48 = vmul.f32 1.442695, %v1508_v45  ;;  %1519 = vst [vmem:[%s594_s27] sm:$0xf] %v1508_v45 }
 0x6fa   : > { %v1510_v49 = vpop.f32.mrf.mxu0  ;;  %v1459_v50 = vpop.f32.mrf.mxu1 }
 0x6fb   : > { %1942 = shalt.err (!%p1939_p3)
}
 0x6fc   : > { %s1943_s1 = scalar_lea.hbm %s2386_s20, 64  ;;  %s1947_s27 = scalar_lea.hbm %s2451_s18, 128 }
 0x6fd   : > { %p1944_p4 = scmp.ne.s32.totalorder %s2386_s20, %s1943_s1  ;;  %p1948_p9 = scmp.lt.s32.totalorder %s2386_s20, %s2451_s18 }
 0x6fe   : > { %p1949_p10 = scmp.lt.s32.totalorder %s1947_s27, %s1943_s1 }
 0x6ff   : > { %p1945_p7 = pnand %p1944_p4, %p2132_p5 }
 0x700   : > { %p1950_p11 = por %p1949_p10, %p1948_p9 }
 0x701   : > { %p1946_p8 = pneg %p1945_p7 }
 0x703   : > { %p1951_p12 = pnand %p1950_p11, %p1946_p8 }
 0x705   : > { %1954 = shalt.err (!%p1951_p12)
}
 0x706   : > { %1835 = dma.vmem_to_hbm [thread:$0]  (%p2132_p5), %s2388_s23, 64, %s2386_s20, %s1529_s0   ;;  %1927 = vpow2.f32 %v1514_v48  ;;  %v1834_v52 = vpop.f32.mrf.mxu0  ;;  %v1828_v53 = vpop.f32.mrf.mxu1 }
 0x707   : > { %v1417_v55 = vpop.permute.xlu1 %1416  ;;  %s611_s5 = scalar_lea.vmem %s2450_s17, %s1675_s22 }
 0x708   : > { %v1457_v56 = vadd.f32 %v1456_v63, %v1417_v55 }
 0x713   : > { %v1928_v54 = vpop.eup %1927 }
 0x714   : > { %v1516_v57 = vmul.f32 %v1928_v54, %v2216_v31 }
 0x716   : > { %v1517_v58 = vadd.f32 %v1516_v57, %v1457_v56 }
 0x718   : > { %1518 = vst [vmem:[%s611_s5] sm:$0xf] %v1517_v58 }
 0x719 PF: > { %s2476_s2 = sld [smem:[#allocation7_spill]] }
 0x71a   : > { %s2477_s26 = sld [smem:[#allocation5_spill]] }
 0x71f   : > { %p1841_p5 = scmp.ge.s32.totalorder %s2476_s2, 2 }
 0x720   : > { %s1574_s23 = sand.u32 1, %s2477_s26  }
 0x721   : > { %p1838_p13 = pnand %p1841_p5, %p2136_p6  ;;  %s1575_s20 = scalar_lea.sflag [#allocation3], %s1574_s23 }
 0x723   : > { %p1839_p0 = pneg %p1838_p13 }
 0x725   : > { %1972 = dma.done.wait (%p1839_p0), %s1575_s20, 64  }
 0x726   : > { %1974 = vsyncadd (%p1839_p0), %s1575_s20, 4294967232  ;;  %s2479_s30 = sld [smem:[#allocation8_spill]]  ;;  %s2482_s27 = smov %s1981_s28 }
 0x727   : > { %s2480_s24 = sld [smem:[#allocation6_spill]] }
 0x728   : > { %s2481_s29 = sld [smem:[#allocation9_spill]] }
 0x72c   : > { %p29_p1 = scmp.ge.s32.totalorder %s2479_s30, 4  }
 0x72d   : > { %s2483_s28 = smov %s2480_s24 }
 0x72e   :  { %31 = sbr.rel (!%p29_p1) target bundleno = 9 (0x9), region = 150 }
 0x733   :  { %1580 = vsyncpa [#allocation3], 1 }
 0x734   :  { %1582 = vsyncpa [#allocation3 + $0x1], 1 }

// kernel: _lambda_.8
= control target key start
LH: loop header
LB: loop body
LE: loop exit
PB: predicated region body
PF: predicated region fallthrough
CT: control target
= control target key end

     0   :  { %s1998_s27 = smov 0   ;;  %s2256_s0 = inlined_call_operand.vmem [shape: f32[2,6,128], index: 0, kind: input, shape index: {}]   ;;  %s2257_s1 = inlined_call_operand.vmem [shape: f32[2,32,128], index: 1, kind: input, shape index: {}]   ;;  %s2258_s2 = inlined_call_operand.vmem [shape: f32[3,6], index: 2, kind: input, shape index: {}]   ;;  %s2259_s3 = inlined_call_operand.vmem [shape: f32[3,6], index: 3, kind: input, shape index: {}]   ;;  %s2260_s4 = inlined_call_operand.vmem [shape: f32[16,3], index: 4, kind: input, shape index: {}]   ;;  %s2261_s5 = inlined_call_operand.vmem [shape: f32[16,1], index: 5, kind: input, shape index: {}]   ;;  %s2262_s6 = inlined_call_operand.vmem [shape: f32[64,32], index: 6, kind: input, shape index: {}]   ;;  %s2263_s7 = inlined_call_operand.vmem [shape: f32[64,1], index: 7, kind: input, shape index: {}]   ;;  %s2264_s8 = inlined_call_operand.vmem [shape: f32[2,32,48], index: 8, kind: input, shape index: {}]   ;;  %s2265_s9 = inlined_call_operand.vmem [shape: f32[2,32,1], index: 9, kind: input, shape index: {}]   ;;  %s2266_s10 = inlined_call_operand.vmem [shape: f32[2,32,16], index: 10, kind: input, shape index: {}]   ;;  %s2267_s11 = inlined_call_operand.vmem [shape: f32[2,32,1], index: 11, kind: input, shape index: {}]   ;;  %s2268_s12 = inlined_call_operand.vmem [shape: f32[3,16], index: 12, kind: input, shape index: {}]   ;;  %s2269_s13 = inlined_call_operand.vmem [shape: f32[3,1], index: 13, kind: input, shape index: {}]   ;;  %s2270_s14 = inlined_call_operand.vmem [shape: f32[3,16], index: 14, kind: input, shape index: {}]   ;;  %s2271_s15 = inlined_call_operand.vmem [shape: f32[3,1], index: 15, kind: input, shape index: {}]   ;;  %s2272_s16 = inlined_call_operand.vmem [shape: f32[2,3,128], index: 16, kind: output, shape index: {0}]   ;;  %s2273_s17 = inlined_call_operand.vmem [shape: f32[2,3,128], index: 17, kind: output, shape index: {1}]   ;;  %s2274_s18 = inlined_call_operand.vmem [shape: f32[2,3,128], index: 18, kind: output, shape index: {2}]  }
   0x1   :  { %2275 = sst [smem:[#allocation2_spill]] %s2256_s0 }
   0x2   :  { %2276 = sst [smem:[#allocation3_spill]] %s2257_s1 }
   0x3   :  { %2277 = sst [smem:[#allocation4_spill]] %s2258_s2 }
   0x4 LB: > { %s1654_s28 = sadd.s32 4294967295, %s1893_s27   ;;  %p1658_p0 = scmp.ge.s32.totalorder %s1893_s27, 1  ;;  %s1893_s27 = sphi %s1998_s27, %s29_s27  }
   0x5   : > { %p526_p1 = scmp.lt.s32.totalorder %s1893_s27, 3 }
   0x7   : > { %p527_p2 = pnand %p1658_p0, %p526_p1 }
   0x8   : > { %p591_p3 = scmp.lt.s32.totalorder (!%p527_p2), %s1654_s28, 1  ;;  %s2278_s19 = sld [smem:[#allocation2_spill]] (!%p527_p2) }
   0x9   : > { %530 = sbr.rel (%p527_p2) target bundleno = 1791 (0x6ff), region = 84  ;;  %s2279_s22 = sld [smem:[#allocation4_spill]] (!%p527_p2) }
   0xa   : > { %s2280_s0 = sld [smem:[#allocation3_spill]] (!%p527_p2)  ;;  %s1899_s23 = smov (!%p527_p2), 127  }
   0xb   : > { %s1900_s24 = smov (!%p527_p2), 1   ;;  %s1902_s20 = smov (!%p527_p2), 126  }
   0xe   : > { %v1895_v0 = vmov 0.0   ;;  %vm1896_vm0 = vmmov 0   ;;  %s2282_s28 = smov (!%p591_p3, %s1654_s28), 1  ;;  %vm619_vm1 = vcmask 1045504   ;;  %vm615_vm2 = vcmask 48128   ;;  %v771_v4 = vld [vmem:[%s2261_s5] sm:$0xff] }
   0xf   : > { %1751 = vmatprep.subr.mxu0 %v1895_v0  ;;  %1753 = vmatprep.mubr.msk.f32.mxu0 %vm1896_vm0, %v1895_v0  ;;  %s1659_s29 = sshll.u32 %s2282_s28, 3  ;;  %v614_v1 = vld [vmem:[%s2279_s22] sm:$0x7]  ;;  %v1897_v5 = vmov 0   ;;  %v772_v6 = vld [vmem:[%s2261_s5 + $0x8] sm:$0xff]  ;;  %v855_v7 = vld [vmem:[%s2263_s7 + $0x10] sm:$0xff]  ;;  %v979_v53 = vlaneseq }
  0x10   : > { %1756 = vmatprep.subr.mxu1 %v1895_v0  ;;  %1758 = vmatprep.mubr.msk.f32.mxu1 %vm1896_vm0, %v1895_v0  ;;  %s594_s1 = scalar_lea.vmem %s2278_s19, %s1659_s29  ;;  %v693_v3 = vld [vmem:[%s2259_s3] sm:$0x7]  ;;  %v1012_v8 = vld [vmem:[%s2265_s9 + $0x10] sm:$0xff]  ;;  %s1718_s25 = sshll.u32 %s2282_s28, 5  ;;  %vm787_vm3 = vcmask 1040384   ;;  %vm788_vm4 = vcmask 1041408  }
  0x11   : > { %v613_v2 = vld [vmem:[%s594_s1] sm:$0x3f]  ;;  %1839 = vset.pattern.permute.xlu0 %v1897_v5  ;;  %1850 = vset.pattern.permute.xlu1 %v1897_v5  ;;  %s2050_s26 = sshll.u32 %s2282_s28, 2  ;;  %s599_s19 = scalar_lea.vmem %s2280_s0, %s1718_s25  ;;  %v1898_v12 = vmov 65535   ;;  %v768_v20 = vld [vmem:[%s2260_s4 + $0x8] sm:$0xff]  ;;  %vm783_vm5 = vcmask 23552  }
  0x12   : > { %1752 = vmatpush3.msk.msra.mxu0 %vm619_vm1, %v613_v2  ;;  %1757 = vmatpush3.msk.msra.mxu1 %vm619_vm1, %v613_v2  ;;  %v853_v9 = vld [vmem:[%s2263_s7] sm:$0xff]  ;;  %v789_v13 = vsel %vm787_vm3, 4294967295, %v1898_v12  ;;  %s603_s21 = scalar_lea.vmem %s2272_s16, %s2050_s26  ;;  %v845_v14 = vld [vmem:[%s599_s19 + $0x10] sm:$0xff]  ;;  %v846_v15 = vld [vmem:[%s599_s19 + $0x18] sm:$0xff]  ;;  %vm901_vm6 = vcmask 261120   ;;  %vm1034_vm7 = vcmask 392192  }
  0x13   : > { %1754 = vmatmul.mubr.msk.f32.vlgmr.msra.gmra.mxu0 %vm615_vm2, %v614_v1  ;;  %1761 = vmatprep.subr.bf16.mxu1 %v1895_v0  ;;  %v1010_v10 = vld [vmem:[%s2265_s9] sm:$0xff]  ;;  %v790_v17 = vsel %vm788_vm4, %v789_v13, 0  ;;  %v852_v22 = vpack.c.bf16 %v846_v15, %v845_v14  ;;  %v836_v24 = vld [vmem:[%s2262_s6 + $0x8] sm:$0xff]  ;;  %v837_v31 = vld [vmem:[%s2262_s6 + $0x10] sm:$0xff]  ;;  %v2109_v54 = vand.u32 127, %v979_v53  ;;  %vm1141_vm12 = vcmask 130048  }
  0x14   : > { %1759 = vmatmul.mubr.msk.f32.vlgmr.msra.gmra.mxu1 %vm615_vm2, %v693_v3  ;;  %775 = vperm.xlu0 %1839, %v771_v4   ;;  %v1117_v11 = vld [vmem:[%s2267_s11] sm:$0xff]  ;;  %v844_v27 = vld [vmem:[%s599_s19 + $0x8] sm:$0xff]  ;;  %v838_v32 = vld [vmem:[%s2262_s6 + $0x18] sm:$0xff]  ;;  %s1901_s1 = smov 2  }
  0x15   : > { %1763 = vmatprep.mubr.msk.bf16.mxu1 %vm1896_vm0, %v1895_v0  ;;  %v767_v19 = vld [vmem:[%s2260_s4] sm:$0xff]  ;;  %v848_v33 = vpack.c.bf16 %v838_v32, %v837_v31  ;;  %v1002_v46 = vld [vmem:[%s2264_s8 + $0x8] sm:$0xff]  ;;  %v856_v48 = vld [vmem:[%s2263_s7 + $0x18] sm:$0xff]  ;;  %v995_v55 = vadd.s32 1, %v2109_v54  ;;  %v985_v59 = vadd.s32 4294967295, %v2109_v54 }
  0x16   : > { %v835_v23 = vld [vmem:[%s2262_s6] sm:$0xff]  ;;  %v769_v28 = vpack.c.bf16 %v768_v20, %v767_v19  ;;  %v1013_v49 = vld [vmem:[%s2265_s9 + $0x18] sm:$0xff]  ;;  %v854_v50 = vld [vmem:[%s2263_s7 + $0x8] sm:$0xff] }
  0x17   : > { %v843_v26 = vld [vmem:[%s599_s19] sm:$0xff]  ;;  %v847_v29 = vpack.c.bf16 %v836_v24, %v835_v23  ;;  %v1011_v51 = vld [vmem:[%s2265_s9 + $0x8] sm:$0xff]  ;;  %vm997_vm8 = vcmp.lt.s32.totalorder %v995_v55, 128  ;;  %vm986_vm10 = vcmp.ge.s32.totalorder %v985_v59, 0  ;;  %v1003_v3 = vld [vmem:[%s2264_s8 + $0x10] sm:$0xff]  ;;  %s607_s19 = scalar_lea.vmem %s2273_s17, %s2050_s26 }
  0x18   : > { %780 = vperm.xlu0 %1839, %v772_v6   ;;  %v851_v30 = vpack.c.bf16 %v844_v27, %v843_v26  ;;  %v1001_v45 = vld [vmem:[%s2264_s8] sm:$0xff]  ;;  %v1118_v52 = vld [vmem:[%s2267_s11 + $0x8] sm:$0xff]  ;;  %vm1674_vm9 = vmpackc.low %vm997_vm8, %vm997_vm8 }
  0x19   : > { %v1005_v47 = vpack.c.bf16 %v1002_v46, %v1001_v45  ;;  %vm1677_vm11 = vmpackc.low %vm986_vm10, %vm986_vm10  ;;  %v1004_v4 = vld [vmem:[%s2264_s8 + $0x18] sm:$0xff]  ;;  %v1110_v6 = vld [vmem:[%s2266_s10] sm:$0xff] }
  0x1a   : > { %v1006_v5 = vpack.c.bf16 %v1004_v4, %v1003_v3  ;;  %v842_v13 = vld [vmem:[%s2262_s6 + $0x38] sm:$0xff]  ;;  %v1112_v59 = vld [vmem:[%s2266_s10 + $0x10] sm:$0xff] }
  0x1b   : > { %1785 = vmatprep.mubr.msk.bf16.mxu0 %vm1034_vm7, %v1005_v47 }
  0x1c   : > { %873 = vperm.xlu0 %1839, %v855_v7   ;;  %v1111_v7 = vld [vmem:[%s2266_s10 + $0x8] sm:$0xff] }
  0x20   : > { %1026 = vperm.xlu0 %1839, %v1012_v8   ;;  %v1114_v8 = vpack.c.bf16 %v1111_v7, %v1110_v6 }
  0x24   : > { %863 = vperm.xlu0 %1839, %v853_v9   ;;  %v839_v9 = vld [vmem:[%s2262_s6 + $0x20] sm:$0xff] }
  0x28   : > { %1016 = vperm.xlu0 %1839, %v1010_v10   ;;  %v840_v10 = vld [vmem:[%s2262_s6 + $0x28] sm:$0xff] }
  0x29   : > { %v849_v12 = vpack.c.bf16 %v840_v10, %v839_v9 }
  0x2c   : > { %1123 = vperm.xlu0 %1839, %v1117_v11   ;;  %v841_v11 = vld [vmem:[%s2262_s6 + $0x30] sm:$0xff] }
  0x2d   : > { %v850_v14 = vpack.c.bf16 %v842_v13, %v841_v11  ;;  %v1687_v13 = vld [vmem:[%s2264_s8 + $0x28] sm:$0xff] }
  0x8f   : > { %v776_v36 = vpop.permute.xlu0 %775 }
  0x93   : > { %v781_v39 = vpop.permute.xlu0 %780 }
  0x97   : > { %v874_v15 = vpop.permute.xlu0 %873 }
  0xd3   : > { %v689_v16 = vpop.f32.mrf.mxu0 }
  0xd4   : > { %v770_v18 = vpack.c.bf16 %v689_v16, %v689_v16  ;;  %1520 = vst [vmem:[%s603_s21] sm:$0x7] %v689_v16  ;;  %v2079_v34 = vpop.f32.mrf.mxu1 }
  0xd5   : > { %v1755_v21 = vpop.f32.mrf.mxu0 }
  0xd6   : > { %v792_v25 = vand.u32 %v790_v17, %v770_v18  ;;  %v1760_v35 = vpop.f32.mrf.mxu1  ;;  %v1027_v18 = vpop.permute.xlu0 %1026 }
  0xd8   : > { %1762 = vmatpush3.bf16.msra.mxu1 %v792_v25 }
  0xd9   : > { %1767 = vmatprep.subr.bf16.mxu1 %v852_v22 }
  0xda   : > { %v864_v32 = vpop.permute.xlu0 %863 }
  0xdb   : > { %1764 = vmatmul.mubr.msk.bf16.vlgmr.msra.gmra.mxu1 %vm783_vm5, %v769_v28 }
  0xdc   : > { %1768 = vmatpush3.bf16.msra.mxu1 %v852_v22  ;;  %1771 = vmatprep.mubr.msk.bf16.mxu1 %vm901_vm6, %v847_v29 }
  0xdd   : > { %1769 = vmatprep.subr.bf16.mxu1 %v851_v30 }
  0xe0   : > { %1770 = vmatpush3.bf16.msra.mxu1 %v851_v30 }
  0xe3   : > { %1772 = vmatmul.mubr.msk.bf16.vlgmr.msra.gmra.mxu1 %vm901_vm6, %v848_v33 }
  0xe4   : > { %1775 = vmatprep.mubr.msk.bf16.mxu1 %vm901_vm6, %v849_v12  ;;  %v1686_v12 = vld [vmem:[%s2264_s8 + $0x20] sm:$0xff] }
  0xeb   : > { %1776 = vmatmul.mubr.msk.bf16.gmra.mxu1 %vm901_vm6, %v850_v14  ;;  %v1226_v14 = vpack.c.bf16 %v1687_v13, %v1686_v12 }
  0xed   : > { %1801 = vmatprep.mubr.msk.bf16.mxu1 %vm1034_vm7, %v1226_v14 }
 0x19b   : > { %v828_v37 = vpop.f32.mrf.mxu1 }
 0x19c   : > { %v2081_v41 = vadd.f32 %v828_v37, %v776_v36  ;;  %v1017_v36 = vpop.permute.xlu0 %1016 }
 0x19d   : > { %v1765_v38 = vpop.f32.mrf.mxu1 }
 0x19f   : > { %v831_v40 = vpop.f32.mrf.mxu1 }
 0x1a0   : > { %v2083_v42 = vadd.f32 %v831_v40, %v781_v39 }
 0x1a1   : > { %v1766_v43 = vpop.f32.mrf.mxu1 }
 0x1a2   : > { %v1840_v44 = vpack.i.bf16 %v2083_v42, %v2081_v41  ;;  %v1008_v1 = vpack.c.bf16 %v2083_v42, %v2081_v41 }
 0x1a3   : > { %v1773_v16 = vpop.f32.mrf.mxu1 }
 0x1a4   : > { %1841 = vrot.lane.b32.xlu1 %v1840_v44, %s1899_s23  ;;  %v957_v20 = vadd.f32 %v1773_v16, %v874_v15  ;;  %v1693_v15 = vld [vmem:[%s2265_s9 + $0x38] sm:$0xff]  ;;  %v1692_v16 = vld [vmem:[%s2265_s9 + $0x30] sm:$0xff] }
 0x1a5   : > { %v948_v21 = vpop.f32.mrf.mxu1 }
 0x1a6   : > { %v949_v43 = vadd.f32 %v948_v21, %v864_v32  ;;  %v1120_v21 = vld [vmem:[%s2267_s11 + $0x18] sm:$0xff] }
 0x1a7   : > { %v1774_v24 = vpop.f32.mrf.mxu1 }
 0x1a8   : > { %1846 = vrot.lane.b32.xlu1 %v1840_v44, %s1900_s24 }
 0x1a9   : > { %v951_v40 = vpop.f32.mrf.mxu1 }
 0x1ac   : > { %878 = vperm.xlu1 %1850, %v856_v48  }
 0x1b0   : > { %1031 = vperm.xlu1 %1850, %v1013_v49  }
 0x1b4   : > { %868 = vperm.xlu1 %1850, %v854_v50  }
 0x1b8   : > { %1021 = vperm.xlu1 %1850, %v1011_v51  }
 0x1bc   : > { %1128 = vperm.xlu1 %1850, %v1118_v52  }
 0x216   : > { %v1842_v56 = vpop.permute.xlu1 %1841 }
 0x217   : > { %v1844_v57 = vunpack.i.h.bf16 %v1842_v56  ;;  %v1843_v58 = vunpack.i.l.bf16 %v1842_v56 }
 0x219   : > { %v1675_v60 = vpack.c.bf16 %v1844_v57, %v1843_v58 }
 0x21a   : > { %v1847_v61 = vpop.permute.xlu1 %1846 }
 0x21b   : > { %v1849_v62 = vunpack.i.h.bf16 %v1847_v61  ;;  %v1848_v63 = vunpack.i.l.bf16 %v1847_v61  ;;  %1779 = vmatprep.subr.msk.bf16.mxu0 %vm1674_vm9, %v1675_v60 }
 0x21c   : > { %1780 = vmatpush3.bf16.msk.msra.mxu0 %vm1674_vm9, %v1675_v60  ;;  %v1113_v60 = vld [vmem:[%s2266_s10 + $0x18] sm:$0xff] }
 0x21d   : > { %1781 = vmatprep.subr.bf16.mxu0 %v1008_v1  ;;  %v1678_v2 = vpack.c.bf16 %v1849_v62, %v1848_v63  ;;  %v1115_v62 = vpack.c.bf16 %v1113_v60, %v1112_v59 }
 0x220   : > { %1782 = vmatpush3.bf16.msra.mxu0 %v1008_v1 }
 0x221   : > { %1783 = vmatprep.subr.msk.bf16.mxu0 %vm1677_vm11, %v1678_v2 }
 0x224   : > { %1784 = vmatpush3.bf16.msk.msra.mxu0 %vm1677_vm11, %v1678_v2  ;;  %v1124_v2 = vpop.permute.xlu0 %1123 }
 0x227   : > { %1786 = vmatmul.mubr.msk.bf16.vlgmr.msra.gmra.mxu0 %vm1034_vm7, %v1006_v5  ;;  %v879_v17 = vpop.permute.xlu1 %878 }
 0x228   : > { %1791 = vmatprep.mubr.msk.bf16.mxu0 %vm1141_vm12, %v1114_v8  ;;  %v960_v28 = vadd.f32 %v1774_v24, %v879_v17  ;;  %v858_v17 = vld [vmem:[%s2263_s7 + $0x28] sm:$0xff]  ;;  %v1710_v24 = vld [vmem:[%s2267_s11 + $0x30] sm:$0xff] }
 0x22b   : > { %v1032_v26 = vpop.permute.xlu1 %1031 }
 0x22f   : > { %v869_v35 = vpop.permute.xlu1 %868 }
 0x230   : > { %v952_v46 = vadd.f32 %v951_v40, %v869_v35  ;;  %v1704_v40 = vld [vmem:[%s2266_s10 + $0x20] sm:$0xff] }
 0x233   : > { %v1022_v39 = vpop.permute.xlu1 %1021 }
 0x237   : > { %v1129_v5 = vpop.permute.xlu1 %1128 }
 0x2e7   : > { %v1787_v19 = vpop.f32.mrf.mxu0 }
 0x2e8   : > { %v1084_v22 = vadd.f32 %v1787_v19, %v1027_v18  ;;  %v857_v18 = vld [vmem:[%s2263_s7 + $0x20] sm:$0xff]  ;;  %v1691_v19 = vld [vmem:[%s2265_s9 + $0x28] sm:$0xff] }
 0x2e9   : > { %v1075_v23 = vpop.f32.mrf.mxu0 }
 0x2ea   : > { %v1092_v25 = vadd.f32 %v1084_v22, %v957_v20  ;;  %v1076_v38 = vadd.f32 %v1075_v23, %v1017_v36  ;;  %v1690_v20 = vld [vmem:[%s2265_s9 + $0x20] sm:$0xff]  ;;  %v1119_v22 = vld [vmem:[%s2267_s11 + $0x10] sm:$0xff]  ;;  %v1711_v23 = vld [vmem:[%s2267_s11 + $0x38] sm:$0xff] }
 0x2eb   : > { %v1788_v27 = vpop.f32.mrf.mxu0 }
 0x2ec   : > { %v1682_v29 = vmul.f32 -1.442695, %v1092_v25  ;;  %v1087_v30 = vadd.f32 %v1788_v27, %v1032_v26  ;;  %v1090_v47 = vadd.f32 %v1076_v38, %v949_v43  ;;  %v1420_v25 = vld [vmem:[%s2269_s13] sm:$0x7]  ;;  %v1215_v27 = vadd.s32 2, %v2109_v54  ;;  %v1688_v38 = vld [vmem:[%s2264_s8 + $0x30] sm:$0xff] }
 0x2ed   : > { %v1078_v37 = vpop.f32.mrf.mxu0  ;;  %v1471_v26 = vld [vmem:[%s2271_s15] sm:$0x7]  ;;  %v1705_v43 = vld [vmem:[%s2266_s10 + $0x28] sm:$0xff] }
 0x2ee   : > { %1861 = vpow2.f32 %v1682_v29  ;;  %v1093_v31 = vadd.f32 %v1087_v30, %v960_v28  ;;  %v1079_v44 = vadd.f32 %v1078_v37, %v1022_v39  ;;  %vm1217_vm13 = vcmp.lt.s32.totalorder %v1215_v27, 128 }
 0x2ef   : > { %vm1694_vm14 = vmpackc.low %vm1217_vm13, %vm1217_vm13 }
 0x2f0   : > { %v1683_v33 = vmul.f32 -1.442695, %v1093_v31  ;;  %v1091_v49 = vadd.f32 %v1079_v44, %v952_v46  ;;  %v1205_v31 = vadd.s32 4294967294, %v2109_v54  ;;  %v1689_v54 = vld [vmem:[%s2264_s8 + $0x38] sm:$0xff]  ;;  %v1336_v44 = vpack.c.bf16 %v1705_v43, %v1704_v40  ;;  %v1469_v43 = vld [vmem:[%s2270_s14] sm:$0x7] }
 0x2f1   : > { %v1227_v39 = vpack.c.bf16 %v1689_v54, %v1688_v38 }
 0x2f2   : > { %1863 = vpow2.f32 %v1683_v33  ;;  %vm1206_vm15 = vcmp.ge.s32.totalorder %v1205_v31, 0 }
 0x2f3   : > { %1865 = vtanh.f32 %v1090_v47  ;;  %vm1697_vm1 = vmpackc.low %vm1206_vm15, %vm1206_vm15 }
 0x2fb   : > { %v1862_v45 = vpop.eup %1861 }
 0x2fc   : > { %v1102_v48 = vadd.f32 1.0, %v1862_v45  ;;  %v1777_v45 = vpop.f32.mrf.mxu1 }
 0x2fe   : > { %1867 = vrcp.f32 %v1102_v48  ;;  %v964_v46 = vpop.f32.mrf.mxu1 }
 0x2ff   : > { %v1864_v50 = vpop.eup %1863  ;;  %1869 = vtanh.f32 %v1091_v49 }
 0x300   : > { %v1103_v51 = vadd.f32 1.0, %v1864_v50  ;;  %v1866_v52 = vpop.eup %1865  ;;  %v1778_v48 = vpop.f32.mrf.mxu1 }
 0x302   : > { %1871 = vrcp.f32 %v1103_v51  ;;  %v967_v50 = vpop.f32.mrf.mxu1 }
 0x30b   : > { %v1868_v53 = vpop.eup %1867 }
 0x30c   : > { %v1870_v55 = vpop.eup %1869  ;;  %v1108_v57 = vmul.f32 %v1868_v53, %v1866_v52 }
 0x30f   : > { %v1872_v56 = vpop.eup %1871 }
 0x310   : > { %v1109_v58 = vmul.f32 %v1872_v56, %v1870_v55 }
 0x312   : > { %v1116_v61 = vpack.c.bf16 %v1109_v58, %v1108_v57 }
 0x314   : > { %1789 = vmatprep.subr.bf16.mxu0 %v1116_v61 }
 0x315   : > { %1790 = vmatpush3.bf16.msra.mxu0 %v1116_v61 }
 0x318   : > { %1792 = vmatmul.mubr.msk.bf16.vlgmr.msra.gmra.mxu0 %vm1141_vm12, %v1115_v62 }
 0x319   : > { %1807 = vmatprep.mubr.msk.bf16.mxu0 %vm1141_vm12, %v1336_v44 }
 0x3d8   : > { %v2150_v63 = vpop.f32.mrf.mxu0 }
 0x3da   : > { %v1182_v1 = vpop.f32.mrf.mxu0 }
 0x3db   : > { %v1183_v4 = vadd.f32 %v1182_v1, %v1124_v2 }
 0x3dc   : > { %v2152_v3 = vpop.f32.mrf.mxu0 }
 0x3dd   : > { %v1197_v8 = vadd.f32 %v1183_v4, %v2081_v41  ;;  %v860_v41 = vld [vmem:[%s2263_s7 + $0x38] sm:$0xff] }
 0x3de   : > { %v1185_v6 = vpop.f32.mrf.mxu0 }
 0x3df   : > { %v1186_v7 = vadd.f32 %v1185_v6, %v1129_v5 }
 0x3e1   : > { %v1198_v9 = vadd.f32 %v1186_v7, %v2083_v42  ;;  %v859_v42 = vld [vmem:[%s2263_s7 + $0x30] sm:$0xff] }
 0x3e3   : > { %v1856_v10 = vpack.i.bf16 %v1198_v9, %v1197_v8  ;;  %v1229_v11 = vpack.c.bf16 %v1198_v9, %v1197_v8 }
 0x3e5   : > { %1857 = vrot.lane.b32.xlu1 %v1856_v10, %s1901_s1  ;;  %1852 = vrot.lane.b32.xlu0 %v1856_v10, %s1902_s20  ;;  %s611_s1 = scalar_lea.vmem %s2274_s18, %s2050_s26 }
 0x3e9   : > { %898 = vperm.xlu1 %1850, %v860_v41   ;;  %893 = vperm.xlu0 %1839, %v859_v42  }
 0x3ed   : > { %1253 = vperm.xlu1 %1850, %v1693_v15   ;;  %1248 = vperm.xlu0 %1839, %v1692_v16  }
 0x3f1   : > { %888 = vperm.xlu1 %1850, %v858_v17   ;;  %883 = vperm.xlu0 %1839, %v857_v18  }
 0x3f5   : > { %1243 = vperm.xlu1 %1850, %v1691_v19   ;;  %1238 = vperm.xlu0 %1839, %v1690_v20  }
 0x3f9   : > { %1138 = vperm.xlu1 %1850, %v1120_v21   ;;  %1133 = vperm.xlu0 %1839, %v1119_v22  }
 0x3fd   : > { %1359 = vperm.xlu1 %1850, %v1711_v23   ;;  %1354 = vperm.xlu0 %1839, %v1710_v24   ;;  %v1706_v23 = vld [vmem:[%s2266_s10 + $0x30] sm:$0xff]  ;;  %v1707_v24 = vld [vmem:[%s2266_s10 + $0x38] sm:$0xff] }
 0x401   : > { %1423 = vperm.xlu1 %1850, %v1420_v25   ;;  %1474 = vperm.xlu0 %1839, %v1471_v26   ;;  %v1337_v26 = vpack.c.bf16 %v1707_v24, %v1706_v23 }
 0x457   : > { %v1853_v28 = vpop.permute.xlu0 %1852  ;;  %v1858_v32 = vpop.permute.xlu1 %1857 }
 0x458   : > { %v1855_v29 = vunpack.i.h.bf16 %v1853_v28  ;;  %v1854_v30 = vunpack.i.l.bf16 %v1853_v28  ;;  %v1860_v35 = vunpack.i.h.bf16 %v1858_v32  ;;  %v1859_v36 = vunpack.i.l.bf16 %v1858_v32 }
 0x45a   : > { %v1695_v33 = vpack.c.bf16 %v1855_v29, %v1854_v30  ;;  %v1698_v37 = vpack.c.bf16 %v1860_v35, %v1859_v36 }
 0x45c   : > { %1795 = vmatprep.subr.msk.bf16.mxu1 %vm1694_vm14, %v1695_v33 }
 0x45d   : > { %1796 = vmatpush3.bf16.msk.msra.mxu1 %vm1694_vm14, %v1695_v33 }
 0x45e   : > { %1797 = vmatprep.subr.bf16.mxu1 %v1229_v11 }
 0x461   : > { %1798 = vmatpush3.bf16.msra.mxu1 %v1229_v11 }
 0x462   : > { %1799 = vmatprep.subr.msk.bf16.mxu1 %vm1697_vm1, %v1698_v37 }
 0x464   : > { %v894_v47 = vpop.permute.xlu0 %893  ;;  %v899_v49 = vpop.permute.xlu1 %898 }
 0x465   : > { %1800 = vmatpush3.bf16.msk.msra.mxu1 %vm1697_vm1, %v1698_v37  ;;  %v973_v53 = vadd.f32 %v1777_v45, %v894_v47  ;;  %v976_v60 = vadd.f32 %v1778_v48, %v899_v49 }
 0x466   : > { %1811 = vmatprep.subr.bf16.mxu1 %v1895_v0 }
 0x468   : > { %1802 = vmatmul.mubr.msk.bf16.vlgmr.msra.gmra.mxu1 %vm1034_vm7, %v1227_v39  ;;  %v1249_v51 = vpop.permute.xlu0 %1248  ;;  %v1254_v58 = vpop.permute.xlu1 %1253 }
 0x469   : > { %1813 = vmatprep.mubr.msk.bf16.mxu1 %vm1896_vm0, %v1895_v0 }
 0x46c   : > { %v884_v2 = vpop.permute.xlu0 %883  ;;  %v889_v5 = vpop.permute.xlu1 %888 }
 0x46d   : > { %v965_v10 = vadd.f32 %v964_v46, %v884_v2  ;;  %v968_v13 = vadd.f32 %v967_v50, %v889_v5  ;;  %v1470_v46 = vpack.c.bf16 %v1469_v43, %v1469_v43 }
 0x470   : > { %v1239_v6 = vpop.permute.xlu0 %1238  ;;  %v1244_v9 = vpop.permute.xlu1 %1243 }
 0x474   : > { %v1134_v27 = vpop.permute.xlu0 %1133  ;;  %v1139_v28 = vpop.permute.xlu1 %1138 }
 0x475   : > { %v1194_v36 = vadd.f32 %v2152_v3, %v1139_v28  ;;  %v1191_v37 = vadd.f32 %v2150_v63, %v1134_v27 }
 0x478   : > { %v1355_v30 = vpop.permute.xlu0 %1354  ;;  %v1360_v33 = vpop.permute.xlu1 %1359 }
 0x47c   : > { %v1475_v63 = vpop.permute.xlu0 %1474 }
 0x528   : > { %v1803_v52 = vpop.f32.mrf.mxu1 }
 0x529   : > { %v1305_v55 = vadd.f32 %v1803_v52, %v1249_v51 }
 0x52a   : > { %v1296_v56 = vpop.f32.mrf.mxu1 }
 0x52b   : > { %v1313_v57 = vadd.f32 %v1305_v55, %v973_v53  ;;  %v1297_v8 = vadd.f32 %v1296_v56, %v1239_v6 }
 0x52c   : > { %v1804_v59 = vpop.f32.mrf.mxu1 }
 0x52d   : > { %v1702_v61 = vmul.f32 -1.442695, %v1313_v57  ;;  %v1308_v62 = vadd.f32 %v1804_v59, %v1254_v58  ;;  %v1311_v41 = vadd.f32 %v1297_v8, %v965_v10  ;;  %v1424_v58 = vpop.permute.xlu1 %1423 }
 0x52e   : > { %v1299_v7 = vpop.f32.mrf.mxu1 }
 0x52f   : > { %1873 = vpow2.f32 %v1702_v61  ;;  %v1314_v1 = vadd.f32 %v1308_v62, %v976_v60  ;;  %v1300_v11 = vadd.f32 %v1299_v7, %v1244_v9 }
 0x531   : > { %v1703_v4 = vmul.f32 -1.442695, %v1314_v1  ;;  %v1312_v14 = vadd.f32 %v1300_v11, %v968_v13 }
 0x533   : > { %1875 = vpow2.f32 %v1703_v4 }
 0x534   : > { %1877 = vtanh.f32 %v1311_v41 }
 0x53c   : > { %v1874_v12 = vpop.eup %1873 }
 0x53d   : > { %v1323_v42 = vadd.f32 1.0, %v1874_v12 }
 0x53f   : > { %1879 = vrcp.f32 %v1323_v42 }
 0x540   : > { %v1876_v15 = vpop.eup %1875  ;;  %1881 = vtanh.f32 %v1312_v14 }
 0x541   : > { %v1324_v16 = vadd.f32 1.0, %v1876_v15  ;;  %v1878_v17 = vpop.eup %1877 }
 0x543   : > { %1883 = vrcp.f32 %v1324_v16 }
 0x54c   : > { %v1880_v18 = vpop.eup %1879 }
 0x54d   : > { %v1882_v19 = vpop.eup %1881  ;;  %v1329_v21 = vmul.f32 %v1880_v18, %v1878_v17 }
 0x550   : > { %v1884_v20 = vpop.eup %1883 }
 0x551   : > { %v1330_v22 = vmul.f32 %v1884_v20, %v1882_v19 }
 0x553   : > { %v1338_v25 = vpack.c.bf16 %v1330_v22, %v1329_v21 }
 0x555   : > { %1805 = vmatprep.subr.bf16.mxu0 %v1338_v25 }
 0x556   : > { %1806 = vmatpush3.bf16.msra.mxu0 %v1338_v25 }
 0x557   : > { %1817 = vmatprep.subr.bf16.mxu0 %v1895_v0 }
 0x559   : > { %1808 = vmatmul.mubr.msk.bf16.vlgmr.msra.gmra.mxu0 %vm1141_vm12, %v1337_v26 }
 0x55a   : > { %1819 = vmatprep.mubr.msk.bf16.mxu0 %vm1896_vm0, %v1895_v0  ;;  %v1417_v0 = vld [vmem:[%s2268_s12] sm:$0x7] }
 0x55b   : > { %v1418_v45 = vpack.c.bf16 %v1417_v0, %v1417_v0 }
 0x619   : > { %v1809_v29 = vpop.f32.mrf.mxu0 }
 0x61a   : > { %v1409_v32 = vadd.f32 %v1809_v29, %v1355_v30 }
 0x61b   : > { %v1402_v31 = vpop.f32.mrf.mxu0 }
 0x61c   : > { %v1415_v39 = vadd.f32 %v1409_v32, %v1191_v37 }
 0x61d   : > { %v1810_v35 = vpop.f32.mrf.mxu0 }
 0x61e   : > { %v1412_v38 = vadd.f32 %v1810_v35, %v1360_v33 }
 0x61f   : > { %v1404_v54 = vpop.f32.mrf.mxu0 }
 0x620   : > { %v1416_v40 = vadd.f32 %v1412_v38, %v1194_v36 }
 0x622   : > { %v1419_v44 = vpack.c.bf16 %v1416_v40, %v1415_v39 }
 0x624   : > { %1812 = vmatpush3.bf16.msra.mxu1 %v1419_v44  ;;  %1818 = vmatpush3.bf16.msra.mxu0 %v1419_v44 }
 0x627   : > { %1814 = vmatmul.mubr.msk.bf16.vlgmr.msra.gmra.mxu1 %vm1141_vm12, %v1418_v45  ;;  %1820 = vmatmul.mubr.msk.bf16.vlgmr.msra.gmra.mxu0 %vm1141_vm12, %v1470_v46 }
 0x6e7   : > { %v1463_v3 = vpop.f32.mrf.mxu1  ;;  %v1514_v47 = vpop.f32.mrf.mxu0 }
 0x6e8   : > { %v1515_v48 = vadd.f32 %v1514_v47, %v1475_v63  ;;  %v1464_v59 = vadd.f32 %v1463_v3, %v1424_v58 }
 0x6e9   : > { %v1821_v49 = vpop.f32.mrf.mxu0  ;;  %v1815_v50 = vpop.f32.mrf.mxu1 }
 0x6ea   : > { %v1521_v51 = vmul.f32 1.442695, %v1515_v48  ;;  %1526 = vst [vmem:[%s611_s1] sm:$0x7] %v1515_v48 }
 0x6eb   : > { %v1517_v52 = vpop.f32.mrf.mxu0  ;;  %v1466_v53 = vpop.f32.mrf.mxu1 }
 0x6ec   : > { %1885 = vpow2.f32 %v1521_v51 }
 0x6ed   : > { %v1822_v55 = vpop.f32.mrf.mxu0  ;;  %v1816_v56 = vpop.f32.mrf.mxu1 }
 0x6f9   : > { %v1886_v57 = vpop.eup %1885 }
 0x6fa   : > { %v1523_v60 = vmul.f32 %v1886_v57, %v2079_v34 }
 0x6fc   : > { %v1524_v61 = vadd.f32 %v1523_v60, %v1464_v59 }
 0x6fe   : > { %1525 = vst [vmem:[%s607_s19] sm:$0x7] %v1524_v61 }
 0x6ff PF: > { %s29_s27 = sadd.s32 1, %s1893_s27  }
 0x700   : > { %p26_p4 = scmp.ge.s32.totalorder %s29_s27, 4  }
 0x702   :  { %28 = sbr.rel (!%p26_p4) target bundleno = 4 (0x4), region = 145 }

</bundles_post_ra>
